<compile_context>
chip_gen: v7x
topology: tpu7x:2x2x1
jax: 0.10.0
libtpu: 0.0.40
codegen_flags: <defaults>
</compile_context>

<pallas_src>
import jax
import jax.numpy as jnp
from jax import lax
from jax.experimental import pallas as pl
from jax.experimental.pallas import tpu as pltpu


def _round_up(n, m):
    return (n + m - 1) // m * m


# --------------------------------------------------------------------------
# Pallas kernel
# --------------------------------------------------------------------------
def bigru_kernel(x_ref, len_ref, wih_ref, bih_ref, whh_ref, bhhn_ref,
                 out_ref, h_ref, gi_ref):
    T, Bb, Ep = x_ref.shape
    Hp6 = gi_ref.shape[-1]            # 6 * H_pad   (fwd r,z,n | bwd r,z,n)
    Hp = Hp6 // 6
    Hp3 = 3 * Hp

    # ---- hoisted input projection: ONE fused bf16 matmul for both
    #      directions and all three gates; bih (+ folded bhh_r, bhh_z)
    #      added once, result stored once as bf16 -------------------------
    x2 = x_ref[...].reshape(T * Bb, Ep)                              # bf16
    gi = jnp.dot(x2, wih_ref[...], preferred_element_type=jnp.float32)
    gi = gi + bih_ref[...]                                           # f32
    gi_ref[...] = gi.astype(jnp.bfloat16).reshape(T, Bb, Hp6)

    lengths = len_ref[...]                                           # (Bb,1) i32
    whh = whh_ref[...]                                  # (2Hp, 6Hp) bf16 blockdiag
    bhh_nf = bhhn_ref[:, pl.ds(0, Hp)]                  # (1, Hp) f32
    bhh_nb = bhhn_ref[:, pl.ds(Hp, Hp)]                 # (1, Hp) f32

    def body(i, carry):
        h_f, h_b = carry
        tf = i
        tb = T - 1 - i

        # one K=2Hp recurrent matmul covers both directions (block-diag W)
        h_cat = jnp.concatenate([h_f, h_b], axis=1).astype(jnp.bfloat16)
        gh = jnp.dot(h_cat, whh, preferred_element_type=jnp.float32)  # (Bb,6Hp)

        gi_f = gi_ref[tf, :, pl.ds(0, Hp3)].astype(jnp.float32)
        gi_b = gi_ref[tb, :, pl.ds(Hp3, Hp3)].astype(jnp.float32)

        # PyTorch GRUCell: gates [r, z, n]; bhh_r/bhh_z already in gi.
        r_f = jax.nn.sigmoid(gi_f[:, :Hp] + gh[:, :Hp])
        z_f = jax.nn.sigmoid(gi_f[:, Hp:2 * Hp] + gh[:, Hp:2 * Hp])
        n_f = jnp.tanh(gi_f[:, 2 * Hp:] + r_f * (gh[:, 2 * Hp:Hp3] + bhh_nf))
        hf_new = (1.0 - z_f) * n_f + z_f * h_f

        r_b = jax.nn.sigmoid(gi_b[:, :Hp] + gh[:, Hp3:Hp3 + Hp])
        z_b = jax.nn.sigmoid(gi_b[:, Hp:2 * Hp] + gh[:, Hp3 + Hp:Hp3 + 2 * Hp])
        n_b = jnp.tanh(gi_b[:, 2 * Hp:] + r_b * (gh[:, Hp3 + 2 * Hp:] + bhh_nb))
        hb_new = (1.0 - z_b) * n_b + z_b * h_b

        vf = (lengths > tf).astype(jnp.float32)          # (Bb, 1)
        vb = (lengths > tb).astype(jnp.float32)
        # lane-dense (8 x 128) stores; padded / out-of-length rows -> exact 0
        out_ref[tf, :, pl.ds(0, Hp)] = vf * hf_new
        out_ref[tb, :, pl.ds(Hp, Hp)] = vb * hb_new
        # keep last *valid* hidden (packed-sequence semantics)
        h_f = h_f + vf * (hf_new - h_f)
        h_b = h_b + vb * (hb_new - h_b)
        return (h_f, h_b)

    h0 = jnp.zeros((Bb, Hp), jnp.float32)
    # TODO(synk): for long T, stream gi/out in T-chunks (emit_pipeline) so the
    # resident working set stays bounded on v7x's 64 MiB VMEM.
    h_f, h_b = lax.fori_loop(0, T, body, (h0, h0), unroll=min(T, 8))
    h_ref[:, pl.ds(0, Hp)] = h_f
    h_ref[:, pl.ds(Hp, Hp)] = h_b


# --------------------------------------------------------------------------
# Wrapper (embedding gather, weight fusing/padding, layout conversion)
# --------------------------------------------------------------------------
def _fuse_gates(w3, rows_pad, Hp):
    """w3: (3, rows, H) per-gate weights -> (rows_pad, 3*Hp), zero padded."""
    _, rows, H = w3.shape
    out = jnp.zeros((rows_pad, 3 * Hp), jnp.float32)
    for g in range(3):
        out = out.at[:rows, g * Hp:g * Hp + H].set(w3[g])
    return out


def _fuse_bias(b3, Hp, gates=(0, 1, 2)):
    """b3: (3, H) per-gate bias -> (1, 3*Hp), zero padded, selected gates."""
    _, H = b3.shape
    out = jnp.zeros((1, 3 * Hp), jnp.float32)
    for g in gates:
        out = out.at[0, g * Hp:g * Hp + H].set(b3[g])
    return out


@jax.jit
def nmt_encoder_forward(params, x_in, x_lengths):
    """Replicates NMTEncoder.forward. Returns (x_unpacked, x_birnn_h)."""
    B, T = x_in.shape
    V, E = params["embedding"].shape
    H = params["whh_f"].shape[-1]

    Bp = _round_up(B, 8)
    Ep = _round_up(E, 128)
    Hp = _round_up(H, 128)
    BB = 8                                  # batch tile; grid axis is "parallel"

    # --- embedding: gather straight into the time-major bf16 layout ---------
    # (no f32 pad/transpose round trip of the activation; padding_idx row is 0)
    emb_pad = jnp.zeros((V, Ep), jnp.bfloat16).at[:, :E].set(
        params["embedding"].astype(jnp.bfloat16))
    tok_tm = jnp.zeros((T, Bp), jnp.int32).at[:, :B].set(
        jnp.transpose(x_in).astype(jnp.int32))            # padded rows -> id 0
    x_tm = jnp.take(emb_pad, tok_tm, axis=0)              # (T, Bp, Ep) bf16
    # TODO(synk): for large vocab, fuse this gather into the kernel
    # (PrefetchScalarGridSpec + pl.Element row gather) to drop the HBM bounce.

    # padded batch rows get length 0 -> always masked
    lengths = jnp.zeros((Bp, 1), jnp.int32).at[:B, 0].set(
        x_lengths.astype(jnp.int32))

    # --- fused + padded weights (gate order r,z,n; columns fwd|bwd) ---------
    wih_all = jnp.concatenate(
        [_fuse_gates(params["wih_f"], Ep, Hp),
         _fuse_gates(params["wih_b"], Ep, Hp)], axis=1).astype(jnp.bfloat16)
    # bhh_r / bhh_z folded into the hoisted bias; only bhh_n stays per-step
    bih_all = jnp.concatenate(
        [_fuse_bias(params["bih_f"], Hp) + _fuse_bias(params["bhh_f"], Hp, (0, 1)),
         _fuse_bias(params["bih_b"], Hp) + _fuse_bias(params["bhh_b"], Hp, (0, 1))],
        axis=1)                                            # (1, 6Hp) f32
    # block-diagonal recurrent weight: one K=2Hp matmul per step (v6e/v7x MXU)
    whh_blk = jnp.zeros((2 * Hp, 6 * Hp), jnp.float32)
    whh_blk = whh_blk.at[:Hp, :3 * Hp].set(_fuse_gates(params["whh_f"], Hp, Hp))
    whh_blk = whh_blk.at[Hp:, 3 * Hp:].set(_fuse_gates(params["whh_b"], Hp, Hp))
    whh_blk = whh_blk.astype(jnp.bfloat16)
    bhh_n = jnp.zeros((1, 2 * Hp), jnp.float32)
    bhh_n = bhh_n.at[0, :H].set(params["bhh_f"][2])
    bhh_n = bhh_n.at[0, Hp:Hp + H].set(params["bhh_b"][2])

    grid = (Bp // BB,)
    in_specs = [
        pl.BlockSpec((T, BB, Ep), lambda i: (0, i, 0)),        # activations
        pl.BlockSpec((BB, 1), lambda i: (i, 0)),               # lengths
        pl.BlockSpec((Ep, 6 * Hp), lambda i: (0, 0)),          # wih (resident)
        pl.BlockSpec((1, 6 * Hp), lambda i: (0, 0)),           # bih (+bhh_rz)
        pl.BlockSpec((2 * Hp, 6 * Hp), lambda i: (0, 0)),      # whh block-diag
        pl.BlockSpec((1, 2 * Hp), lambda i: (0, 0)),           # bhh_n
    ]
    out_shape = (
        jax.ShapeDtypeStruct((T, Bp, 2 * Hp), jnp.float32),    # fwd|bwd outputs
        jax.ShapeDtypeStruct((Bp, 2 * Hp), jnp.float32),       # final fwd|bwd h
    )
    out_specs = (
        pl.BlockSpec((T, BB, 2 * Hp), lambda i: (0, i, 0)),
        pl.BlockSpec((BB, 2 * Hp), lambda i: (i, 0)),
    )

    out, h_out = pl.pallas_call(
        bigru_kernel,
        grid=grid,
        in_specs=in_specs,
        out_specs=out_specs,
        out_shape=out_shape,
        scratch_shapes=[pltpu.VMEM((T, BB, 6 * Hp), jnp.bfloat16)],  # single gi
        compiler_params=pltpu.CompilerParams(
            dimension_semantics=("parallel",),
            vmem_limit_bytes=64 * 1024 * 1024),
    )(x_tm, lengths, wih_all, bih_all, whh_blk, bhh_n)

    # strip padding, convert to batch_first, concat directions
    x_unpacked = jnp.concatenate(
        [out[:, :B, :H], out[:, :B, Hp:Hp + H]], axis=-1).transpose(1, 0, 2)
    x_birnn_h = jnp.concatenate(
        [h_out[:B, :H], h_out[:B, Hp:Hp + H]], axis=-1)
    # TODO(synk): pad_packed_sequence pads only to max(x_lengths); here the
    # output is padded to the static T (demo uses max(x_lengths) == T).
    return x_unpacked, x_birnn_h


# --------------------------------------------------------------------------
# Parameters + pure-JAX reference (f32) for correctness checking
# --------------------------------------------------------------------------
def init_params(key, input_size, embedding_size, hidden_size, padding_idx):
    ks = jax.random.split(key, 9)
    scale = 1.0 / jnp.sqrt(jnp.float32(hidden_size))

    def u(k, shape):
        return jax.random.uniform(k, shape, jnp.float32, -scale, scale)

    emb = jax.random.normal(ks[0], (input_size, embedding_size),
                            jnp.float32) * 0.1
    emb = emb.at[padding_idx].set(0.0)   # nn.Embedding padding_idx semantics

    return dict(
        embedding=emb,
        # gate order [r, z, n], stored pre-transposed as (3, in_dim, H)
        wih_f=u(ks[1], (3, embedding_size, hidden_size)),
        whh_f=u(ks[2], (3, hidden_size, hidden_size)),
        bih_f=u(ks[3], (3, hidden_size)),
        bhh_f=u(ks[4], (3, hidden_size)),
        wih_b=u(ks[5], (3, embedding_size, hidden_size)),
        whh_b=u(ks[6], (3, hidden_size, hidden_size)),
        bih_b=u(ks[7], (3, hidden_size)),
        bhh_b=u(ks[8], (3, hidden_size)),
    )


def _reference_forward(params, x_in, x_lengths):
    x_emb = jnp.take(params["embedding"], x_in, axis=0)   # (B, T, E)
    B, T, _ = x_emb.shape
    H = params["whh_f"].shape[-1]

    def cell(x_t, h, w_ih, w_hh, b_ih, b_hh):
        r = jax.nn.sigmoid(x_t @ w_ih[0] + b_ih[0] + h @ w_hh[0] + b_hh[0])
        z = jax.nn.sigmoid(x_t @ w_ih[1] + b_ih[1] + h @ w_hh[1] + b_hh[1])
        n = jnp.tanh(x_t @ w_ih[2] + b_ih[2] + r * (h @ w_hh[2] + b_hh[2]))
        return (1.0 - z) * n + z * h

    outs_f = []
    h = jnp.zeros((B, H), jnp.float32)
    for t in range(T):
        h_new = cell(x_emb[:, t], h, params["wih_f"], params["whh_f"],
                     params["bih_f"], params["bhh_f"])
        v = (x_lengths > t).astype(jnp.float32)[:, None]
        outs_f.append(v * h_new)
        h = h + v * (h_new - h)
    h_f = h

    outs_b = [None] * T
    h = jnp.zeros((B, H), jnp.float32)
    for t in range(T - 1, -1, -1):
        h_new = cell(x_emb[:, t], h, params["wih_b"], params["whh_b"],
                     params["bih_b"], params["bhh_b"])
        v = (x_lengths > t).astype(jnp.float32)[:, None]
        outs_b[t] = v * h_new
        h = h + v * (h_new - h)
    h_b = h

    out = jnp.concatenate([jnp.stack(outs_f, 1), jnp.stack(outs_b, 1)], -1)
    return out, jnp.concatenate([h_f, h_b], -1)


if __name__ == "__main__":
    INPUT_SIZE = 20        # vocab size
    EMBEDDING_SIZE = 16
    HIDDEN_SIZE = 32
    PADDING_IDX = 0
    B, T = 2, 8

    key = jax.random.PRNGKey(0)
    k_params, k_tokens = jax.random.split(key)

    params = init_params(k_params, INPUT_SIZE, EMBEDDING_SIZE,
                         HIDDEN_SIZE, PADDING_IDX)

    # Token ids; lengths sorted descending (pack_padded_sequence default).
    x_in = jax.random.randint(k_tokens, (B, T), 1, INPUT_SIZE, dtype=jnp.int32)
    x_lengths = jnp.array([8, 5], dtype=jnp.int32)
    x_in = x_in.at[1, 5:].set(PADDING_IDX)   # pad tail of shorter sequence

    x_unpacked, x_birnn_h = nmt_encoder_forward(params, x_in, x_lengths)
    jax.block_until_ready((x_unpacked, x_birnn_h))

    assert x_unpacked.shape == (B, T, 2 * HIDDEN_SIZE)
    assert x_birnn_h.shape == (B, 2 * HIDDEN_SIZE)
    # padded positions of the shorter sequence must be exactly zero
    assert bool(jnp.all(x_unpacked[1, 5:] == 0.0))

    # correctness vs. f32 pure-JAX reference (bf16 MXU + bf16 gi -> loose tol)
    ref_out, ref_h = _reference_forward(params, x_in, x_lengths)
    err_out = float(jnp.max(jnp.abs(x_unpacked - ref_out)))
    err_h = float(jnp.max(jnp.abs(x_birnn_h - ref_h)))
    assert err_out < 5e-2 and err_h < 5e-2, (err_out, err_h)

    print("KERNEL_OK")
</pallas_src>

<mosaic_0001>
module attributes {stable_mosaic.version = 11 : i64} {
  func.func @bigru_kernel(%arg0: i32, %arg1: memref<8x8x128xbf16, #tpu.memory_space<vmem>>, %arg2: memref<8x1xi32, #tpu.memory_space<vmem>>, %arg3: memref<128x768xbf16, #tpu.memory_space<vmem>>, %arg4: memref<1x768xf32, #tpu.memory_space<vmem>>, %arg5: memref<256x768xbf16, #tpu.memory_space<vmem>>, %arg6: memref<1x256xf32, #tpu.memory_space<vmem>>, %arg7: memref<8x8x256xf32, #tpu.memory_space<vmem>>, %arg8: memref<8x256xf32, #tpu.memory_space<vmem>>, %arg9: memref<8x8x768xbf16, #tpu.memory_space<vmem>>) attributes {dimension_semantics = [#tpu.dimension_semantics<parallel>], iteration_bounds = array<i64: 1>, scalar_prefetch = 0 : i64, scratch_operands = 1 : i64, tpu.core_type = #tpu.core_type<tc>, window_params = [{transform_indices = @transform_0, window_bounds = array<i64: 8, 8, 128>}, {transform_indices = @transform_1, window_bounds = array<i64: 8, 1>}, {pipeline_mode = #tpu.pipeline_mode<synchronous>, transform_indices = @transform_2, window_bounds = array<i64: 128, 768>}, {pipeline_mode = #tpu.pipeline_mode<synchronous>, transform_indices = @transform_3, window_bounds = array<i64: 1, 768>}, {pipeline_mode = #tpu.pipeline_mode<synchronous>, transform_indices = @transform_4, window_bounds = array<i64: 256, 768>}, {pipeline_mode = #tpu.pipeline_mode<synchronous>, transform_indices = @transform_5, window_bounds = array<i64: 1, 256>}, {transform_indices = @transform_6, window_bounds = array<i64: 8, 8, 256>}, {transform_indices = @transform_7, window_bounds = array<i64: 8, 256>}]} {
    %c0 = arith.constant 0 : index
    %c0_0 = arith.constant 0 : index
    %c0_1 = arith.constant 0 : index
    %0 = vector.load %arg1[%c0, %c0_0, %c0_1] : memref<8x8x128xbf16, #tpu.memory_space<vmem>>, vector<8x8x128xbf16>
    %1 = vector.shape_cast %0 : vector<8x8x128xbf16> to vector<64x128xbf16>
    %c0_2 = arith.constant 0 : index
    %c0_3 = arith.constant 0 : index
    %2 = vector.load %arg3[%c0_2, %c0_3] : memref<128x768xbf16, #tpu.memory_space<vmem>>, vector<128x768xbf16>
    %cst = arith.constant dense<0.000000e+00> : vector<64x768xf32>
    %3 = tpu.matmul %1, %2, %cst {dimension_numbers = #tpu.dot_dimension_numbers<[1], [0], [0], [1], [0, 0, 1, 1], [], []>} : vector<64x128xbf16>, vector<128x768xbf16>, vector<64x768xf32> -> vector<64x768xf32>
    %c0_4 = arith.constant 0 : index
    %c0_5 = arith.constant 0 : index
    %4 = vector.load %arg4[%c0_4, %c0_5] : memref<1x768xf32, #tpu.memory_space<vmem>>, vector<1x768xf32>
    %5 = vector.broadcast %4 : vector<1x768xf32> to vector<64x768xf32>
    %6 = arith.addf %3, %5 : vector<64x768xf32>
    %7 = arith.truncf %6 : vector<64x768xf32> to vector<64x768xbf16>
    %8 = vector.shape_cast %7 : vector<64x768xbf16> to vector<8x8x768xbf16>
    %c0_6 = arith.constant 0 : index
    %c0_7 = arith.constant 0 : index
    %c0_8 = arith.constant 0 : index
    %9 = vector.load %arg9[%c0_6, %c0_7, %c0_8] : memref<8x8x768xbf16, #tpu.memory_space<vmem>>, vector<8x8x768xbf16>
    tpu.vector_store %arg9[%c0_6, %c0_7, %c0_8], %8 {strides = array<i32>} : memref<8x8x768xbf16, #tpu.memory_space<vmem>>, vector<8x8x768xbf16>,
    %c0_9 = arith.constant 0 : index
    %c0_10 = arith.constant 0 : index
    %10 = vector.load %arg2[%c0_9, %c0_10] : memref<8x1xi32, #tpu.memory_space<vmem>>, vector<8x1xi32>
    %c0_11 = arith.constant 0 : index
    %c0_12 = arith.constant 0 : index
    %11 = vector.load %arg5[%c0_11, %c0_12] : memref<256x768xbf16, #tpu.memory_space<vmem>>, vector<256x768xbf16>
    %c0_13 = arith.constant 0 : index
    %c0_14 = arith.constant 0 : index
    %12 = vector.load %arg6[%c0_13, %c0_14] : memref<1x256xf32, #tpu.memory_space<vmem>>, vector<1x128xf32>
    %c0_15 = arith.constant 0 : index
    %c128 = arith.constant 128 : index
    %13 = vector.load %arg6[%c0_15, %c128] : memref<1x256xf32, #tpu.memory_space<vmem>>, vector<1x128xf32>
    %cst_16 = arith.constant 0.000000e+00 : f32
    %14 = vector.broadcast %cst_16 : f32 to vector<8x128xf32>
    %c0_i32 = arith.constant 0 : i32
    %c7_i32 = arith.constant 7 : i32
    %15 = arith.subi %c7_i32, %c0_i32 : i32
    %16 = tpu.concatenate %14, %14 in 1 : vector<8x128xf32>, vector<8x128xf32> -> vector<8x256xf32>
    %17 = arith.truncf %16 : vector<8x256xf32> to vector<8x256xbf16>
    %cst_17 = arith.constant dense<0.000000e+00> : vector<8x768xf32>
    %18 = tpu.matmul %17, %11, %cst_17 {dimension_numbers = #tpu.dot_dimension_numbers<[1], [0], [0], [1], [0, 0, 1, 1], [], []>} : vector<8x256xbf16>, vector<256x768xbf16>, vector<8x768xf32> -> vector<8x768xf32>
    %19 = arith.index_cast %c0_i32 : i32 to index
    %c0_18 = arith.constant 0 : index
    %c0_19 = arith.constant 0 : index
    %20 = vector.load %arg9[%19, %c0_18, %c0_19] : memref<8x8x768xbf16, #tpu.memory_space<vmem>>, vector<1x8x384xbf16>
    %21 = vector.shape_cast %20 : vector<1x8x384xbf16> to vector<8x384xbf16>
    %22 = arith.extf %21 : vector<8x384xbf16> to vector<8x384xf32>
    %23 = arith.index_cast %15 : i32 to index
    %c0_20 = arith.constant 0 : index
    %c384 = arith.constant 384 : index
    %24 = vector.load %arg9[%23, %c0_20, %c384] : memref<8x8x768xbf16, #tpu.memory_space<vmem>>, vector<1x8x384xbf16>
    %25 = vector.shape_cast %24 : vector<1x8x384xbf16> to vector<8x384xbf16>
    %26 = arith.extf %25 : vector<8x384xbf16> to vector<8x384xf32>
    %27 = vector.extract_strided_slice %22 {offsets = [0, 0], sizes = [8, 128], strides = [1, 1]} : vector<8x384xf32> to vector<8x128xf32>
    %28 = vector.extract_strided_slice %18 {offsets = [0, 0], sizes = [8, 128], strides = [1, 1]} : vector<8x768xf32> to vector<8x128xf32>
    %29 = arith.addf %27, %28 : vector<8x128xf32>
    %30 = arith.negf %29 : vector<8x128xf32>
    %31 = math.exp %30 : vector<8x128xf32>
    %cst_21 = arith.constant 1.000000e+00 : f32
    %32 = vector.broadcast %cst_21 : f32 to vector<8x128xf32>
    %33 = arith.addf %32, %31 : vector<8x128xf32>
    %34 = arith.divf %32, %33 : vector<8x128xf32>
    %35 = vector.extract_strided_slice %22 {offsets = [0, 128], sizes = [8, 128], strides = [1, 1]} : vector<8x384xf32> to vector<8x128xf32>
    %36 = vector.extract_strided_slice %18 {offsets = [0, 128], sizes = [8, 128], strides = [1, 1]} : vector<8x768xf32> to vector<8x128xf32>
    %37 = arith.addf %35, %36 : vector<8x128xf32>
    %38 = arith.negf %37 : vector<8x128xf32>
    %39 = math.exp %38 : vector<8x128xf32>
    %cst_22 = arith.constant 1.000000e+00 : f32
    %40 = vector.broadcast %cst_22 : f32 to vector<8x128xf32>
    %41 = arith.addf %40, %39 : vector<8x128xf32>
    %42 = arith.divf %40, %41 : vector<8x128xf32>
    %43 = vector.extract_strided_slice %22 {offsets = [0, 256], sizes = [8, 128], strides = [1, 1]} : vector<8x384xf32> to vector<8x128xf32>
    %44 = vector.extract_strided_slice %18 {offsets = [0, 256], sizes = [8, 128], strides = [1, 1]} : vector<8x768xf32> to vector<8x128xf32>
    %45 = vector.broadcast %12 : vector<1x128xf32> to vector<8x128xf32>
    %46 = arith.addf %44, %45 : vector<8x128xf32>
    %47 = arith.mulf %34, %46 : vector<8x128xf32>
    %48 = arith.addf %43, %47 : vector<8x128xf32>
    %49 = math.tanh %48 : vector<8x128xf32>
    %cst_23 = arith.constant 1.000000e+00 : f32
    %50 = vector.broadcast %cst_23 : f32 to vector<8x128xf32>
    %51 = arith.subf %50, %42 : vector<8x128xf32>
    %52 = arith.mulf %51, %49 : vector<8x128xf32>
    %53 = arith.mulf %42, %14 : vector<8x128xf32>
    %54 = arith.addf %52, %53 : vector<8x128xf32>
    %55 = vector.extract_strided_slice %26 {offsets = [0, 0], sizes = [8, 128], strides = [1, 1]} : vector<8x384xf32> to vector<8x128xf32>
    %56 = vector.extract_strided_slice %18 {offsets = [0, 384], sizes = [8, 128], strides = [1, 1]} : vector<8x768xf32> to vector<8x128xf32>
    %57 = arith.addf %55, %56 : vector<8x128xf32>
    %58 = arith.negf %57 : vector<8x128xf32>
    %59 = math.exp %58 : vector<8x128xf32>
    %cst_24 = arith.constant 1.000000e+00 : f32
    %60 = vector.broadcast %cst_24 : f32 to vector<8x128xf32>
    %61 = arith.addf %60, %59 : vector<8x128xf32>
    %62 = arith.divf %60, %61 : vector<8x128xf32>
    %63 = vector.extract_strided_slice %26 {offsets = [0, 128], sizes = [8, 128], strides = [1, 1]} : vector<8x384xf32> to vector<8x128xf32>
    %64 = vector.extract_strided_slice %18 {offsets = [0, 512], sizes = [8, 128], strides = [1, 1]} : vector<8x768xf32> to vector<8x128xf32>
    %65 = arith.addf %63, %64 : vector<8x128xf32>
    %66 = arith.negf %65 : vector<8x128xf32>
    %67 = math.exp %66 : vector<8x128xf32>
    %cst_25 = arith.constant 1.000000e+00 : f32
    %68 = vector.broadcast %cst_25 : f32 to vector<8x128xf32>
    %69 = arith.addf %68, %67 : vector<8x128xf32>
    %70 = arith.divf %68, %69 : vector<8x128xf32>
    %71 = vector.extract_strided_slice %26 {offsets = [0, 256], sizes = [8, 128], strides = [1, 1]} : vector<8x384xf32> to vector<8x128xf32>
    %72 = vector.extract_strided_slice %18 {offsets = [0, 640], sizes = [8, 128], strides = [1, 1]} : vector<8x768xf32> to vector<8x128xf32>
    %73 = vector.broadcast %13 : vector<1x128xf32> to vector<8x128xf32>
    %74 = arith.addf %72, %73 : vector<8x128xf32>
    %75 = arith.mulf %62, %74 : vector<8x128xf32>
    %76 = arith.addf %71, %75 : vector<8x128xf32>
    %77 = math.tanh %76 : vector<8x128xf32>
    %cst_26 = arith.constant 1.000000e+00 : f32
    %78 = vector.broadcast %cst_26 : f32 to vector<8x128xf32>
    %79 = arith.subf %78, %70 : vector<8x128xf32>
    %80 = arith.mulf %79, %77 : vector<8x128xf32>
    %81 = arith.mulf %70, %14 : vector<8x128xf32>
    %82 = arith.addf %80, %81 : vector<8x128xf32>
    %83 = vector.broadcast %c0_i32 : i32 to vector<8x1xi32>
    %84 = arith.cmpi sgt, %10, %83 : vector<8x1xi32>
    %85 = arith.extui %84 : vector<8x1xi1> to vector<8x1xi32>
    %86 = arith.sitofp %85 : vector<8x1xi32> to vector<8x1xf32>
    %87 = vector.broadcast %15 : i32 to vector<8x1xi32>
    %88 = arith.cmpi sgt, %10, %87 : vector<8x1xi32>
    %89 = arith.extui %88 : vector<8x1xi1> to vector<8x1xi32>
    %90 = arith.sitofp %89 : vector<8x1xi32> to vector<8x1xf32>
    %91 = vector.broadcast %86 : vector<8x1xf32> to vector<8x128xf32>
    %92 = arith.mulf %91, %54 : vector<8x128xf32>
    %93 = arith.index_cast %c0_i32 : i32 to index
    %c0_27 = arith.constant 0 : index
    %c0_28 = arith.constant 0 : index
    %94 = vector.load %arg7[%93, %c0_27, %c0_28] : memref<8x8x256xf32, #tpu.memory_space<vmem>>, vector<1x8x128xf32>
    %95 = vector.shape_cast %94 : vector<1x8x128xf32> to vector<8x128xf32>
    %96 = vector.shape_cast %92 : vector<8x128xf32> to vector<1x8x128xf32>
    tpu.vector_store %arg7[%93, %c0_27, %c0_28], %96 {strides = array<i32>} : memref<8x8x256xf32, #tpu.memory_space<vmem>>, vector<1x8x128xf32>,
    %97 = vector.broadcast %90 : vector<8x1xf32> to vector<8x128xf32>
    %98 = arith.mulf %97, %82 : vector<8x128xf32>
    %99 = arith.index_cast %15 : i32 to index
    %c0_29 = arith.constant 0 : index
    %c128_30 = arith.constant 128 : index
    %100 = vector.load %arg7[%99, %c0_29, %c128_30] : memref<8x8x256xf32, #tpu.memory_space<vmem>>, vector<1x8x128xf32>
    %101 = vector.shape_cast %100 : vector<1x8x128xf32> to vector<8x128xf32>
    %102 = vector.shape_cast %98 : vector<8x128xf32> to vector<1x8x128xf32>
    tpu.vector_store %arg7[%99, %c0_29, %c128_30], %102 {strides = array<i32>} : memref<8x8x256xf32, #tpu.memory_space<vmem>>, vector<1x8x128xf32>,
    %103 = arith.subf %54, %14 : vector<8x128xf32>
    %104 = vector.broadcast %86 : vector<8x1xf32> to vector<8x128xf32>
    %105 = arith.mulf %104, %103 : vector<8x128xf32>
    %106 = arith.addf %14, %105 : vector<8x128xf32>
    %107 = arith.subf %82, %14 : vector<8x128xf32>
    %108 = vector.broadcast %90 : vector<8x1xf32> to vector<8x128xf32>
    %109 = arith.mulf %108, %107 : vector<8x128xf32>
    %110 = arith.addf %14, %109 : vector<8x128xf32>
    %c1_i32 = arith.constant 1 : i32
    %c7_i32_31 = arith.constant 7 : i32
    %111 = arith.subi %c7_i32_31, %c1_i32 : i32
    %112 = tpu.concatenate %106, %110 in 1 : vector<8x128xf32>, vector<8x128xf32> -> vector<8x256xf32>
    %113 = arith.truncf %112 : vector<8x256xf32> to vector<8x256xbf16>
    %cst_32 = arith.constant dense<0.000000e+00> : vector<8x768xf32>
    %114 = tpu.matmul %113, %11, %cst_32 {dimension_numbers = #tpu.dot_dimension_numbers<[1], [0], [0], [1], [0, 0, 1, 1], [], []>} : vector<8x256xbf16>, vector<256x768xbf16>, vector<8x768xf32> -> vector<8x768xf32>
    %115 = arith.index_cast %c1_i32 : i32 to index
    %c0_33 = arith.constant 0 : index
    %c0_34 = arith.constant 0 : index
    %116 = vector.load %arg9[%115, %c0_33, %c0_34] : memref<8x8x768xbf16, #tpu.memory_space<vmem>>, vector<1x8x384xbf16>
    %117 = vector.shape_cast %116 : vector<1x8x384xbf16> to vector<8x384xbf16>
    %118 = arith.extf %117 : vector<8x384xbf16> to vector<8x384xf32>
    %119 = arith.index_cast %111 : i32 to index
    %c0_35 = arith.constant 0 : index
    %c384_36 = arith.constant 384 : index
    %120 = vector.load %arg9[%119, %c0_35, %c384_36] : memref<8x8x768xbf16, #tpu.memory_space<vmem>>, vector<1x8x384xbf16>
    %121 = vector.shape_cast %120 : vector<1x8x384xbf16> to vector<8x384xbf16>
    %122 = arith.extf %121 : vector<8x384xbf16> to vector<8x384xf32>
    %123 = vector.extract_strided_slice %118 {offsets = [0, 0], sizes = [8, 128], strides = [1, 1]} : vector<8x384xf32> to vector<8x128xf32>
    %124 = vector.extract_strided_slice %114 {offsets = [0, 0], sizes = [8, 128], strides = [1, 1]} : vector<8x768xf32> to vector<8x128xf32>
    %125 = arith.addf %123, %124 : vector<8x128xf32>
    %126 = arith.negf %125 : vector<8x128xf32>
    %127 = math.exp %126 : vector<8x128xf32>
    %cst_37 = arith.constant 1.000000e+00 : f32
    %128 = vector.broadcast %cst_37 : f32 to vector<8x128xf32>
    %129 = arith.addf %128, %127 : vector<8x128xf32>
    %130 = arith.divf %128, %129 : vector<8x128xf32>
    %131 = vector.extract_strided_slice %118 {offsets = [0, 128], sizes = [8, 128], strides = [1, 1]} : vector<8x384xf32> to vector<8x128xf32>
    %132 = vector.extract_strided_slice %114 {offsets = [0, 128], sizes = [8, 128], strides = [1, 1]} : vector<8x768xf32> to vector<8x128xf32>
    %133 = arith.addf %131, %132 : vector<8x128xf32>
    %134 = arith.negf %133 : vector<8x128xf32>
    %135 = math.exp %134 : vector<8x128xf32>
    %cst_38 = arith.constant 1.000000e+00 : f32
    %136 = vector.broadcast %cst_38 : f32 to vector<8x128xf32>
    %137 = arith.addf %136, %135 : vector<8x128xf32>
    %138 = arith.divf %136, %137 : vector<8x128xf32>
    %139 = vector.extract_strided_slice %118 {offsets = [0, 256], sizes = [8, 128], strides = [1, 1]} : vector<8x384xf32> to vector<8x128xf32>
    %140 = vector.extract_strided_slice %114 {offsets = [0, 256], sizes = [8, 128], strides = [1, 1]} : vector<8x768xf32> to vector<8x128xf32>
    %141 = vector.broadcast %12 : vector<1x128xf32> to vector<8x128xf32>
    %142 = arith.addf %140, %141 : vector<8x128xf32>
    %143 = arith.mulf %130, %142 : vector<8x128xf32>
    %144 = arith.addf %139, %143 : vector<8x128xf32>
    %145 = math.tanh %144 : vector<8x128xf32>
    %cst_39 = arith.constant 1.000000e+00 : f32
    %146 = vector.broadcast %cst_39 : f32 to vector<8x128xf32>
    %147 = arith.subf %146, %138 : vector<8x128xf32>
    %148 = arith.mulf %147, %145 : vector<8x128xf32>
    %149 = arith.mulf %138, %106 : vector<8x128xf32>
    %150 = arith.addf %148, %149 : vector<8x128xf32>
    %151 = vector.extract_strided_slice %122 {offsets = [0, 0], sizes = [8, 128], strides = [1, 1]} : vector<8x384xf32> to vector<8x128xf32>
    %152 = vector.extract_strided_slice %114 {offsets = [0, 384], sizes = [8, 128], strides = [1, 1]} : vector<8x768xf32> to vector<8x128xf32>
    %153 = arith.addf %151, %152 : vector<8x128xf32>
    %154 = arith.negf %153 : vector<8x128xf32>
    %155 = math.exp %154 : vector<8x128xf32>
    %cst_40 = arith.constant 1.000000e+00 : f32
    %156 = vector.broadcast %cst_40 : f32 to vector<8x128xf32>
    %157 = arith.addf %156, %155 : vector<8x128xf32>
    %158 = arith.divf %156, %157 : vector<8x128xf32>
    %159 = vector.extract_strided_slice %122 {offsets = [0, 128], sizes = [8, 128], strides = [1, 1]} : vector<8x384xf32> to vector<8x128xf32>
    %160 = vector.extract_strided_slice %114 {offsets = [0, 512], sizes = [8, 128], strides = [1, 1]} : vector<8x768xf32> to vector<8x128xf32>
    %161 = arith.addf %159, %160 : vector<8x128xf32>
    %162 = arith.negf %161 : vector<8x128xf32>
    %163 = math.exp %162 : vector<8x128xf32>
    %cst_41 = arith.constant 1.000000e+00 : f32
    %164 = vector.broadcast %cst_41 : f32 to vector<8x128xf32>
    %165 = arith.addf %164, %163 : vector<8x128xf32>
    %166 = arith.divf %164, %165 : vector<8x128xf32>
    %167 = vector.extract_strided_slice %122 {offsets = [0, 256], sizes = [8, 128], strides = [1, 1]} : vector<8x384xf32> to vector<8x128xf32>
    %168 = vector.extract_strided_slice %114 {offsets = [0, 640], sizes = [8, 128], strides = [1, 1]} : vector<8x768xf32> to vector<8x128xf32>
    %169 = vector.broadcast %13 : vector<1x128xf32> to vector<8x128xf32>
    %170 = arith.addf %168, %169 : vector<8x128xf32>
    %171 = arith.mulf %158, %170 : vector<8x128xf32>
    %172 = arith.addf %167, %171 : vector<8x128xf32>
    %173 = math.tanh %172 : vector<8x128xf32>
    %cst_42 = arith.constant 1.000000e+00 : f32
    %174 = vector.broadcast %cst_42 : f32 to vector<8x128xf32>
    %175 = arith.subf %174, %166 : vector<8x128xf32>
    %176 = arith.mulf %175, %173 : vector<8x128xf32>
    %177 = arith.mulf %166, %110 : vector<8x128xf32>
    %178 = arith.addf %176, %177 : vector<8x128xf32>
    %179 = vector.broadcast %c1_i32 : i32 to vector<8x1xi32>
    %180 = arith.cmpi sgt, %10, %179 : vector<8x1xi32>
    %181 = arith.extui %180 : vector<8x1xi1> to vector<8x1xi32>
    %182 = arith.sitofp %181 : vector<8x1xi32> to vector<8x1xf32>
    %183 = vector.broadcast %111 : i32 to vector<8x1xi32>
    %184 = arith.cmpi sgt, %10, %183 : vector<8x1xi32>
    %185 = arith.extui %184 : vector<8x1xi1> to vector<8x1xi32>
    %186 = arith.sitofp %185 : vector<8x1xi32> to vector<8x1xf32>
    %187 = vector.broadcast %182 : vector<8x1xf32> to vector<8x128xf32>
    %188 = arith.mulf %187, %150 : vector<8x128xf32>
    %189 = arith.index_cast %c1_i32 : i32 to index
    %c0_43 = arith.constant 0 : index
    %c0_44 = arith.constant 0 : index
    %190 = vector.load %arg7[%189, %c0_43, %c0_44] : memref<8x8x256xf32, #tpu.memory_space<vmem>>, vector<1x8x128xf32>
    %191 = vector.shape_cast %190 : vector<1x8x128xf32> to vector<8x128xf32>
    %192 = vector.shape_cast %188 : vector<8x128xf32> to vector<1x8x128xf32>
    tpu.vector_store %arg7[%189, %c0_43, %c0_44], %192 {strides = array<i32>} : memref<8x8x256xf32, #tpu.memory_space<vmem>>, vector<1x8x128xf32>,
    %193 = vector.broadcast %186 : vector<8x1xf32> to vector<8x128xf32>
    %194 = arith.mulf %193, %178 : vector<8x128xf32>
    %195 = arith.index_cast %111 : i32 to index
    %c0_45 = arith.constant 0 : index
    %c128_46 = arith.constant 128 : index
    %196 = vector.load %arg7[%195, %c0_45, %c128_46] : memref<8x8x256xf32, #tpu.memory_space<vmem>>, vector<1x8x128xf32>
    %197 = vector.shape_cast %196 : vector<1x8x128xf32> to vector<8x128xf32>
    %198 = vector.shape_cast %194 : vector<8x128xf32> to vector<1x8x128xf32>
    tpu.vector_store %arg7[%195, %c0_45, %c128_46], %198 {strides = array<i32>} : memref<8x8x256xf32, #tpu.memory_space<vmem>>, vector<1x8x128xf32>,
    %199 = arith.subf %150, %106 : vector<8x128xf32>
    %200 = vector.broadcast %182 : vector<8x1xf32> to vector<8x128xf32>
    %201 = arith.mulf %200, %199 : vector<8x128xf32>
    %202 = arith.addf %106, %201 : vector<8x128xf32>
    %203 = arith.subf %178, %110 : vector<8x128xf32>
    %204 = vector.broadcast %186 : vector<8x1xf32> to vector<8x128xf32>
    %205 = arith.mulf %204, %203 : vector<8x128xf32>
    %206 = arith.addf %110, %205 : vector<8x128xf32>
    %c2_i32 = arith.constant 2 : i32
    %c7_i32_47 = arith.constant 7 : i32
    %207 = arith.subi %c7_i32_47, %c2_i32 : i32
    %208 = tpu.concatenate %202, %206 in 1 : vector<8x128xf32>, vector<8x128xf32> -> vector<8x256xf32>
    %209 = arith.truncf %208 : vector<8x256xf32> to vector<8x256xbf16>
    %cst_48 = arith.constant dense<0.000000e+00> : vector<8x768xf32>
    %210 = tpu.matmul %209, %11, %cst_48 {dimension_numbers = #tpu.dot_dimension_numbers<[1], [0], [0], [1], [0, 0, 1, 1], [], []>} : vector<8x256xbf16>, vector<256x768xbf16>, vector<8x768xf32> -> vector<8x768xf32>
    %211 = arith.index_cast %c2_i32 : i32 to index
    %c0_49 = arith.constant 0 : index
    %c0_50 = arith.constant 0 : index
    %212 = vector.load %arg9[%211, %c0_49, %c0_50] : memref<8x8x768xbf16, #tpu.memory_space<vmem>>, vector<1x8x384xbf16>
    %213 = vector.shape_cast %212 : vector<1x8x384xbf16> to vector<8x384xbf16>
    %214 = arith.extf %213 : vector<8x384xbf16> to vector<8x384xf32>
    %215 = arith.index_cast %207 : i32 to index
    %c0_51 = arith.constant 0 : index
    %c384_52 = arith.constant 384 : index
    %216 = vector.load %arg9[%215, %c0_51, %c384_52] : memref<8x8x768xbf16, #tpu.memory_space<vmem>>, vector<1x8x384xbf16>
    %217 = vector.shape_cast %216 : vector<1x8x384xbf16> to vector<8x384xbf16>
    %218 = arith.extf %217 : vector<8x384xbf16> to vector<8x384xf32>
    %219 = vector.extract_strided_slice %214 {offsets = [0, 0], sizes = [8, 128], strides = [1, 1]} : vector<8x384xf32> to vector<8x128xf32>
    %220 = vector.extract_strided_slice %210 {offsets = [0, 0], sizes = [8, 128], strides = [1, 1]} : vector<8x768xf32> to vector<8x128xf32>
    %221 = arith.addf %219, %220 : vector<8x128xf32>
    %222 = arith.negf %221 : vector<8x128xf32>
    %223 = math.exp %222 : vector<8x128xf32>
    %cst_53 = arith.constant 1.000000e+00 : f32
    %224 = vector.broadcast %cst_53 : f32 to vector<8x128xf32>
    %225 = arith.addf %224, %223 : vector<8x128xf32>
    %226 = arith.divf %224, %225 : vector<8x128xf32>
    %227 = vector.extract_strided_slice %214 {offsets = [0, 128], sizes = [8, 128], strides = [1, 1]} : vector<8x384xf32> to vector<8x128xf32>
    %228 = vector.extract_strided_slice %210 {offsets = [0, 128], sizes = [8, 128], strides = [1, 1]} : vector<8x768xf32> to vector<8x128xf32>
    %229 = arith.addf %227, %228 : vector<8x128xf32>
    %230 = arith.negf %229 : vector<8x128xf32>
    %231 = math.exp %230 : vector<8x128xf32>
    %cst_54 = arith.constant 1.000000e+00 : f32
    %232 = vector.broadcast %cst_54 : f32 to vector<8x128xf32>
    %233 = arith.addf %232, %231 : vector<8x128xf32>
    %234 = arith.divf %232, %233 : vector<8x128xf32>
    %235 = vector.extract_strided_slice %214 {offsets = [0, 256], sizes = [8, 128], strides = [1, 1]} : vector<8x384xf32> to vector<8x128xf32>
    %236 = vector.extract_strided_slice %210 {offsets = [0, 256], sizes = [8, 128], strides = [1, 1]} : vector<8x768xf32> to vector<8x128xf32>
    %237 = vector.broadcast %12 : vector<1x128xf32> to vector<8x128xf32>
    %238 = arith.addf %236, %237 : vector<8x128xf32>
    %239 = arith.mulf %226, %238 : vector<8x128xf32>
    %240 = arith.addf %235, %239 : vector<8x128xf32>
    %241 = math.tanh %240 : vector<8x128xf32>
    %cst_55 = arith.constant 1.000000e+00 : f32
    %242 = vector.broadcast %cst_55 : f32 to vector<8x128xf32>
    %243 = arith.subf %242, %234 : vector<8x128xf32>
    %244 = arith.mulf %243, %241 : vector<8x128xf32>
    %245 = arith.mulf %234, %202 : vector<8x128xf32>
    %246 = arith.addf %244, %245 : vector<8x128xf32>
    %247 = vector.extract_strided_slice %218 {offsets = [0, 0], sizes = [8, 128], strides = [1, 1]} : vector<8x384xf32> to vector<8x128xf32>
    %248 = vector.extract_strided_slice %210 {offsets = [0, 384], sizes = [8, 128], strides = [1, 1]} : vector<8x768xf32> to vector<8x128xf32>
    %249 = arith.addf %247, %248 : vector<8x128xf32>
    %250 = arith.negf %249 : vector<8x128xf32>
    %251 = math.exp %250 : vector<8x128xf32>
    %cst_56 = arith.constant 1.000000e+00 : f32
    %252 = vector.broadcast %cst_56 : f32 to vector<8x128xf32>
    %253 = arith.addf %252, %251 : vector<8x128xf32>
    %254 = arith.divf %252, %253 : vector<8x128xf32>
    %255 = vector.extract_strided_slice %218 {offsets = [0, 128], sizes = [8, 128], strides = [1, 1]} : vector<8x384xf32> to vector<8x128xf32>
    %256 = vector.extract_strided_slice %210 {offsets = [0, 512], sizes = [8, 128], strides = [1, 1]} : vector<8x768xf32> to vector<8x128xf32>
    %257 = arith.addf %255, %256 : vector<8x128xf32>
    %258 = arith.negf %257 : vector<8x128xf32>
    %259 = math.exp %258 : vector<8x128xf32>
    %cst_57 = arith.constant 1.000000e+00 : f32
    %260 = vector.broadcast %cst_57 : f32 to vector<8x128xf32>
    %261 = arith.addf %260, %259 : vector<8x128xf32>
    %262 = arith.divf %260, %261 : vector<8x128xf32>
    %263 = vector.extract_strided_slice %218 {offsets = [0, 256], sizes = [8, 128], strides = [1, 1]} : vector<8x384xf32> to vector<8x128xf32>
    %264 = vector.extract_strided_slice %210 {offsets = [0, 640], sizes = [8, 128], strides = [1, 1]} : vector<8x768xf32> to vector<8x128xf32>
    %265 = vector.broadcast %13 : vector<1x128xf32> to vector<8x128xf32>
    %266 = arith.addf %264, %265 : vector<8x128xf32>
    %267 = arith.mulf %254, %266 : vector<8x128xf32>
    %268 = arith.addf %263, %267 : vector<8x128xf32>
    %269 = math.tanh %268 : vector<8x128xf32>
    %cst_58 = arith.constant 1.000000e+00 : f32
    %270 = vector.broadcast %cst_58 : f32 to vector<8x128xf32>
    %271 = arith.subf %270, %262 : vector<8x128xf32>
    %272 = arith.mulf %271, %269 : vector<8x128xf32>
    %273 = arith.mulf %262, %206 : vector<8x128xf32>
    %274 = arith.addf %272, %273 : vector<8x128xf32>
    %275 = vector.broadcast %c2_i32 : i32 to vector<8x1xi32>
    %276 = arith.cmpi sgt, %10, %275 : vector<8x1xi32>
    %277 = arith.extui %276 : vector<8x1xi1> to vector<8x1xi32>
    %278 = arith.sitofp %277 : vector<8x1xi32> to vector<8x1xf32>
    %279 = vector.broadcast %207 : i32 to vector<8x1xi32>
    %280 = arith.cmpi sgt, %10, %279 : vector<8x1xi32>
    %281 = arith.extui %280 : vector<8x1xi1> to vector<8x1xi32>
    %282 = arith.sitofp %281 : vector<8x1xi32> to vector<8x1xf32>
    %283 = vector.broadcast %278 : vector<8x1xf32> to vector<8x128xf32>
    %284 = arith.mulf %283, %246 : vector<8x128xf32>
    %285 = arith.index_cast %c2_i32 : i32 to index
    %c0_59 = arith.constant 0 : index
    %c0_60 = arith.constant 0 : index
    %286 = vector.load %arg7[%285, %c0_59, %c0_60] : memref<8x8x256xf32, #tpu.memory_space<vmem>>, vector<1x8x128xf32>
    %287 = vector.shape_cast %286 : vector<1x8x128xf32> to vector<8x128xf32>
    %288 = vector.shape_cast %284 : vector<8x128xf32> to vector<1x8x128xf32>
    tpu.vector_store %arg7[%285, %c0_59, %c0_60], %288 {strides = array<i32>} : memref<8x8x256xf32, #tpu.memory_space<vmem>>, vector<1x8x128xf32>,
    %289 = vector.broadcast %282 : vector<8x1xf32> to vector<8x128xf32>
    %290 = arith.mulf %289, %274 : vector<8x128xf32>
    %291 = arith.index_cast %207 : i32 to index
    %c0_61 = arith.constant 0 : index
    %c128_62 = arith.constant 128 : index
    %292 = vector.load %arg7[%291, %c0_61, %c128_62] : memref<8x8x256xf32, #tpu.memory_space<vmem>>, vector<1x8x128xf32>
    %293 = vector.shape_cast %292 : vector<1x8x128xf32> to vector<8x128xf32>
    %294 = vector.shape_cast %290 : vector<8x128xf32> to vector<1x8x128xf32>
    tpu.vector_store %arg7[%291, %c0_61, %c128_62], %294 {strides = array<i32>} : memref<8x8x256xf32, #tpu.memory_space<vmem>>, vector<1x8x128xf32>,
    %295 = arith.subf %246, %202 : vector<8x128xf32>
    %296 = vector.broadcast %278 : vector<8x1xf32> to vector<8x128xf32>
    %297 = arith.mulf %296, %295 : vector<8x128xf32>
    %298 = arith.addf %202, %297 : vector<8x128xf32>
    %299 = arith.subf %274, %206 : vector<8x128xf32>
    %300 = vector.broadcast %282 : vector<8x1xf32> to vector<8x128xf32>
    %301 = arith.mulf %300, %299 : vector<8x128xf32>
    %302 = arith.addf %206, %301 : vector<8x128xf32>
    %c3_i32 = arith.constant 3 : i32
    %c7_i32_63 = arith.constant 7 : i32
    %303 = arith.subi %c7_i32_63, %c3_i32 : i32
    %304 = tpu.concatenate %298, %302 in 1 : vector<8x128xf32>, vector<8x128xf32> -> vector<8x256xf32>
    %305 = arith.truncf %304 : vector<8x256xf32> to vector<8x256xbf16>
    %cst_64 = arith.constant dense<0.000000e+00> : vector<8x768xf32>
    %306 = tpu.matmul %305, %11, %cst_64 {dimension_numbers = #tpu.dot_dimension_numbers<[1], [0], [0], [1], [0, 0, 1, 1], [], []>} : vector<8x256xbf16>, vector<256x768xbf16>, vector<8x768xf32> -> vector<8x768xf32>
    %307 = arith.index_cast %c3_i32 : i32 to index
    %c0_65 = arith.constant 0 : index
    %c0_66 = arith.constant 0 : index
    %308 = vector.load %arg9[%307, %c0_65, %c0_66] : memref<8x8x768xbf16, #tpu.memory_space<vmem>>, vector<1x8x384xbf16>
    %309 = vector.shape_cast %308 : vector<1x8x384xbf16> to vector<8x384xbf16>
    %310 = arith.extf %309 : vector<8x384xbf16> to vector<8x384xf32>
    %311 = arith.index_cast %303 : i32 to index
    %c0_67 = arith.constant 0 : index
    %c384_68 = arith.constant 384 : index
    %312 = vector.load %arg9[%311, %c0_67, %c384_68] : memref<8x8x768xbf16, #tpu.memory_space<vmem>>, vector<1x8x384xbf16>
    %313 = vector.shape_cast %312 : vector<1x8x384xbf16> to vector<8x384xbf16>
    %314 = arith.extf %313 : vector<8x384xbf16> to vector<8x384xf32>
    %315 = vector.extract_strided_slice %310 {offsets = [0, 0], sizes = [8, 128], strides = [1, 1]} : vector<8x384xf32> to vector<8x128xf32>
    %316 = vector.extract_strided_slice %306 {offsets = [0, 0], sizes = [8, 128], strides = [1, 1]} : vector<8x768xf32> to vector<8x128xf32>
    %317 = arith.addf %315, %316 : vector<8x128xf32>
    %318 = arith.negf %317 : vector<8x128xf32>
    %319 = math.exp %318 : vector<8x128xf32>
    %cst_69 = arith.constant 1.000000e+00 : f32
    %320 = vector.broadcast %cst_69 : f32 to vector<8x128xf32>
    %321 = arith.addf %320, %319 : vector<8x128xf32>
    %322 = arith.divf %320, %321 : vector<8x128xf32>
    %323 = vector.extract_strided_slice %310 {offsets = [0, 128], sizes = [8, 128], strides = [1, 1]} : vector<8x384xf32> to vector<8x128xf32>
    %324 = vector.extract_strided_slice %306 {offsets = [0, 128], sizes = [8, 128], strides = [1, 1]} : vector<8x768xf32> to vector<8x128xf32>
    %325 = arith.addf %323, %324 : vector<8x128xf32>
    %326 = arith.negf %325 : vector<8x128xf32>
    %327 = math.exp %326 : vector<8x128xf32>
    %cst_70 = arith.constant 1.000000e+00 : f32
    %328 = vector.broadcast %cst_70 : f32 to vector<8x128xf32>
    %329 = arith.addf %328, %327 : vector<8x128xf32>
    %330 = arith.divf %328, %329 : vector<8x128xf32>
    %331 = vector.extract_strided_slice %310 {offsets = [0, 256], sizes = [8, 128], strides = [1, 1]} : vector<8x384xf32> to vector<8x128xf32>
    %332 = vector.extract_strided_slice %306 {offsets = [0, 256], sizes = [8, 128], strides = [1, 1]} : vector<8x768xf32> to vector<8x128xf32>
    %333 = vector.broadcast %12 : vector<1x128xf32> to vector<8x128xf32>
    %334 = arith.addf %332, %333 : vector<8x128xf32>
    %335 = arith.mulf %322, %334 : vector<8x128xf32>
    %336 = arith.addf %331, %335 : vector<8x128xf32>
    %337 = math.tanh %336 : vector<8x128xf32>
    %cst_71 = arith.constant 1.000000e+00 : f32
    %338 = vector.broadcast %cst_71 : f32 to vector<8x128xf32>
    %339 = arith.subf %338, %330 : vector<8x128xf32>
    %340 = arith.mulf %339, %337 : vector<8x128xf32>
    %341 = arith.mulf %330, %298 : vector<8x128xf32>
    %342 = arith.addf %340, %341 : vector<8x128xf32>
    %343 = vector.extract_strided_slice %314 {offsets = [0, 0], sizes = [8, 128], strides = [1, 1]} : vector<8x384xf32> to vector<8x128xf32>
    %344 = vector.extract_strided_slice %306 {offsets = [0, 384], sizes = [8, 128], strides = [1, 1]} : vector<8x768xf32> to vector<8x128xf32>
    %345 = arith.addf %343, %344 : vector<8x128xf32>
    %346 = arith.negf %345 : vector<8x128xf32>
    %347 = math.exp %346 : vector<8x128xf32>
    %cst_72 = arith.constant 1.000000e+00 : f32
    %348 = vector.broadcast %cst_72 : f32 to vector<8x128xf32>
    %349 = arith.addf %348, %347 : vector<8x128xf32>
    %350 = arith.divf %348, %349 : vector<8x128xf32>
    %351 = vector.extract_strided_slice %314 {offsets = [0, 128], sizes = [8, 128], strides = [1, 1]} : vector<8x384xf32> to vector<8x128xf32>
    %352 = vector.extract_strided_slice %306 {offsets = [0, 512], sizes = [8, 128], strides = [1, 1]} : vector<8x768xf32> to vector<8x128xf32>
    %353 = arith.addf %351, %352 : vector<8x128xf32>
    %354 = arith.negf %353 : vector<8x128xf32>
    %355 = math.exp %354 : vector<8x128xf32>
    %cst_73 = arith.constant 1.000000e+00 : f32
    %356 = vector.broadcast %cst_73 : f32 to vector<8x128xf32>
    %357 = arith.addf %356, %355 : vector<8x128xf32>
    %358 = arith.divf %356, %357 : vector<8x128xf32>
    %359 = vector.extract_strided_slice %314 {offsets = [0, 256], sizes = [8, 128], strides = [1, 1]} : vector<8x384xf32> to vector<8x128xf32>
    %360 = vector.extract_strided_slice %306 {offsets = [0, 640], sizes = [8, 128], strides = [1, 1]} : vector<8x768xf32> to vector<8x128xf32>
    %361 = vector.broadcast %13 : vector<1x128xf32> to vector<8x128xf32>
    %362 = arith.addf %360, %361 : vector<8x128xf32>
    %363 = arith.mulf %350, %362 : vector<8x128xf32>
    %364 = arith.addf %359, %363 : vector<8x128xf32>
    %365 = math.tanh %364 : vector<8x128xf32>
    %cst_74 = arith.constant 1.000000e+00 : f32
    %366 = vector.broadcast %cst_74 : f32 to vector<8x128xf32>
    %367 = arith.subf %366, %358 : vector<8x128xf32>
    %368 = arith.mulf %367, %365 : vector<8x128xf32>
    %369 = arith.mulf %358, %302 : vector<8x128xf32>
    %370 = arith.addf %368, %369 : vector<8x128xf32>
    %371 = vector.broadcast %c3_i32 : i32 to vector<8x1xi32>
    %372 = arith.cmpi sgt, %10, %371 : vector<8x1xi32>
    %373 = arith.extui %372 : vector<8x1xi1> to vector<8x1xi32>
    %374 = arith.sitofp %373 : vector<8x1xi32> to vector<8x1xf32>
    %375 = vector.broadcast %303 : i32 to vector<8x1xi32>
    %376 = arith.cmpi sgt, %10, %375 : vector<8x1xi32>
    %377 = arith.extui %376 : vector<8x1xi1> to vector<8x1xi32>
    %378 = arith.sitofp %377 : vector<8x1xi32> to vector<8x1xf32>
    %379 = vector.broadcast %374 : vector<8x1xf32> to vector<8x128xf32>
    %380 = arith.mulf %379, %342 : vector<8x128xf32>
    %381 = arith.index_cast %c3_i32 : i32 to index
    %c0_75 = arith.constant 0 : index
    %c0_76 = arith.constant 0 : index
    %382 = vector.load %arg7[%381, %c0_75, %c0_76] : memref<8x8x256xf32, #tpu.memory_space<vmem>>, vector<1x8x128xf32>
    %383 = vector.shape_cast %382 : vector<1x8x128xf32> to vector<8x128xf32>
    %384 = vector.shape_cast %380 : vector<8x128xf32> to vector<1x8x128xf32>
    tpu.vector_store %arg7[%381, %c0_75, %c0_76], %384 {strides = array<i32>} : memref<8x8x256xf32, #tpu.memory_space<vmem>>, vector<1x8x128xf32>,
    %385 = vector.broadcast %378 : vector<8x1xf32> to vector<8x128xf32>
    %386 = arith.mulf %385, %370 : vector<8x128xf32>
    %387 = arith.index_cast %303 : i32 to index
    %c0_77 = arith.constant 0 : index
    %c128_78 = arith.constant 128 : index
    %388 = vector.load %arg7[%387, %c0_77, %c128_78] : memref<8x8x256xf32, #tpu.memory_space<vmem>>, vector<1x8x128xf32>
    %389 = vector.shape_cast %388 : vector<1x8x128xf32> to vector<8x128xf32>
    %390 = vector.shape_cast %386 : vector<8x128xf32> to vector<1x8x128xf32>
    tpu.vector_store %arg7[%387, %c0_77, %c128_78], %390 {strides = array<i32>} : memref<8x8x256xf32, #tpu.memory_space<vmem>>, vector<1x8x128xf32>,
    %391 = arith.subf %342, %298 : vector<8x128xf32>
    %392 = vector.broadcast %374 : vector<8x1xf32> to vector<8x128xf32>
    %393 = arith.mulf %392, %391 : vector<8x128xf32>
    %394 = arith.addf %298, %393 : vector<8x128xf32>
    %395 = arith.subf %370, %302 : vector<8x128xf32>
    %396 = vector.broadcast %378 : vector<8x1xf32> to vector<8x128xf32>
    %397 = arith.mulf %396, %395 : vector<8x128xf32>
    %398 = arith.addf %302, %397 : vector<8x128xf32>
    %c4_i32 = arith.constant 4 : i32
    %c7_i32_79 = arith.constant 7 : i32
    %399 = arith.subi %c7_i32_79, %c4_i32 : i32
    %400 = tpu.concatenate %394, %398 in 1 : vector<8x128xf32>, vector<8x128xf32> -> vector<8x256xf32>
    %401 = arith.truncf %400 : vector<8x256xf32> to vector<8x256xbf16>
    %cst_80 = arith.constant dense<0.000000e+00> : vector<8x768xf32>
    %402 = tpu.matmul %401, %11, %cst_80 {dimension_numbers = #tpu.dot_dimension_numbers<[1], [0], [0], [1], [0, 0, 1, 1], [], []>} : vector<8x256xbf16>, vector<256x768xbf16>, vector<8x768xf32> -> vector<8x768xf32>
    %403 = arith.index_cast %c4_i32 : i32 to index
    %c0_81 = arith.constant 0 : index
    %c0_82 = arith.constant 0 : index
    %404 = vector.load %arg9[%403, %c0_81, %c0_82] : memref<8x8x768xbf16, #tpu.memory_space<vmem>>, vector<1x8x384xbf16>
    %405 = vector.shape_cast %404 : vector<1x8x384xbf16> to vector<8x384xbf16>
    %406 = arith.extf %405 : vector<8x384xbf16> to vector<8x384xf32>
    %407 = arith.index_cast %399 : i32 to index
    %c0_83 = arith.constant 0 : index
    %c384_84 = arith.constant 384 : index
    %408 = vector.load %arg9[%407, %c0_83, %c384_84] : memref<8x8x768xbf16, #tpu.memory_space<vmem>>, vector<1x8x384xbf16>
    %409 = vector.shape_cast %408 : vector<1x8x384xbf16> to vector<8x384xbf16>
    %410 = arith.extf %409 : vector<8x384xbf16> to vector<8x384xf32>
    %411 = vector.extract_strided_slice %406 {offsets = [0, 0], sizes = [8, 128], strides = [1, 1]} : vector<8x384xf32> to vector<8x128xf32>
    %412 = vector.extract_strided_slice %402 {offsets = [0, 0], sizes = [8, 128], strides = [1, 1]} : vector<8x768xf32> to vector<8x128xf32>
    %413 = arith.addf %411, %412 : vector<8x128xf32>
    %414 = arith.negf %413 : vector<8x128xf32>
    %415 = math.exp %414 : vector<8x128xf32>
    %cst_85 = arith.constant 1.000000e+00 : f32
    %416 = vector.broadcast %cst_85 : f32 to vector<8x128xf32>
    %417 = arith.addf %416, %415 : vector<8x128xf32>
    %418 = arith.divf %416, %417 : vector<8x128xf32>
    %419 = vector.extract_strided_slice %406 {offsets = [0, 128], sizes = [8, 128], strides = [1, 1]} : vector<8x384xf32> to vector<8x128xf32>
    %420 = vector.extract_strided_slice %402 {offsets = [0, 128], sizes = [8, 128], strides = [1, 1]} : vector<8x768xf32> to vector<8x128xf32>
    %421 = arith.addf %419, %420 : vector<8x128xf32>
    %422 = arith.negf %421 : vector<8x128xf32>
    %423 = math.exp %422 : vector<8x128xf32>
    %cst_86 = arith.constant 1.000000e+00 : f32
    %424 = vector.broadcast %cst_86 : f32 to vector<8x128xf32>
    %425 = arith.addf %424, %423 : vector<8x128xf32>
    %426 = arith.divf %424, %425 : vector<8x128xf32>
    %427 = vector.extract_strided_slice %406 {offsets = [0, 256], sizes = [8, 128], strides = [1, 1]} : vector<8x384xf32> to vector<8x128xf32>
    %428 = vector.extract_strided_slice %402 {offsets = [0, 256], sizes = [8, 128], strides = [1, 1]} : vector<8x768xf32> to vector<8x128xf32>
    %429 = vector.broadcast %12 : vector<1x128xf32> to vector<8x128xf32>
    %430 = arith.addf %428, %429 : vector<8x128xf32>
    %431 = arith.mulf %418, %430 : vector<8x128xf32>
    %432 = arith.addf %427, %431 : vector<8x128xf32>
    %433 = math.tanh %432 : vector<8x128xf32>
    %cst_87 = arith.constant 1.000000e+00 : f32
    %434 = vector.broadcast %cst_87 : f32 to vector<8x128xf32>
    %435 = arith.subf %434, %426 : vector<8x128xf32>
    %436 = arith.mulf %435, %433 : vector<8x128xf32>
    %437 = arith.mulf %426, %394 : vector<8x128xf32>
    %438 = arith.addf %436, %437 : vector<8x128xf32>
    %439 = vector.extract_strided_slice %410 {offsets = [0, 0], sizes = [8, 128], strides = [1, 1]} : vector<8x384xf32> to vector<8x128xf32>
    %440 = vector.extract_strided_slice %402 {offsets = [0, 384], sizes = [8, 128], strides = [1, 1]} : vector<8x768xf32> to vector<8x128xf32>
    %441 = arith.addf %439, %440 : vector<8x128xf32>
    %442 = arith.negf %441 : vector<8x128xf32>
    %443 = math.exp %442 : vector<8x128xf32>
    %cst_88 = arith.constant 1.000000e+00 : f32
    %444 = vector.broadcast %cst_88 : f32 to vector<8x128xf32>
    %445 = arith.addf %444, %443 : vector<8x128xf32>
    %446 = arith.divf %444, %445 : vector<8x128xf32>
    %447 = vector.extract_strided_slice %410 {offsets = [0, 128], sizes = [8, 128], strides = [1, 1]} : vector<8x384xf32> to vector<8x128xf32>
    %448 = vector.extract_strided_slice %402 {offsets = [0, 512], sizes = [8, 128], strides = [1, 1]} : vector<8x768xf32> to vector<8x128xf32>
    %449 = arith.addf %447, %448 : vector<8x128xf32>
    %450 = arith.negf %449 : vector<8x128xf32>
    %451 = math.exp %450 : vector<8x128xf32>
    %cst_89 = arith.constant 1.000000e+00 : f32
    %452 = vector.broadcast %cst_89 : f32 to vector<8x128xf32>
    %453 = arith.addf %452, %451 : vector<8x128xf32>
    %454 = arith.divf %452, %453 : vector<8x128xf32>
    %455 = vector.extract_strided_slice %410 {offsets = [0, 256], sizes = [8, 128], strides = [1, 1]} : vector<8x384xf32> to vector<8x128xf32>
    %456 = vector.extract_strided_slice %402 {offsets = [0, 640], sizes = [8, 128], strides = [1, 1]} : vector<8x768xf32> to vector<8x128xf32>
    %457 = vector.broadcast %13 : vector<1x128xf32> to vector<8x128xf32>
    %458 = arith.addf %456, %457 : vector<8x128xf32>
    %459 = arith.mulf %446, %458 : vector<8x128xf32>
    %460 = arith.addf %455, %459 : vector<8x128xf32>
    %461 = math.tanh %460 : vector<8x128xf32>
    %cst_90 = arith.constant 1.000000e+00 : f32
    %462 = vector.broadcast %cst_90 : f32 to vector<8x128xf32>
    %463 = arith.subf %462, %454 : vector<8x128xf32>
    %464 = arith.mulf %463, %461 : vector<8x128xf32>
    %465 = arith.mulf %454, %398 : vector<8x128xf32>
    %466 = arith.addf %464, %465 : vector<8x128xf32>
    %467 = vector.broadcast %c4_i32 : i32 to vector<8x1xi32>
    %468 = arith.cmpi sgt, %10, %467 : vector<8x1xi32>
    %469 = arith.extui %468 : vector<8x1xi1> to vector<8x1xi32>
    %470 = arith.sitofp %469 : vector<8x1xi32> to vector<8x1xf32>
    %471 = vector.broadcast %399 : i32 to vector<8x1xi32>
    %472 = arith.cmpi sgt, %10, %471 : vector<8x1xi32>
    %473 = arith.extui %472 : vector<8x1xi1> to vector<8x1xi32>
    %474 = arith.sitofp %473 : vector<8x1xi32> to vector<8x1xf32>
    %475 = vector.broadcast %470 : vector<8x1xf32> to vector<8x128xf32>
    %476 = arith.mulf %475, %438 : vector<8x128xf32>
    %477 = arith.index_cast %c4_i32 : i32 to index
    %c0_91 = arith.constant 0 : index
    %c0_92 = arith.constant 0 : index
    %478 = vector.load %arg7[%477, %c0_91, %c0_92] : memref<8x8x256xf32, #tpu.memory_space<vmem>>, vector<1x8x128xf32>
    %479 = vector.shape_cast %478 : vector<1x8x128xf32> to vector<8x128xf32>
    %480 = vector.shape_cast %476 : vector<8x128xf32> to vector<1x8x128xf32>
    tpu.vector_store %arg7[%477, %c0_91, %c0_92], %480 {strides = array<i32>} : memref<8x8x256xf32, #tpu.memory_space<vmem>>, vector<1x8x128xf32>,
    %481 = vector.broadcast %474 : vector<8x1xf32> to vector<8x128xf32>
    %482 = arith.mulf %481, %466 : vector<8x128xf32>
    %483 = arith.index_cast %399 : i32 to index
    %c0_93 = arith.constant 0 : index
    %c128_94 = arith.constant 128 : index
    %484 = vector.load %arg7[%483, %c0_93, %c128_94] : memref<8x8x256xf32, #tpu.memory_space<vmem>>, vector<1x8x128xf32>
    %485 = vector.shape_cast %484 : vector<1x8x128xf32> to vector<8x128xf32>
    %486 = vector.shape_cast %482 : vector<8x128xf32> to vector<1x8x128xf32>
    tpu.vector_store %arg7[%483, %c0_93, %c128_94], %486 {strides = array<i32>} : memref<8x8x256xf32, #tpu.memory_space<vmem>>, vector<1x8x128xf32>,
    %487 = arith.subf %438, %394 : vector<8x128xf32>
    %488 = vector.broadcast %470 : vector<8x1xf32> to vector<8x128xf32>
    %489 = arith.mulf %488, %487 : vector<8x128xf32>
    %490 = arith.addf %394, %489 : vector<8x128xf32>
    %491 = arith.subf %466, %398 : vector<8x128xf32>
    %492 = vector.broadcast %474 : vector<8x1xf32> to vector<8x128xf32>
    %493 = arith.mulf %492, %491 : vector<8x128xf32>
    %494 = arith.addf %398, %493 : vector<8x128xf32>
    %c5_i32 = arith.constant 5 : i32
    %c7_i32_95 = arith.constant 7 : i32
    %495 = arith.subi %c7_i32_95, %c5_i32 : i32
    %496 = tpu.concatenate %490, %494 in 1 : vector<8x128xf32>, vector<8x128xf32> -> vector<8x256xf32>
    %497 = arith.truncf %496 : vector<8x256xf32> to vector<8x256xbf16>
    %cst_96 = arith.constant dense<0.000000e+00> : vector<8x768xf32>
    %498 = tpu.matmul %497, %11, %cst_96 {dimension_numbers = #tpu.dot_dimension_numbers<[1], [0], [0], [1], [0, 0, 1, 1], [], []>} : vector<8x256xbf16>, vector<256x768xbf16>, vector<8x768xf32> -> vector<8x768xf32>
    %499 = arith.index_cast %c5_i32 : i32 to index
    %c0_97 = arith.constant 0 : index
    %c0_98 = arith.constant 0 : index
    %500 = vector.load %arg9[%499, %c0_97, %c0_98] : memref<8x8x768xbf16, #tpu.memory_space<vmem>>, vector<1x8x384xbf16>
    %501 = vector.shape_cast %500 : vector<1x8x384xbf16> to vector<8x384xbf16>
    %502 = arith.extf %501 : vector<8x384xbf16> to vector<8x384xf32>
    %503 = arith.index_cast %495 : i32 to index
    %c0_99 = arith.constant 0 : index
    %c384_100 = arith.constant 384 : index
    %504 = vector.load %arg9[%503, %c0_99, %c384_100] : memref<8x8x768xbf16, #tpu.memory_space<vmem>>, vector<1x8x384xbf16>
    %505 = vector.shape_cast %504 : vector<1x8x384xbf16> to vector<8x384xbf16>
    %506 = arith.extf %505 : vector<8x384xbf16> to vector<8x384xf32>
    %507 = vector.extract_strided_slice %502 {offsets = [0, 0], sizes = [8, 128], strides = [1, 1]} : vector<8x384xf32> to vector<8x128xf32>
    %508 = vector.extract_strided_slice %498 {offsets = [0, 0], sizes = [8, 128], strides = [1, 1]} : vector<8x768xf32> to vector<8x128xf32>
    %509 = arith.addf %507, %508 : vector<8x128xf32>
    %510 = arith.negf %509 : vector<8x128xf32>
    %511 = math.exp %510 : vector<8x128xf32>
    %cst_101 = arith.constant 1.000000e+00 : f32
    %512 = vector.broadcast %cst_101 : f32 to vector<8x128xf32>
    %513 = arith.addf %512, %511 : vector<8x128xf32>
    %514 = arith.divf %512, %513 : vector<8x128xf32>
    %515 = vector.extract_strided_slice %502 {offsets = [0, 128], sizes = [8, 128], strides = [1, 1]} : vector<8x384xf32> to vector<8x128xf32>
    %516 = vector.extract_strided_slice %498 {offsets = [0, 128], sizes = [8, 128], strides = [1, 1]} : vector<8x768xf32> to vector<8x128xf32>
    %517 = arith.addf %515, %516 : vector<8x128xf32>
    %518 = arith.negf %517 : vector<8x128xf32>
    %519 = math.exp %518 : vector<8x128xf32>
    %cst_102 = arith.constant 1.000000e+00 : f32
    %520 = vector.broadcast %cst_102 : f32 to vector<8x128xf32>
    %521 = arith.addf %520, %519 : vector<8x128xf32>
    %522 = arith.divf %520, %521 : vector<8x128xf32>
    %523 = vector.extract_strided_slice %502 {offsets = [0, 256], sizes = [8, 128], strides = [1, 1]} : vector<8x384xf32> to vector<8x128xf32>
    %524 = vector.extract_strided_slice %498 {offsets = [0, 256], sizes = [8, 128], strides = [1, 1]} : vector<8x768xf32> to vector<8x128xf32>
    %525 = vector.broadcast %12 : vector<1x128xf32> to vector<8x128xf32>
    %526 = arith.addf %524, %525 : vector<8x128xf32>
    %527 = arith.mulf %514, %526 : vector<8x128xf32>
    %528 = arith.addf %523, %527 : vector<8x128xf32>
    %529 = math.tanh %528 : vector<8x128xf32>
    %cst_103 = arith.constant 1.000000e+00 : f32
    %530 = vector.broadcast %cst_103 : f32 to vector<8x128xf32>
    %531 = arith.subf %530, %522 : vector<8x128xf32>
    %532 = arith.mulf %531, %529 : vector<8x128xf32>
    %533 = arith.mulf %522, %490 : vector<8x128xf32>
    %534 = arith.addf %532, %533 : vector<8x128xf32>
    %535 = vector.extract_strided_slice %506 {offsets = [0, 0], sizes = [8, 128], strides = [1, 1]} : vector<8x384xf32> to vector<8x128xf32>
    %536 = vector.extract_strided_slice %498 {offsets = [0, 384], sizes = [8, 128], strides = [1, 1]} : vector<8x768xf32> to vector<8x128xf32>
    %537 = arith.addf %535, %536 : vector<8x128xf32>
    %538 = arith.negf %537 : vector<8x128xf32>
    %539 = math.exp %538 : vector<8x128xf32>
    %cst_104 = arith.constant 1.000000e+00 : f32
    %540 = vector.broadcast %cst_104 : f32 to vector<8x128xf32>
    %541 = arith.addf %540, %539 : vector<8x128xf32>
    %542 = arith.divf %540, %541 : vector<8x128xf32>
    %543 = vector.extract_strided_slice %506 {offsets = [0, 128], sizes = [8, 128], strides = [1, 1]} : vector<8x384xf32> to vector<8x128xf32>
    %544 = vector.extract_strided_slice %498 {offsets = [0, 512], sizes = [8, 128], strides = [1, 1]} : vector<8x768xf32> to vector<8x128xf32>
    %545 = arith.addf %543, %544 : vector<8x128xf32>
    %546 = arith.negf %545 : vector<8x128xf32>
    %547 = math.exp %546 : vector<8x128xf32>
    %cst_105 = arith.constant 1.000000e+00 : f32
    %548 = vector.broadcast %cst_105 : f32 to vector<8x128xf32>
    %549 = arith.addf %548, %547 : vector<8x128xf32>
    %550 = arith.divf %548, %549 : vector<8x128xf32>
    %551 = vector.extract_strided_slice %506 {offsets = [0, 256], sizes = [8, 128], strides = [1, 1]} : vector<8x384xf32> to vector<8x128xf32>
    %552 = vector.extract_strided_slice %498 {offsets = [0, 640], sizes = [8, 128], strides = [1, 1]} : vector<8x768xf32> to vector<8x128xf32>
    %553 = vector.broadcast %13 : vector<1x128xf32> to vector<8x128xf32>
    %554 = arith.addf %552, %553 : vector<8x128xf32>
    %555 = arith.mulf %542, %554 : vector<8x128xf32>
    %556 = arith.addf %551, %555 : vector<8x128xf32>
    %557 = math.tanh %556 : vector<8x128xf32>
    %cst_106 = arith.constant 1.000000e+00 : f32
    %558 = vector.broadcast %cst_106 : f32 to vector<8x128xf32>
    %559 = arith.subf %558, %550 : vector<8x128xf32>
    %560 = arith.mulf %559, %557 : vector<8x128xf32>
    %561 = arith.mulf %550, %494 : vector<8x128xf32>
    %562 = arith.addf %560, %561 : vector<8x128xf32>
    %563 = vector.broadcast %c5_i32 : i32 to vector<8x1xi32>
    %564 = arith.cmpi sgt, %10, %563 : vector<8x1xi32>
    %565 = arith.extui %564 : vector<8x1xi1> to vector<8x1xi32>
    %566 = arith.sitofp %565 : vector<8x1xi32> to vector<8x1xf32>
    %567 = vector.broadcast %495 : i32 to vector<8x1xi32>
    %568 = arith.cmpi sgt, %10, %567 : vector<8x1xi32>
    %569 = arith.extui %568 : vector<8x1xi1> to vector<8x1xi32>
    %570 = arith.sitofp %569 : vector<8x1xi32> to vector<8x1xf32>
    %571 = vector.broadcast %566 : vector<8x1xf32> to vector<8x128xf32>
    %572 = arith.mulf %571, %534 : vector<8x128xf32>
    %573 = arith.index_cast %c5_i32 : i32 to index
    %c0_107 = arith.constant 0 : index
    %c0_108 = arith.constant 0 : index
    %574 = vector.load %arg7[%573, %c0_107, %c0_108] : memref<8x8x256xf32, #tpu.memory_space<vmem>>, vector<1x8x128xf32>
    %575 = vector.shape_cast %574 : vector<1x8x128xf32> to vector<8x128xf32>
    %576 = vector.shape_cast %572 : vector<8x128xf32> to vector<1x8x128xf32>
    tpu.vector_store %arg7[%573, %c0_107, %c0_108], %576 {strides = array<i32>} : memref<8x8x256xf32, #tpu.memory_space<vmem>>, vector<1x8x128xf32>,
    %577 = vector.broadcast %570 : vector<8x1xf32> to vector<8x128xf32>
    %578 = arith.mulf %577, %562 : vector<8x128xf32>
    %579 = arith.index_cast %495 : i32 to index
    %c0_109 = arith.constant 0 : index
    %c128_110 = arith.constant 128 : index
    %580 = vector.load %arg7[%579, %c0_109, %c128_110] : memref<8x8x256xf32, #tpu.memory_space<vmem>>, vector<1x8x128xf32>
    %581 = vector.shape_cast %580 : vector<1x8x128xf32> to vector<8x128xf32>
    %582 = vector.shape_cast %578 : vector<8x128xf32> to vector<1x8x128xf32>
    tpu.vector_store %arg7[%579, %c0_109, %c128_110], %582 {strides = array<i32>} : memref<8x8x256xf32, #tpu.memory_space<vmem>>, vector<1x8x128xf32>,
    %583 = arith.subf %534, %490 : vector<8x128xf32>
    %584 = vector.broadcast %566 : vector<8x1xf32> to vector<8x128xf32>
    %585 = arith.mulf %584, %583 : vector<8x128xf32>
    %586 = arith.addf %490, %585 : vector<8x128xf32>
    %587 = arith.subf %562, %494 : vector<8x128xf32>
    %588 = vector.broadcast %570 : vector<8x1xf32> to vector<8x128xf32>
    %589 = arith.mulf %588, %587 : vector<8x128xf32>
    %590 = arith.addf %494, %589 : vector<8x128xf32>
    %c6_i32 = arith.constant 6 : i32
    %c7_i32_111 = arith.constant 7 : i32
    %591 = arith.subi %c7_i32_111, %c6_i32 : i32
    %592 = tpu.concatenate %586, %590 in 1 : vector<8x128xf32>, vector<8x128xf32> -> vector<8x256xf32>
    %593 = arith.truncf %592 : vector<8x256xf32> to vector<8x256xbf16>
    %cst_112 = arith.constant dense<0.000000e+00> : vector<8x768xf32>
    %594 = tpu.matmul %593, %11, %cst_112 {dimension_numbers = #tpu.dot_dimension_numbers<[1], [0], [0], [1], [0, 0, 1, 1], [], []>} : vector<8x256xbf16>, vector<256x768xbf16>, vector<8x768xf32> -> vector<8x768xf32>
    %595 = arith.index_cast %c6_i32 : i32 to index
    %c0_113 = arith.constant 0 : index
    %c0_114 = arith.constant 0 : index
    %596 = vector.load %arg9[%595, %c0_113, %c0_114] : memref<8x8x768xbf16, #tpu.memory_space<vmem>>, vector<1x8x384xbf16>
    %597 = vector.shape_cast %596 : vector<1x8x384xbf16> to vector<8x384xbf16>
    %598 = arith.extf %597 : vector<8x384xbf16> to vector<8x384xf32>
    %599 = arith.index_cast %591 : i32 to index
    %c0_115 = arith.constant 0 : index
    %c384_116 = arith.constant 384 : index
    %600 = vector.load %arg9[%599, %c0_115, %c384_116] : memref<8x8x768xbf16, #tpu.memory_space<vmem>>, vector<1x8x384xbf16>
    %601 = vector.shape_cast %600 : vector<1x8x384xbf16> to vector<8x384xbf16>
    %602 = arith.extf %601 : vector<8x384xbf16> to vector<8x384xf32>
    %603 = vector.extract_strided_slice %598 {offsets = [0, 0], sizes = [8, 128], strides = [1, 1]} : vector<8x384xf32> to vector<8x128xf32>
    %604 = vector.extract_strided_slice %594 {offsets = [0, 0], sizes = [8, 128], strides = [1, 1]} : vector<8x768xf32> to vector<8x128xf32>
    %605 = arith.addf %603, %604 : vector<8x128xf32>
    %606 = arith.negf %605 : vector<8x128xf32>
    %607 = math.exp %606 : vector<8x128xf32>
    %cst_117 = arith.constant 1.000000e+00 : f32
    %608 = vector.broadcast %cst_117 : f32 to vector<8x128xf32>
    %609 = arith.addf %608, %607 : vector<8x128xf32>
    %610 = arith.divf %608, %609 : vector<8x128xf32>
    %611 = vector.extract_strided_slice %598 {offsets = [0, 128], sizes = [8, 128], strides = [1, 1]} : vector<8x384xf32> to vector<8x128xf32>
    %612 = vector.extract_strided_slice %594 {offsets = [0, 128], sizes = [8, 128], strides = [1, 1]} : vector<8x768xf32> to vector<8x128xf32>
    %613 = arith.addf %611, %612 : vector<8x128xf32>
    %614 = arith.negf %613 : vector<8x128xf32>
    %615 = math.exp %614 : vector<8x128xf32>
    %cst_118 = arith.constant 1.000000e+00 : f32
    %616 = vector.broadcast %cst_118 : f32 to vector<8x128xf32>
    %617 = arith.addf %616, %615 : vector<8x128xf32>
    %618 = arith.divf %616, %617 : vector<8x128xf32>
    %619 = vector.extract_strided_slice %598 {offsets = [0, 256], sizes = [8, 128], strides = [1, 1]} : vector<8x384xf32> to vector<8x128xf32>
    %620 = vector.extract_strided_slice %594 {offsets = [0, 256], sizes = [8, 128], strides = [1, 1]} : vector<8x768xf32> to vector<8x128xf32>
    %621 = vector.broadcast %12 : vector<1x128xf32> to vector<8x128xf32>
    %622 = arith.addf %620, %621 : vector<8x128xf32>
    %623 = arith.mulf %610, %622 : vector<8x128xf32>
    %624 = arith.addf %619, %623 : vector<8x128xf32>
    %625 = math.tanh %624 : vector<8x128xf32>
    %cst_119 = arith.constant 1.000000e+00 : f32
    %626 = vector.broadcast %cst_119 : f32 to vector<8x128xf32>
    %627 = arith.subf %626, %618 : vector<8x128xf32>
    %628 = arith.mulf %627, %625 : vector<8x128xf32>
    %629 = arith.mulf %618, %586 : vector<8x128xf32>
    %630 = arith.addf %628, %629 : vector<8x128xf32>
    %631 = vector.extract_strided_slice %602 {offsets = [0, 0], sizes = [8, 128], strides = [1, 1]} : vector<8x384xf32> to vector<8x128xf32>
    %632 = vector.extract_strided_slice %594 {offsets = [0, 384], sizes = [8, 128], strides = [1, 1]} : vector<8x768xf32> to vector<8x128xf32>
    %633 = arith.addf %631, %632 : vector<8x128xf32>
    %634 = arith.negf %633 : vector<8x128xf32>
    %635 = math.exp %634 : vector<8x128xf32>
    %cst_120 = arith.constant 1.000000e+00 : f32
    %636 = vector.broadcast %cst_120 : f32 to vector<8x128xf32>
    %637 = arith.addf %636, %635 : vector<8x128xf32>
    %638 = arith.divf %636, %637 : vector<8x128xf32>
    %639 = vector.extract_strided_slice %602 {offsets = [0, 128], sizes = [8, 128], strides = [1, 1]} : vector<8x384xf32> to vector<8x128xf32>
    %640 = vector.extract_strided_slice %594 {offsets = [0, 512], sizes = [8, 128], strides = [1, 1]} : vector<8x768xf32> to vector<8x128xf32>
    %641 = arith.addf %639, %640 : vector<8x128xf32>
    %642 = arith.negf %641 : vector<8x128xf32>
    %643 = math.exp %642 : vector<8x128xf32>
    %cst_121 = arith.constant 1.000000e+00 : f32
    %644 = vector.broadcast %cst_121 : f32 to vector<8x128xf32>
    %645 = arith.addf %644, %643 : vector<8x128xf32>
    %646 = arith.divf %644, %645 : vector<8x128xf32>
    %647 = vector.extract_strided_slice %602 {offsets = [0, 256], sizes = [8, 128], strides = [1, 1]} : vector<8x384xf32> to vector<8x128xf32>
    %648 = vector.extract_strided_slice %594 {offsets = [0, 640], sizes = [8, 128], strides = [1, 1]} : vector<8x768xf32> to vector<8x128xf32>
    %649 = vector.broadcast %13 : vector<1x128xf32> to vector<8x128xf32>
    %650 = arith.addf %648, %649 : vector<8x128xf32>
    %651 = arith.mulf %638, %650 : vector<8x128xf32>
    %652 = arith.addf %647, %651 : vector<8x128xf32>
    %653 = math.tanh %652 : vector<8x128xf32>
    %cst_122 = arith.constant 1.000000e+00 : f32
    %654 = vector.broadcast %cst_122 : f32 to vector<8x128xf32>
    %655 = arith.subf %654, %646 : vector<8x128xf32>
    %656 = arith.mulf %655, %653 : vector<8x128xf32>
    %657 = arith.mulf %646, %590 : vector<8x128xf32>
    %658 = arith.addf %656, %657 : vector<8x128xf32>
    %659 = vector.broadcast %c6_i32 : i32 to vector<8x1xi32>
    %660 = arith.cmpi sgt, %10, %659 : vector<8x1xi32>
    %661 = arith.extui %660 : vector<8x1xi1> to vector<8x1xi32>
    %662 = arith.sitofp %661 : vector<8x1xi32> to vector<8x1xf32>
    %663 = vector.broadcast %591 : i32 to vector<8x1xi32>
    %664 = arith.cmpi sgt, %10, %663 : vector<8x1xi32>
    %665 = arith.extui %664 : vector<8x1xi1> to vector<8x1xi32>
    %666 = arith.sitofp %665 : vector<8x1xi32> to vector<8x1xf32>
    %667 = vector.broadcast %662 : vector<8x1xf32> to vector<8x128xf32>
    %668 = arith.mulf %667, %630 : vector<8x128xf32>
    %669 = arith.index_cast %c6_i32 : i32 to index
    %c0_123 = arith.constant 0 : index
    %c0_124 = arith.constant 0 : index
    %670 = vector.load %arg7[%669, %c0_123, %c0_124] : memref<8x8x256xf32, #tpu.memory_space<vmem>>, vector<1x8x128xf32>
    %671 = vector.shape_cast %670 : vector<1x8x128xf32> to vector<8x128xf32>
    %672 = vector.shape_cast %668 : vector<8x128xf32> to vector<1x8x128xf32>
    tpu.vector_store %arg7[%669, %c0_123, %c0_124], %672 {strides = array<i32>} : memref<8x8x256xf32, #tpu.memory_space<vmem>>, vector<1x8x128xf32>,
    %673 = vector.broadcast %666 : vector<8x1xf32> to vector<8x128xf32>
    %674 = arith.mulf %673, %658 : vector<8x128xf32>
    %675 = arith.index_cast %591 : i32 to index
    %c0_125 = arith.constant 0 : index
    %c128_126 = arith.constant 128 : index
    %676 = vector.load %arg7[%675, %c0_125, %c128_126] : memref<8x8x256xf32, #tpu.memory_space<vmem>>, vector<1x8x128xf32>
    %677 = vector.shape_cast %676 : vector<1x8x128xf32> to vector<8x128xf32>
    %678 = vector.shape_cast %674 : vector<8x128xf32> to vector<1x8x128xf32>
    tpu.vector_store %arg7[%675, %c0_125, %c128_126], %678 {strides = array<i32>} : memref<8x8x256xf32, #tpu.memory_space<vmem>>, vector<1x8x128xf32>,
    %679 = arith.subf %630, %586 : vector<8x128xf32>
    %680 = vector.broadcast %662 : vector<8x1xf32> to vector<8x128xf32>
    %681 = arith.mulf %680, %679 : vector<8x128xf32>
    %682 = arith.addf %586, %681 : vector<8x128xf32>
    %683 = arith.subf %658, %590 : vector<8x128xf32>
    %684 = vector.broadcast %666 : vector<8x1xf32> to vector<8x128xf32>
    %685 = arith.mulf %684, %683 : vector<8x128xf32>
    %686 = arith.addf %590, %685 : vector<8x128xf32>
    %c7_i32_127 = arith.constant 7 : i32
    %c7_i32_128 = arith.constant 7 : i32
    %687 = arith.subi %c7_i32_128, %c7_i32_127 : i32
    %688 = tpu.concatenate %682, %686 in 1 : vector<8x128xf32>, vector<8x128xf32> -> vector<8x256xf32>
    %689 = arith.truncf %688 : vector<8x256xf32> to vector<8x256xbf16>
    %cst_129 = arith.constant dense<0.000000e+00> : vector<8x768xf32>
    %690 = tpu.matmul %689, %11, %cst_129 {dimension_numbers = #tpu.dot_dimension_numbers<[1], [0], [0], [1], [0, 0, 1, 1], [], []>} : vector<8x256xbf16>, vector<256x768xbf16>, vector<8x768xf32> -> vector<8x768xf32>
    %691 = arith.index_cast %c7_i32_127 : i32 to index
    %c0_130 = arith.constant 0 : index
    %c0_131 = arith.constant 0 : index
    %692 = vector.load %arg9[%691, %c0_130, %c0_131] : memref<8x8x768xbf16, #tpu.memory_space<vmem>>, vector<1x8x384xbf16>
    %693 = vector.shape_cast %692 : vector<1x8x384xbf16> to vector<8x384xbf16>
    %694 = arith.extf %693 : vector<8x384xbf16> to vector<8x384xf32>
    %695 = arith.index_cast %687 : i32 to index
    %c0_132 = arith.constant 0 : index
    %c384_133 = arith.constant 384 : index
    %696 = vector.load %arg9[%695, %c0_132, %c384_133] : memref<8x8x768xbf16, #tpu.memory_space<vmem>>, vector<1x8x384xbf16>
    %697 = vector.shape_cast %696 : vector<1x8x384xbf16> to vector<8x384xbf16>
    %698 = arith.extf %697 : vector<8x384xbf16> to vector<8x384xf32>
    %699 = vector.extract_strided_slice %694 {offsets = [0, 0], sizes = [8, 128], strides = [1, 1]} : vector<8x384xf32> to vector<8x128xf32>
    %700 = vector.extract_strided_slice %690 {offsets = [0, 0], sizes = [8, 128], strides = [1, 1]} : vector<8x768xf32> to vector<8x128xf32>
    %701 = arith.addf %699, %700 : vector<8x128xf32>
    %702 = arith.negf %701 : vector<8x128xf32>
    %703 = math.exp %702 : vector<8x128xf32>
    %cst_134 = arith.constant 1.000000e+00 : f32
    %704 = vector.broadcast %cst_134 : f32 to vector<8x128xf32>
    %705 = arith.addf %704, %703 : vector<8x128xf32>
    %706 = arith.divf %704, %705 : vector<8x128xf32>
    %707 = vector.extract_strided_slice %694 {offsets = [0, 128], sizes = [8, 128], strides = [1, 1]} : vector<8x384xf32> to vector<8x128xf32>
    %708 = vector.extract_strided_slice %690 {offsets = [0, 128], sizes = [8, 128], strides = [1, 1]} : vector<8x768xf32> to vector<8x128xf32>
    %709 = arith.addf %707, %708 : vector<8x128xf32>
    %710 = arith.negf %709 : vector<8x128xf32>
    %711 = math.exp %710 : vector<8x128xf32>
    %cst_135 = arith.constant 1.000000e+00 : f32
    %712 = vector.broadcast %cst_135 : f32 to vector<8x128xf32>
    %713 = arith.addf %712, %711 : vector<8x128xf32>
    %714 = arith.divf %712, %713 : vector<8x128xf32>
    %715 = vector.extract_strided_slice %694 {offsets = [0, 256], sizes = [8, 128], strides = [1, 1]} : vector<8x384xf32> to vector<8x128xf32>
    %716 = vector.extract_strided_slice %690 {offsets = [0, 256], sizes = [8, 128], strides = [1, 1]} : vector<8x768xf32> to vector<8x128xf32>
    %717 = vector.broadcast %12 : vector<1x128xf32> to vector<8x128xf32>
    %718 = arith.addf %716, %717 : vector<8x128xf32>
    %719 = arith.mulf %706, %718 : vector<8x128xf32>
    %720 = arith.addf %715, %719 : vector<8x128xf32>
    %721 = math.tanh %720 : vector<8x128xf32>
    %cst_136 = arith.constant 1.000000e+00 : f32
    %722 = vector.broadcast %cst_136 : f32 to vector<8x128xf32>
    %723 = arith.subf %722, %714 : vector<8x128xf32>
    %724 = arith.mulf %723, %721 : vector<8x128xf32>
    %725 = arith.mulf %714, %682 : vector<8x128xf32>
    %726 = arith.addf %724, %725 : vector<8x128xf32>
    %727 = vector.extract_strided_slice %698 {offsets = [0, 0], sizes = [8, 128], strides = [1, 1]} : vector<8x384xf32> to vector<8x128xf32>
    %728 = vector.extract_strided_slice %690 {offsets = [0, 384], sizes = [8, 128], strides = [1, 1]} : vector<8x768xf32> to vector<8x128xf32>
    %729 = arith.addf %727, %728 : vector<8x128xf32>
    %730 = arith.negf %729 : vector<8x128xf32>
    %731 = math.exp %730 : vector<8x128xf32>
    %cst_137 = arith.constant 1.000000e+00 : f32
    %732 = vector.broadcast %cst_137 : f32 to vector<8x128xf32>
    %733 = arith.addf %732, %731 : vector<8x128xf32>
    %734 = arith.divf %732, %733 : vector<8x128xf32>
    %735 = vector.extract_strided_slice %698 {offsets = [0, 128], sizes = [8, 128], strides = [1, 1]} : vector<8x384xf32> to vector<8x128xf32>
    %736 = vector.extract_strided_slice %690 {offsets = [0, 512], sizes = [8, 128], strides = [1, 1]} : vector<8x768xf32> to vector<8x128xf32>
    %737 = arith.addf %735, %736 : vector<8x128xf32>
    %738 = arith.negf %737 : vector<8x128xf32>
    %739 = math.exp %738 : vector<8x128xf32>
    %cst_138 = arith.constant 1.000000e+00 : f32
    %740 = vector.broadcast %cst_138 : f32 to vector<8x128xf32>
    %741 = arith.addf %740, %739 : vector<8x128xf32>
    %742 = arith.divf %740, %741 : vector<8x128xf32>
    %743 = vector.extract_strided_slice %698 {offsets = [0, 256], sizes = [8, 128], strides = [1, 1]} : vector<8x384xf32> to vector<8x128xf32>
    %744 = vector.extract_strided_slice %690 {offsets = [0, 640], sizes = [8, 128], strides = [1, 1]} : vector<8x768xf32> to vector<8x128xf32>
    %745 = vector.broadcast %13 : vector<1x128xf32> to vector<8x128xf32>
    %746 = arith.addf %744, %745 : vector<8x128xf32>
    %747 = arith.mulf %734, %746 : vector<8x128xf32>
    %748 = arith.addf %743, %747 : vector<8x128xf32>
    %749 = math.tanh %748 : vector<8x128xf32>
    %cst_139 = arith.constant 1.000000e+00 : f32
    %750 = vector.broadcast %cst_139 : f32 to vector<8x128xf32>
    %751 = arith.subf %750, %742 : vector<8x128xf32>
    %752 = arith.mulf %751, %749 : vector<8x128xf32>
    %753 = arith.mulf %742, %686 : vector<8x128xf32>
    %754 = arith.addf %752, %753 : vector<8x128xf32>
    %755 = vector.broadcast %c7_i32_127 : i32 to vector<8x1xi32>
    %756 = arith.cmpi sgt, %10, %755 : vector<8x1xi32>
    %757 = arith.extui %756 : vector<8x1xi1> to vector<8x1xi32>
    %758 = arith.sitofp %757 : vector<8x1xi32> to vector<8x1xf32>
    %759 = vector.broadcast %687 : i32 to vector<8x1xi32>
    %760 = arith.cmpi sgt, %10, %759 : vector<8x1xi32>
    %761 = arith.extui %760 : vector<8x1xi1> to vector<8x1xi32>
    %762 = arith.sitofp %761 : vector<8x1xi32> to vector<8x1xf32>
    %763 = vector.broadcast %758 : vector<8x1xf32> to vector<8x128xf32>
    %764 = arith.mulf %763, %726 : vector<8x128xf32>
    %765 = arith.index_cast %c7_i32_127 : i32 to index
    %c0_140 = arith.constant 0 : index
    %c0_141 = arith.constant 0 : index
    %766 = vector.load %arg7[%765, %c0_140, %c0_141] : memref<8x8x256xf32, #tpu.memory_space<vmem>>, vector<1x8x128xf32>
    %767 = vector.shape_cast %766 : vector<1x8x128xf32> to vector<8x128xf32>
    %768 = vector.shape_cast %764 : vector<8x128xf32> to vector<1x8x128xf32>
    tpu.vector_store %arg7[%765, %c0_140, %c0_141], %768 {strides = array<i32>} : memref<8x8x256xf32, #tpu.memory_space<vmem>>, vector<1x8x128xf32>,
    %769 = vector.broadcast %762 : vector<8x1xf32> to vector<8x128xf32>
    %770 = arith.mulf %769, %754 : vector<8x128xf32>
    %771 = arith.index_cast %687 : i32 to index
    %c0_142 = arith.constant 0 : index
    %c128_143 = arith.constant 128 : index
    %772 = vector.load %arg7[%771, %c0_142, %c128_143] : memref<8x8x256xf32, #tpu.memory_space<vmem>>, vector<1x8x128xf32>
    %773 = vector.shape_cast %772 : vector<1x8x128xf32> to vector<8x128xf32>
    %774 = vector.shape_cast %770 : vector<8x128xf32> to vector<1x8x128xf32>
    tpu.vector_store %arg7[%771, %c0_142, %c128_143], %774 {strides = array<i32>} : memref<8x8x256xf32, #tpu.memory_space<vmem>>, vector<1x8x128xf32>,
    %775 = arith.subf %726, %682 : vector<8x128xf32>
    %776 = vector.broadcast %758 : vector<8x1xf32> to vector<8x128xf32>
    %777 = arith.mulf %776, %775 : vector<8x128xf32>
    %778 = arith.addf %682, %777 : vector<8x128xf32>
    %779 = arith.subf %754, %686 : vector<8x128xf32>
    %780 = vector.broadcast %762 : vector<8x1xf32> to vector<8x128xf32>
    %781 = arith.mulf %780, %779 : vector<8x128xf32>
    %782 = arith.addf %686, %781 : vector<8x128xf32>
    %c8_i32 = arith.constant 8 : i32
    %c0_144 = arith.constant 0 : index
    %c0_145 = arith.constant 0 : index
    %783 = vector.load %arg8[%c0_144, %c0_145] : memref<8x256xf32, #tpu.memory_space<vmem>>, vector<8x128xf32>
    tpu.vector_store %arg8[%c0_144, %c0_145], %778 {strides = array<i32>} : memref<8x256xf32, #tpu.memory_space<vmem>>, vector<8x128xf32>,
    %c0_146 = arith.constant 0 : index
    %c128_147 = arith.constant 128 : index
    %784 = vector.load %arg8[%c0_146, %c128_147] : memref<8x256xf32, #tpu.memory_space<vmem>>, vector<8x128xf32>
    tpu.vector_store %arg8[%c0_146, %c128_147], %782 {strides = array<i32>} : memref<8x256xf32, #tpu.memory_space<vmem>>, vector<8x128xf32>,
    return
  }
  func.func @transform_0(%arg0: i32) -> (i32, i32, i32) {
    %c0_i32 = arith.constant 0 : i32
    %c0_i32_0 = arith.constant 0 : i32
    %c0_i32_1 = arith.constant 0 : i32
    return %c0_i32, %arg0, %c0_i32_0 : i32, i32, i32
  }
  func.func @transform_1(%arg0: i32) -> (i32, i32) {
    %c0_i32 = arith.constant 0 : i32
    %c0_i32_0 = arith.constant 0 : i32
    return %arg0, %c0_i32 : i32, i32
  }
  func.func @transform_2(%arg0: i32) -> (i32, i32) {
    %c0_i32 = arith.constant 0 : i32
    %c0_i32_0 = arith.constant 0 : i32
    %c0_i32_1 = arith.constant 0 : i32
    return %c0_i32, %c0_i32_0 : i32, i32
  }
  func.func @transform_3(%arg0: i32) -> (i32, i32) {
    %c0_i32 = arith.constant 0 : i32
    %c0_i32_0 = arith.constant 0 : i32
    %c0_i32_1 = arith.constant 0 : i32
    return %c0_i32, %c0_i32_0 : i32, i32
  }
  func.func @transform_4(%arg0: i32) -> (i32, i32) {
    %c0_i32 = arith.constant 0 : i32
    %c0_i32_0 = arith.constant 0 : i32
    %c0_i32_1 = arith.constant 0 : i32
    return %c0_i32, %c0_i32_0 : i32, i32
  }
  func.func @transform_5(%arg0: i32) -> (i32, i32) {
    %c0_i32 = arith.constant 0 : i32
    %c0_i32_0 = arith.constant 0 : i32
    %c0_i32_1 = arith.constant 0 : i32
    return %c0_i32, %c0_i32_0 : i32, i32
  }
  func.func @transform_6(%arg0: i32) -> (i32, i32, i32) {
    %c0_i32 = arith.constant 0 : i32
    %c0_i32_0 = arith.constant 0 : i32
    %c0_i32_1 = arith.constant 0 : i32
    return %c0_i32, %arg0, %c0_i32_0 : i32, i32, i32
  }
  func.func @transform_7(%arg0: i32) -> (i32, i32) {
    %c0_i32 = arith.constant 0 : i32
    %c0_i32_0 = arith.constant 0 : i32
    return %arg0, %c0_i32 : i32, i32
  }
}

</mosaic_0001>

<bundles_post_ra>
// kernel: nmt_encoder_forward.1
= control target key start
LH: loop header
LB: loop body
LE: loop exit
PB: predicated region body
PF: predicated region fallthrough
CT: control target
= control target key end

     0   :  { %13 = vsyncpa [#allocation4], 0  ;;  %s5920_s0 = inlined_call_operand.hbm [shape: bf16[8,8,128], index: 0, kind: input, shape index: {}]   ;;  %s5921_s1 = inlined_call_operand.hbm [shape: s32[8,1], index: 1, kind: input, shape index: {}]   ;;  %s5922_s2 = inlined_call_operand.hbm [shape: bf16[128,768], index: 2, kind: input, shape index: {}]   ;;  %s5923_s3 = inlined_call_operand.hbm [shape: f32[1,768], index: 3, kind: input, shape index: {}]   ;;  %s5924_s4 = inlined_call_operand.hbm [shape: bf16[256,768], index: 4, kind: input, shape index: {}]   ;;  %s5925_s5 = inlined_call_operand.hbm [shape: f32[1,256], index: 5, kind: input, shape index: {}]   ;;  %s5926_s6 = inlined_call_operand.hbm [shape: f32[8,8,256], index: 6, kind: output, shape index: {0}]   ;;  %s5927_s7 = inlined_call_operand.hbm [shape: f32[8,256], index: 7, kind: output, shape index: {1}]  }
   0x1   :  { %14 = vsyncpa [#allocation7], 0 }
   0x2   :  { %15 = vsyncpa [#allocation10], 0 }
   0x3   :  { %16 = vsyncpa [#allocation13], 0 }
   0x4   :  { %17 = vsyncpa [#allocation5], 0 }
   0x5   :  { %18 = vsyncpa [#allocation16], 0  ;;  %s4097_s24 = smov [#allocation6]   ;;  %s4098_s26 = smov [#allocation9]  }
   0x6   :  { %s37_s25 = sshll.u32 %s4097_s24, 4  ;;  %s59_s27 = sshll.u32 %s4098_s26, 4  ;;  %s38_s25 = int_to_ptr.vmem [resolvable:$true] %s37_s25  ;;  %s60_s27 = int_to_ptr.vmem [resolvable:$true] %s59_s27 }
   0x7   :  { %s3909_s30 = scalar_lea.hbm %s5921_s1, 128 }
   0x8   :  { %p3910_p0 = scmp.ne.s32.totalorder %s5921_s1, %s3909_s30  ;;  %p3913_p1 = scmp.lt.u32.totalorder %s3909_s30, %s5921_s1 }
   0xa   :  { %p3915_p2 = pnand %p3913_p1, %p3910_p0 }
   0xc   :  { %3918 = shalt.err (!%p3915_p2)
}
   0xd   :  { %s3919_s12 = scalar_lea.vmem %s38_s25, 128  ;;  %p3924_p4 = scmp.lt.s32.totalorder %s38_s25, %s38_s25 }
   0xe   :  { %p3920_p3 = scmp.ne.s32.totalorder %s38_s25, %s3919_s12  ;;  %p3925_p5 = scmp.lt.s32.totalorder %s3919_s12, %s3919_s12 }
  0x10   :  { %p3926_p6 = por %p3925_p5, %p3924_p4 }
  0x12   :  { %p3927_p7 = pnand %p3926_p6, %p3920_p3 }
  0x14   :  { %3930 = shalt.err (!%p3927_p7)
}
  0x15   :  { %40 = dma.hbm_to_vmem [thread:$0]  %s5921_s1, 128, %s38_s25, [#allocation7]  }
  0x16   :  { %s3931_s17 = scalar_lea.hbm %s5923_s3, 96 }
  0x17   :  { %p3932_p8 = scmp.ne.s32.totalorder %s5923_s3, %s3931_s17  ;;  %p3935_p9 = scmp.lt.u32.totalorder %s3931_s17, %s5923_s3 }
  0x19   :  { %p3937_p10 = pnand %p3935_p9, %p3932_p8 }
  0x1b   :  { %3940 = shalt.err (!%p3937_p10)
}
  0x1c   :  { %s3941_s22 = scalar_lea.vmem %s60_s27, 96  ;;  %p3946_p12 = scmp.lt.s32.totalorder %s60_s27, %s60_s27 }
  0x1d   :  { %p3942_p11 = scmp.ne.s32.totalorder %s60_s27, %s3941_s22  ;;  %p3947_p13 = scmp.lt.s32.totalorder %s3941_s22, %s3941_s22 }
  0x1f   :  { %p3948_p0 = por %p3947_p13, %p3946_p12 }
  0x21   :  { %p3949_p1 = pnand %p3948_p0, %p3942_p11 }
  0x23   :  { %3952 = shalt.err (!%p3949_p1)
}
  0x24   :  { %62 = dma.hbm_to_vmem [thread:$0]  %s5923_s3, 96, %s60_s27, [#allocation10]  }
  0x25   :  { %s4099_s24 = smov [#allocation3]   ;;  %s3953_s29 = scalar_lea.hbm %s5920_s0, 512 }
  0x26   :  { %s24_s25 = sshll.u32 %s4099_s24, 4  ;;  %p3954_p2 = scmp.ne.s32.totalorder %s5920_s0, %s3953_s29  ;;  %s25_s25 = int_to_ptr.vmem [resolvable:$true] %s24_s25 }
  0x27   :  { %p3957_p3 = scmp.lt.u32.totalorder %s3953_s29, %s5920_s0 }
  0x29   :  { %p3959_p4 = pnand %p3957_p3, %p3954_p2 }
  0x2b   :  { %3962 = shalt.err (!%p3959_p4)
}
  0x2c   :  { %s3963_s11 = scalar_lea.vmem %s25_s25, 512  ;;  %p3968_p6 = scmp.lt.s32.totalorder %s25_s25, %s25_s25 }
  0x2d   :  { %p3964_p5 = scmp.ne.s32.totalorder %s25_s25, %s3963_s11  ;;  %p3969_p7 = scmp.lt.s32.totalorder %s3963_s11, %s3963_s11 }
  0x2f   :  { %p3970_p8 = por %p3969_p7, %p3968_p6 }
  0x31   :  { %p3971_p9 = pnand %p3970_p8, %p3964_p5 }
  0x33   :  { %3974 = shalt.err (!%p3971_p9)
}
  0x34   :  { %s4100_s3 = smov 64   ;;  %s4101_s27 = smov 4  }
  0x35   :  { %30 = dma.hbm_to_vmem [thread:$0]  %s5920_s0, 512, %s25_s25, [#allocation4], %s4100_s3, %s4100_s3, %s4101_s27  }
  0x36   :  { %s4102_s14 = smov [#allocation8]   ;;  %s3975_s18 = scalar_lea.hbm %s5922_s2, 6144 }
  0x37   :  { %s46_s15 = sshll.u32 %s4102_s14, 4  ;;  %p3976_p10 = scmp.ne.s32.totalorder %s5922_s2, %s3975_s18  ;;  %s47_s15 = int_to_ptr.vmem [resolvable:$true] %s46_s15 }
  0x38   :  { %p3979_p11 = scmp.lt.u32.totalorder %s3975_s18, %s5922_s2 }
  0x3a   :  { %p3981_p12 = pnand %p3979_p11, %p3976_p10 }
  0x3c   :  { %3984 = shalt.err (!%p3981_p12)
}
  0x3d   :  { %s3985_s1 = scalar_lea.vmem %s47_s15, 6144  ;;  %p3990_p0 = scmp.lt.s32.totalorder %s47_s15, %s47_s15 }
  0x3e   :  { %p3986_p13 = scmp.ne.s32.totalorder %s47_s15, %s3985_s1  ;;  %p3991_p1 = scmp.lt.s32.totalorder %s3985_s1, %s3985_s1 }
  0x40   :  { %p3992_p2 = por %p3991_p1, %p3990_p0 }
  0x42   :  { %p3993_p3 = pnand %p3992_p2, %p3986_p13 }
  0x44   :  { %3996 = shalt.err (!%p3993_p3)
}
  0x45   :  { %s4103_s0 = smov 384   ;;  %s4104_s23 = smov 24  }
  0x46   :  { %52 = dma.hbm_to_vmem [thread:$0]  %s5922_s2, 6144, %s47_s15, [#allocation7], %s4103_s0, %s4103_s0, %s4104_s23  }
  0x47   :  { %s4105_s26 = smov [#allocation11]   ;;  %s4106_s29 = smov [#allocation12]  }
  0x48   :  { %s68_s28 = sshll.u32 %s4105_s26, 4  ;;  %s81_s30 = sshll.u32 %s4106_s29, 4  ;;  %s69_s28 = int_to_ptr.vmem [resolvable:$true] %s68_s28  ;;  %s82_s30 = int_to_ptr.vmem [resolvable:$true] %s81_s30 }
  0x49   :  { %s3997_s10 = scalar_lea.hbm %s5924_s4, 12288 }
  0x4a   :  { %p3998_p4 = scmp.ne.s32.totalorder %s5924_s4, %s3997_s10  ;;  %p4001_p5 = scmp.lt.u32.totalorder %s3997_s10, %s5924_s4 }
  0x4c   :  { %p4003_p6 = pnand %p4001_p5, %p3998_p4 }
  0x4e   :  { %4006 = shalt.err (!%p4003_p6)
}
  0x4f   :  { %s4007_s2 = scalar_lea.vmem %s69_s28, 12288  ;;  %p4012_p8 = scmp.lt.s32.totalorder %s69_s28, %s69_s28 }
  0x50   :  { %p4008_p7 = scmp.ne.s32.totalorder %s69_s28, %s4007_s2  ;;  %p4013_p9 = scmp.lt.s32.totalorder %s4007_s2, %s4007_s2 }
  0x52   :  { %p4014_p10 = por %p4013_p9, %p4012_p8 }
  0x54   :  { %p4015_p11 = pnand %p4014_p10, %p4008_p7 }
  0x56   :  { %4018 = shalt.err (!%p4015_p11)
}
  0x57   :  { %74 = dma.hbm_to_vmem [thread:$0]  %s5924_s4, 12288, %s69_s28, [#allocation10], %s4103_s0, %s4103_s0, %s4104_s23  }
  0x58   :  { %s4019_s17 = scalar_lea.hbm %s5925_s5, 32 }
  0x59   :  { %p4020_p12 = scmp.ne.s32.totalorder %s5925_s5, %s4019_s17  ;;  %p4023_p13 = scmp.lt.u32.totalorder %s4019_s17, %s5925_s5 }
  0x5b   :  { %p4025_p0 = pnand %p4023_p13, %p4020_p12 }
  0x5d   :  { %4028 = shalt.err (!%p4025_p0)
}
  0x5e   :  { %s4029_s22 = scalar_lea.vmem %s82_s30, 32  ;;  %p4034_p2 = scmp.lt.s32.totalorder %s82_s30, %s82_s30 }
  0x5f   :  { %p4030_p1 = scmp.ne.s32.totalorder %s82_s30, %s4029_s22  ;;  %p4035_p3 = scmp.lt.s32.totalorder %s4029_s22, %s4029_s22 }
  0x61   :  { %p4036_p4 = por %p4035_p3, %p4034_p2 }
  0x63   :  { %p4037_p5 = pnand %p4036_p4, %p4030_p1 }
  0x65   :  { %4040 = shalt.err (!%p4037_p5)
}
  0x66   :  { %84 = dma.hbm_to_vmem [thread:$0]  %s5925_s5, 32, %s82_s30, [#allocation13]  }
  0x67   :  { %4085 = dma.done.wait [#allocation4], 512  }
  0x68   :  { %4086 = vsyncadd [#allocation4], 4294966784 }
  0x69   :  { %4087 = dma.done.wait [#allocation7], 6272  }
  0x6a   :  { %4088 = vsyncadd [#allocation7], 4294961024 }
  0x6b   :  { %4089 = dma.done.wait [#allocation10], 12384  }
  0x6c   :  { %4090 = vsyncadd [#allocation10], 4294954912 }
  0x6d   :  { %4091 = dma.done.wait [#allocation13], 32  }
  0x6e   :  { %4092 = vsyncadd [#allocation13], 4294967264  ;;  %v4107_v0 = vmov 0   ;;  %v3332_v1 = vld [vmem:[#allocation8 + $0x4] ss:$24 sps:$4 sm:$0xff]   ;;  %v4266_v53 = vld [vmem:[#allocation3 + $0x10] sm:$0xff]  }
  0x6f   :  { %488 = vmatprep.mubr.bf16.mxu0 %v4107_v0  ;;  %561 = vmatprep.mubr.bf16.mxu1 %v4107_v0  ;;  %v3334_v2 = vld [vmem:[#allocation8 + $0xc] ss:$24 sps:$4 sm:$0xff]   ;;  %v3336_v3 = vld [vmem:[#allocation8] ss:$24 sps:$4 sm:$0xff]   ;;  %v3340_v6 = vld [vmem:[#allocation8 + $0x3c] ss:$24 sps:$4 sm:$0xff]  }
  0x70   :  { %3310 = vset.pattern.permute.xlu0 %v4107_v0  ;;  %3321 = vset.pattern.permute.xlu1 %v4107_v0  ;;  %v3337_v4 = vld [vmem:[#allocation8 + $0x8] ss:$24 sps:$4 sm:$0xff]   ;;  %v3338_v5 = vld [vmem:[#allocation8 + $0x34] ss:$24 sps:$4 sm:$0xff]   ;;  %v3343_v8 = vld [vmem:[#allocation8 + $0x38] ss:$24 sps:$4 sm:$0xff]  }
  0x71   :  { %456 = vmatprep.subr.bf16.mxu0 %v3332_v1  ;;  %529 = vmatprep.subr.bf16.mxu1 %v3334_v2  ;;  %v3342_v7 = vld [vmem:[#allocation8 + $0x30] ss:$24 sps:$4 sm:$0xff]   ;;  %v3344_v9 = vld [vmem:[#allocation8 + $0x64] ss:$24 sps:$4 sm:$0xff]   ;;  %v3348_v11 = vld [vmem:[#allocation8 + $0x60] ss:$24 sps:$4 sm:$0xff]  }
  0x72   :  { %457 = vmatpush1.bf16.msra.mxu0 %v3336_v3  ;;  %530 = vmatpush1.bf16.msra.mxu1 %v3337_v4  ;;  %v3346_v10 = vld [vmem:[#allocation8 + $0x6c] ss:$24 sps:$4 sm:$0xff]   ;;  %v3349_v12 = vld [vmem:[#allocation8 + $0x68] ss:$24 sps:$4 sm:$0xff]   ;;  %v3352_v14 = vld [vmem:[#allocation8 + $0x9c] ss:$24 sps:$4 sm:$0xff]  }
  0x73   :  { %458 = vmatprep.subr.bf16.mxu0 %v3338_v5  ;;  %531 = vmatprep.subr.bf16.mxu1 %v3340_v6  ;;  %v3350_v13 = vld [vmem:[#allocation8 + $0x94] ss:$24 sps:$4 sm:$0xff]   ;;  %v3354_v15 = vld [vmem:[#allocation8 + $0x90] ss:$24 sps:$4 sm:$0xff]   ;;  %v3356_v17 = vld [vmem:[#allocation8 + $0xc4] ss:$24 sps:$4 sm:$0xff]  }
  0x74   :  { %v3355_v16 = vld [vmem:[#allocation8 + $0x98] ss:$24 sps:$4 sm:$0xff]   ;;  %v3358_v18 = vld [vmem:[#allocation8 + $0xcc] ss:$24 sps:$4 sm:$0xff]   ;;  %v3361_v20 = vld [vmem:[#allocation8 + $0xc8] ss:$24 sps:$4 sm:$0xff]  }
  0x75   :  { %v3360_v19 = vld [vmem:[#allocation8 + $0xc0] ss:$24 sps:$4 sm:$0xff]   ;;  %v3362_v21 = vld [vmem:[#allocation8 + $0xf4] ss:$24 sps:$4 sm:$0xff]   ;;  %v3366_v23 = vld [vmem:[#allocation8 + $0xf0] ss:$24 sps:$4 sm:$0xff]  }
  0x76   :  { %459 = vmatpush1.bf16.msra.mxu0 %v3342_v7  ;;  %532 = vmatpush1.bf16.msra.mxu1 %v3343_v8  ;;  %v3364_v22 = vld [vmem:[#allocation8 + $0xfc] ss:$24 sps:$4 sm:$0xff]   ;;  %v3367_v24 = vld [vmem:[#allocation8 + $0xf8] ss:$24 sps:$4 sm:$0xff]   ;;  %v3370_v26 = vld [vmem:[#allocation8 + $0x12c] ss:$24 sps:$4 sm:$0xff]  }
  0x77   :  { %460 = vmatprep.subr.bf16.mxu0 %v3344_v9  ;;  %533 = vmatprep.subr.bf16.mxu1 %v3346_v10  ;;  %v3368_v25 = vld [vmem:[#allocation8 + $0x124] ss:$24 sps:$4 sm:$0xff]   ;;  %v3372_v27 = vld [vmem:[#allocation8 + $0x120] ss:$24 sps:$4 sm:$0xff]   ;;  %v3374_v29 = vld [vmem:[#allocation8 + $0x154] ss:$24 sps:$4 sm:$0xff]  }
  0x78   :  { %v3373_v28 = vld [vmem:[#allocation8 + $0x128] ss:$24 sps:$4 sm:$0xff]   ;;  %v3376_v30 = vld [vmem:[#allocation8 + $0x15c] ss:$24 sps:$4 sm:$0xff]   ;;  %v3379_v32 = vld [vmem:[#allocation8 + $0x158] ss:$24 sps:$4 sm:$0xff]  }
  0x79   :  { %v3378_v31 = vld [vmem:[#allocation8 + $0x150] ss:$24 sps:$4 sm:$0xff]   ;;  %v3383_v33 = vld [vmem:[#allocation8 + $0x14] ss:$24 sps:$4 sm:$0xff]   ;;  %v4232_v35 = vld [vmem:[#allocation3] sm:$0xff]   ;;  %v5932_v8 = vmov 0.0|0.0  }
  0x7a   :  { %461 = vmatpush1.bf16.msra.mxu0 %v3348_v11  ;;  %534 = vmatpush1.bf16.msra.mxu1 %v3349_v12  ;;  %v4230_v34 = vld [vmem:[#allocation11 + $0x4] ss:$24 sps:$4 sm:$0xff]   ;;  %v4234_v37 = vld [vmem:[#allocation11] ss:$24 sps:$4 sm:$0xff]   ;;  %v4237_v39 = vld [vmem:[#allocation11 + $0x34] ss:$24 sps:$4 sm:$0xff]  }
  0x7b   :  { %462 = vmatprep.subr.bf16.mxu0 %v3350_v13  ;;  %535 = vmatprep.subr.bf16.mxu1 %v3352_v14  ;;  %v3381_v36 = vld [vmem:[#allocation8 + $0x10] ss:$24 sps:$4 sm:$0xff]   ;;  %v3389_v38 = vld [vmem:[#allocation8 + $0x44] ss:$24 sps:$4 sm:$0xff]   ;;  %v3387_v40 = vld [vmem:[#allocation8 + $0x40] ss:$24 sps:$4 sm:$0xff]  }
  0x7c   :  { %v4242_v41 = vld [vmem:[#allocation11 + $0x30] ss:$24 sps:$4 sm:$0xff]   ;;  %v4245_v43 = vld [vmem:[#allocation11 + $0x64] ss:$24 sps:$4 sm:$0xff]   ;;  %v4251_v46 = vld [vmem:[#allocation11 + $0x60] ss:$24 sps:$4 sm:$0xff]  }
  0x7d   :  { %v3396_v42 = vld [vmem:[#allocation8 + $0x74] ss:$24 sps:$4 sm:$0xff]   ;;  %v4248_v44 = vld [vmem:[#allocation3 + $0x8] sm:$0xff]   ;;  %v3394_v45 = vld [vmem:[#allocation8 + $0x70] ss:$24 sps:$4 sm:$0xff]   ;;  %s4110_s5 = smov [#allocation14]  }
  0x7e   :  { %463 = vmatpush1.bf16.msra.mxu0 %v3354_v15  ;;  %536 = vmatpush1.bf16.msra.mxu1 %v3355_v16  ;;  %v3402_v47 = vld [vmem:[#allocation8 + $0xa4] ss:$24 sps:$4 sm:$0xff]   ;;  %v3400_v49 = vld [vmem:[#allocation8 + $0xa0] ss:$24 sps:$4 sm:$0xff]   ;;  %v3409_v51 = vld [vmem:[#allocation8 + $0xd4] ss:$24 sps:$4 sm:$0xff]  }
  0x7f   :  { %464 = vmatprep.subr.bf16.mxu0 %v3356_v17  ;;  %537 = vmatprep.subr.bf16.mxu1 %v3358_v18  ;;  %v4255_v48 = vld [vmem:[#allocation11 + $0x94] ss:$24 sps:$4 sm:$0xff]   ;;  %v4258_v50 = vld [vmem:[#allocation11 + $0x90] ss:$24 sps:$4 sm:$0xff]   ;;  %v4263_v52 = vld [vmem:[#allocation11 + $0xc4] ss:$24 sps:$4 sm:$0xff]  }
  0x80   :  { %v3407_v54 = vld [vmem:[#allocation8 + $0xd0] ss:$24 sps:$4 sm:$0xff]   ;;  %v3415_v56 = vld [vmem:[#allocation8 + $0x104] ss:$24 sps:$4 sm:$0xff]   ;;  %v3413_v58 = vld [vmem:[#allocation8 + $0x100] ss:$24 sps:$4 sm:$0xff]  }
  0x81   :  { %v4270_v55 = vld [vmem:[#allocation11 + $0xc0] ss:$24 sps:$4 sm:$0xff]   ;;  %v4273_v57 = vld [vmem:[#allocation11 + $0xf4] ss:$24 sps:$4 sm:$0xff]   ;;  %v4276_v59 = vld [vmem:[#allocation11 + $0xf0] ss:$24 sps:$4 sm:$0xff]  }
  0x82   :  { %465 = vmatpush1.bf16.msra.mxu0 %v3360_v19  ;;  %538 = vmatpush1.bf16.msra.mxu1 %v3361_v20  ;;  %v3422_v60 = vld [vmem:[#allocation8 + $0x134] ss:$24 sps:$4 sm:$0xff]   ;;  %v3420_v63 = vld [vmem:[#allocation8 + $0x130] ss:$24 sps:$4 sm:$0xff]   ;;  %v3428_v2 = vld [vmem:[#allocation8 + $0x164] ss:$24 sps:$4 sm:$0xff]  }
  0x83   :  { %466 = vmatprep.subr.bf16.mxu0 %v3362_v21  ;;  %539 = vmatprep.subr.bf16.mxu1 %v3364_v22  ;;  %v4281_v61 = vld [vmem:[#allocation11 + $0x124] ss:$24 sps:$4 sm:$0xff]   ;;  %v4284_v62 = vld [vmem:[#allocation3 + $0x18] sm:$0xff]   ;;  %v4288_v1 = vld [vmem:[#allocation11 + $0x120] ss:$24 sps:$4 sm:$0xff]   ;;  %s3026_s0 = sshll.u32 %s4110_s5, 4  ;;  %s3027_s0 = int_to_ptr.vmem [resolvable:$true] %s3026_s0 }
  0x84   :  { %v4291_v3 = vld [vmem:[#allocation11 + $0x154] ss:$24 sps:$4 sm:$0xff]   ;;  %v4294_v5 = vld [vmem:[#allocation11 + $0x150] ss:$24 sps:$4 sm:$0xff]   ;;  %v4298_v6 = vld [vmem:[#allocation11 + $0x184] ss:$24 sps:$4 sm:$0xff]   ;;  %p4046_p7 = scmp.lt.s32.totalorder %s3027_s0, %s3027_s0 }
  0x85   :  { %v3426_v4 = vld [vmem:[#allocation8 + $0x160] ss:$24 sps:$4 sm:$0xff]   ;;  %v4301_v7 = vld [vmem:[#allocation11 + $0xc] ss:$24 sps:$4 sm:$0xff]   ;;  %v4308_v10 = vld [vmem:[#allocation11 + $0x8] ss:$24 sps:$4 sm:$0xff]  }
  0x86   :  { %467 = vmatpush1.bf16.msra.mxu0 %v3366_v23  ;;  %540 = vmatpush1.bf16.msra.mxu1 %v3367_v24  ;;  %v4305_v9 = vld [vmem:[#allocation11 + $0x180] ss:$24 sps:$4 sm:$0xff]   ;;  %v4310_v11 = vld [vmem:[#allocation11 + $0x1b4] ss:$24 sps:$4 sm:$0xff]   ;;  %v4317_v13 = vld [vmem:[#allocation11 + $0x1b0] ss:$24 sps:$4 sm:$0xff]  }
  0x87   :  { %468 = vmatprep.subr.bf16.mxu0 %v3368_v25  ;;  %541 = vmatprep.subr.bf16.mxu1 %v3370_v26  ;;  %v4314_v12 = vld [vmem:[#allocation11 + $0x3c] ss:$24 sps:$4 sm:$0xff]   ;;  %v4319_v14 = vld [vmem:[#allocation11 + $0x38] ss:$24 sps:$4 sm:$0xff]   ;;  %v4327_v16 = vld [vmem:[#allocation11 + $0x6c] ss:$24 sps:$4 sm:$0xff]  }
  0x88   :  { %v4323_v15 = vld [vmem:[#allocation11 + $0x1e4] ss:$24 sps:$4 sm:$0xff]   ;;  %v4330_v17 = vld [vmem:[#allocation11 + $0x1e0] ss:$24 sps:$4 sm:$0xff]   ;;  %v4336_v19 = vld [vmem:[#allocation11 + $0x214] ss:$24 sps:$4 sm:$0xff]  }
  0x89   :  { %v4334_v18 = vld [vmem:[#allocation11 + $0x68] ss:$24 sps:$4 sm:$0xff]   ;;  %v4340_v20 = vld [vmem:[#allocation11 + $0x9c] ss:$24 sps:$4 sm:$0xff]   ;;  %v4345_v22 = vld [vmem:[#allocation11 + $0x98] ss:$24 sps:$4 sm:$0xff]  }
  0x8a   :  { %469 = vmatpush1.bf16.msra.mxu0 %v3372_v27  ;;  %542 = vmatpush1.bf16.msra.mxu1 %v3373_v28  ;;  %v4343_v21 = vld [vmem:[#allocation11 + $0x210] ss:$24 sps:$4 sm:$0xff]   ;;  %v4349_v23 = vld [vmem:[#allocation11 + $0x244] ss:$24 sps:$4 sm:$0xff]   ;;  %v4356_v25 = vld [vmem:[#allocation11 + $0x240] ss:$24 sps:$4 sm:$0xff]  }
  0x8b   :  { %470 = vmatprep.subr.bf16.mxu0 %v3374_v29  ;;  %543 = vmatprep.subr.bf16.mxu1 %v3376_v30  ;;  %v4353_v24 = vld [vmem:[#allocation11 + $0xcc] ss:$24 sps:$4 sm:$0xff]   ;;  %v4360_v26 = vld [vmem:[#allocation11 + $0xc8] ss:$24 sps:$4 sm:$0xff]   ;;  %v4366_v28 = vld [vmem:[#allocation11 + $0xfc] ss:$24 sps:$4 sm:$0xff]  }
  0x8c   :  { %v4362_v27 = vld [vmem:[#allocation11 + $0x274] ss:$24 sps:$4 sm:$0xff]   ;;  %v4369_v29 = vld [vmem:[#allocation11 + $0x270] ss:$24 sps:$4 sm:$0xff]   ;;  %s4111_s23 = smov [#allocation15]   ;;  %s4041_s25 = scalar_lea.vmem %s3027_s0, 2048 }
  0x8d   :  { %v4371_v30 = vld [vmem:[#allocation11 + $0xf8] ss:$24 sps:$4 sm:$0xff]   ;;  %s3039_s24 = sshll.u32 %s4111_s23, 4  ;;  %p4042_p6 = scmp.ne.s32.totalorder %s3027_s0, %s4041_s25  ;;  %s3040_s24 = int_to_ptr.vmem [resolvable:$true] %s3039_s24 }
  0x8e   :  { %471 = vmatpush1.bf16.msra.mxu0 %v3378_v31  ;;  %544 = vmatpush1.bf16.msra.mxu1 %v3379_v32  ;;  %v4375_v31 = vld [vmem:[#allocation11 + $0x2a4] ss:$24 sps:$4 sm:$0xff]   ;;  %p4047_p8 = scmp.lt.s32.totalorder %s4041_s25, %s4041_s25 }
  0x8f   :  { %602 = vmatprep.subr.bf16.mxu0 %v3383_v33  ;;  %1423 = vmatprep.subr.bf16.mxu1 %v4230_v34  ;;  %v4379_v32 = vld [vmem:[#allocation11 + $0x12c] ss:$24 sps:$4 sm:$0xff]   ;;  %v4382_v33 = vld [vmem:[#allocation11 + $0x2a0] ss:$24 sps:$4 sm:$0xff]  }
  0x90   :  { %p4048_p9 = por %p4047_p8, %p4046_p7 }
  0x91   :  { %489 = vmatmul.mubr.bf16.vlgmr.msra.gmra.mrb[0].mxu0 %v4232_v35  ;;  %562 = vmatmul.mubr.bf16.vlgmr.msra.gmra.mrb[0].mxu1 %v4232_v35 }
  0x92   :  { %603 = vmatpush1.bf16.msra.mxu0 %v3381_v36  ;;  %1424 = vmatpush1.bf16.msra.mxu1 %v4234_v37  ;;  %v4388_v36 = vld [vmem:[#allocation11 + $0x2d4] ss:$24 sps:$4 sm:$0xff]   ;;  %p4049_p10 = pnand %p4048_p9, %p4042_p6 }
  0x93   :  { %604 = vmatprep.subr.bf16.mxu0 %v3389_v38  ;;  %1425 = vmatprep.subr.bf16.mxu1 %v4237_v39  ;;  %v4392_v38 = vld [vmem:[#allocation11 + $0x15c] ss:$24 sps:$4 sm:$0xff]  }
  0x94   :  { %498 = vmatprep.mubr.bf16.mxu0 %v4107_v0  ;;  %571 = vmatprep.mubr.bf16.mxu1 %v4107_v0 }
  0x96   :  { %605 = vmatpush1.bf16.msra.mxu0 %v3387_v40  ;;  %1426 = vmatpush1.bf16.msra.mxu1 %v4242_v41  ;;  %v4395_v40 = vld [vmem:[#allocation11 + $0x2d0] ss:$24 sps:$4 sm:$0xff]  }
  0x97   :  { %606 = vmatprep.subr.bf16.mxu0 %v3396_v42  ;;  %1427 = vmatprep.subr.bf16.mxu1 %v4245_v43  ;;  %v4401_v42 = vld [vmem:[#allocation11 + $0x18c] ss:$24 sps:$4 sm:$0xff]  }
  0x99   :  { %499 = vmatmul.mubr.bf16.gmra.mrb[4].mxu0 %v4248_v44  ;;  %572 = vmatmul.mubr.bf16.gmra.mrb[4].mxu1 %v4248_v44 }
  0x9a   :  { %607 = vmatpush1.bf16.msra.mxu0 %v3394_v45  ;;  %1428 = vmatpush1.bf16.msra.mxu1 %v4251_v46  ;;  %v4408_v45 = vld [vmem:[#allocation11 + $0x188] ss:$24 sps:$4 sm:$0xff]  }
  0x9b   :  { %608 = vmatprep.subr.bf16.mxu0 %v3402_v47  ;;  %1429 = vmatprep.subr.bf16.mxu1 %v4255_v48  ;;  %v4410_v47 = vld [vmem:[#allocation11 + $0x10] ss:$24 sps:$4 sm:$0xff]  }
  0x9c   :  { %508 = vmatprep.mubr.bf16.mxu0 %v4107_v0  ;;  %581 = vmatprep.mubr.bf16.mxu1 %v4107_v0  ;;  %6161 = vst [vmem:[#allocation23_spill] sm:$0xff] %v4410_v47 }
  0x9e   :  { %609 = vmatpush1.bf16.msra.mxu0 %v3400_v49  ;;  %1430 = vmatpush1.bf16.msra.mxu1 %v4258_v50  ;;  %v4414_v49 = vld [vmem:[#allocation11 + $0x1bc] ss:$24 sps:$4 sm:$0xff]  }
  0x9f   :  { %610 = vmatprep.subr.bf16.mxu0 %v3409_v51  ;;  %1431 = vmatprep.subr.bf16.mxu1 %v4263_v52  ;;  %6162 = vst [vmem:[#allocation24_spill] sm:$0xff] %v4414_v49  ;;  %v4418_v51 = vld [vmem:[#allocation11 + $0x44] ss:$24 sps:$4 sm:$0xff]  }
  0xa0   :  { %6163 = vst [vmem:[#allocation25_spill] sm:$0xff] %v4418_v51 }
  0xa1   :  { %509 = vmatmul.mubr.bf16.gmra.mrb[8].mxu0 %v4266_v53  ;;  %582 = vmatmul.mubr.bf16.gmra.mrb[8].mxu1 %v4266_v53 }
  0xa2   :  { %611 = vmatpush1.bf16.msra.mxu0 %v3407_v54  ;;  %1432 = vmatpush1.bf16.msra.mxu1 %v4270_v55  ;;  %v4425_v54 = vld [vmem:[#allocation11 + $0x40] ss:$24 sps:$4 sm:$0xff]  }
  0xa3   :  { %612 = vmatprep.subr.bf16.mxu0 %v3415_v56  ;;  %1433 = vmatprep.subr.bf16.mxu1 %v4273_v57  ;;  %6164 = vst [vmem:[#allocation26_spill] sm:$0xff] %v4425_v54  ;;  %v4427_v56 = vld [vmem:[#allocation6] sm:$0xff] }
  0xa4   :  { %518 = vmatprep.mubr.bf16.mxu0 %v4107_v0  ;;  %591 = vmatprep.mubr.bf16.mxu1 %v4107_v0  ;;  %vm1613_vm0 = vcmp.gt.s32.totalorder %v4427_v56, 0  ;;  %vm1616_vm1 = vcmp.gt.s32.totalorder %v4427_v56, 7  ;;  %vm1817_vm2 = vcmp.gt.s32.totalorder %v4427_v56, 1  ;;  %vm1820_vm3 = vcmp.gt.s32.totalorder %v4427_v56, 6  ;;  %v4568_v56 = vld [vmem:[#allocation11 + $0x2e4] ss:$24 sps:$4 sm:$0xff]  }
  0xa6   :  { %613 = vmatpush1.bf16.msra.mxu0 %v3413_v58  ;;  %1434 = vmatpush1.bf16.msra.mxu1 %v4276_v59  ;;  %v4431_v58 = vld [vmem:[#allocation11 + $0x1ec] ss:$24 sps:$4 sm:$0xff]  }
  0xa7   :  { %614 = vmatprep.subr.bf16.mxu0 %v3422_v60  ;;  %1435 = vmatprep.subr.bf16.mxu1 %v4281_v61  ;;  %v4433_v60 = vld [vmem:[#allocation11 + $0x74] ss:$24 sps:$4 sm:$0xff]  }
  0xa8   :  { %6165 = vst [vmem:[#allocation27_spill] sm:$0xff] %v4433_v60 }
  0xa9   :  { %519 = vmatmul.mubr.bf16.gmra.mrb[12].mxu0 %v4284_v62  ;;  %592 = vmatmul.mubr.bf16.gmra.mrb[12].mxu1 %v4284_v62 }
  0xaa   :  { %615 = vmatpush1.bf16.msra.mxu0 %v3420_v63  ;;  %1436 = vmatpush1.bf16.msra.mxu1 %v4288_v1 }
  0xab   :  { %616 = vmatprep.subr.bf16.mxu0 %v3428_v2  ;;  %1437 = vmatprep.subr.bf16.mxu1 %v4291_v3 }
  0xac   :  { %634 = vmatprep.mubr.bf16.mxu0 %v4107_v0  ;;  %1455 = vmatprep.mubr.bf16.mxu1 %v5932_v8 }
  0xae   :  { %617 = vmatpush1.bf16.msra.mxu0 %v3426_v4  ;;  %1438 = vmatpush1.bf16.msra.mxu1 %v4294_v5 }
  0xaf   :  { %1439 = vmatprep.subr.bf16.mxu1 %v4298_v6  ;;  %1464 = vmatprep.subr.bf16.mxu0 %v4301_v7 }
  0xb1   :  { %635 = vmatmul.mubr.bf16.vlgmr.msra.gmra.mrb[16].mxu0 %v4232_v35  ;;  %v4386_v35 = vld [vmem:[#allocation11 + $0x128] ss:$24 sps:$4 sm:$0xff]  }
  0xb2   :  { %1440 = vmatpush1.bf16.msra.mxu1 %v4305_v9  ;;  %1465 = vmatpush1.bf16.msra.mxu0 %v4308_v10 }
  0xb3   :  { %1441 = vmatprep.subr.bf16.mxu1 %v4310_v11  ;;  %1466 = vmatprep.subr.bf16.mxu0 %v4314_v12 }
  0xb4   :  { %644 = vmatprep.mubr.bf16.mxu0 %v4107_v0 }
  0xb6   :  { %1442 = vmatpush1.bf16.msra.mxu1 %v4317_v13  ;;  %1467 = vmatpush1.bf16.msra.mxu0 %v4319_v14 }
  0xb7   :  { %1443 = vmatprep.subr.bf16.mxu1 %v4323_v15  ;;  %1468 = vmatprep.subr.bf16.mxu0 %v4327_v16 }
  0xb9   :  { %645 = vmatmul.mubr.bf16.gmra.mrb[20].mxu0 %v4248_v44  ;;  %v4405_v44 = vld [vmem:[#allocation11 + $0x14] ss:$24 sps:$4 sm:$0xff]  }
  0xba   :  { %1444 = vmatpush1.bf16.msra.mxu1 %v4330_v17  ;;  %1469 = vmatpush1.bf16.msra.mxu0 %v4334_v18 }
  0xbb   :  { %1445 = vmatprep.subr.bf16.mxu1 %v4336_v19  ;;  %1470 = vmatprep.subr.bf16.mxu0 %v4340_v20 }
  0xbc   :  { %654 = vmatprep.mubr.bf16.mxu0 %v4107_v0 }
  0xbe   :  { %1446 = vmatpush1.bf16.msra.mxu1 %v4343_v21  ;;  %1471 = vmatpush1.bf16.msra.mxu0 %v4345_v22 }
  0xbf   :  { %1447 = vmatprep.subr.bf16.mxu1 %v4349_v23  ;;  %1472 = vmatprep.subr.bf16.mxu0 %v4353_v24 }
  0xc1   :  { %655 = vmatmul.mubr.bf16.gmra.mrb[24].mxu0 %v4266_v53  ;;  %v4423_v53 = vld [vmem:[#allocation11 + $0x1b8] ss:$24 sps:$4 sm:$0xff]  }
  0xc2   :  { %1448 = vmatpush1.bf16.msra.mxu1 %v4356_v25  ;;  %1473 = vmatpush1.bf16.msra.mxu0 %v4360_v26 }
  0xc3   :  { %1449 = vmatprep.subr.bf16.mxu1 %v4362_v27  ;;  %1474 = vmatprep.subr.bf16.mxu0 %v4366_v28 }
  0xc4   :  { %664 = vmatprep.mubr.bf16.mxu0 %v4107_v0  ;;  %v4397_v0 = vld [vmem:[#allocation11 + $0x158] ss:$24 sps:$4 sm:$0xff]  }
  0xc6   :  { %1450 = vmatpush1.bf16.msra.mxu1 %v4369_v29  ;;  %1475 = vmatpush1.bf16.msra.mxu0 %v4371_v30 }
  0xc7   :  { %1451 = vmatprep.subr.bf16.mxu1 %v4375_v31  ;;  %1476 = vmatprep.subr.bf16.mxu0 %v4379_v32 }
  0xc9   :  { %665 = vmatmul.mubr.bf16.gmra.mrb[28].mxu0 %v4284_v62  ;;  %v5934_v62 = vmov 0.0  }
  0xca   :  { %1452 = vmatpush1.bf16.msra.mxu1 %v4382_v33  ;;  %1477 = vmatpush1.bf16.msra.mxu0 %v4386_v35  ;;  %v3233_v63 = vsel %vm1613_vm0, 1.0, %v5934_v62  ;;  %v3234_v2 = vsel %vm1616_vm1, 1.0, %v5934_v62  ;;  %v4460_v62 = vld [vmem:[#allocation11 + $0x24c] ss:$24 sps:$4 sm:$0xff]  }
  0xcb   :  { %1453 = vmatprep.subr.bf16.mxu1 %v4388_v36  ;;  %1478 = vmatprep.subr.bf16.mxu0 %v4392_v38  ;;  %v3311_v4 = vpack.i.bf16 %v3233_v63, %v3234_v2  ;;  %v4454_v63 = vld [vmem:[#allocation11 + $0x218] ss:$24 sps:$4 sm:$0xff]   ;;  %6171 = vst [vmem:[#allocation33_spill] sm:$0xff] %v4460_v62 }
  0xcc   :  { %1496 = vmatprep.mubr.bf16.mxu0 %v5932_v8  ;;  %6169 = vst [vmem:[#allocation31_spill] sm:$0xff] %v4454_v63  ;;  %v4456_v2 = vld [vmem:[#allocation11 + $0xa0] ss:$24 sps:$4 sm:$0xff]  }
  0xcd   :  { %3312 = vperm.xlu0 %3310, %v3311_v4   ;;  %6170 = vst [vmem:[#allocation32_spill] sm:$0xff] %v4456_v2  ;;  %v4466_v4 = vld [vmem:[#allocation11 + $0x248] ss:$24 sps:$4 sm:$0xff]  }
  0xce   :  { %1454 = vmatpush1.bf16.msra.mxu1 %v4395_v40  ;;  %1479 = vmatpush1.bf16.msra.mxu0 %v4397_v0  ;;  %6173 = vst [vmem:[#allocation35_spill] sm:$0xff] %v4466_v4 }
  0xcf   :  { %1480 = vmatprep.subr.bf16.mxu0 %v4401_v42  ;;  %1505 = vmatprep.subr.bf16.mxu1 %v4405_v44 }
  0xd1   :  { %1456 = vmatmul.mubr.bf16.vlgmr.msra.gmra.mrb[16].mxu1 %v5932_v8 }
  0xd2   :  { %1481 = vmatpush1.bf16.msra.mxu0 %v4408_v45  ;;  %1506 = vmatpush1.bf16.msra.mxu1 %v4410_v47  ;;  %v4444_v47 = vld [vmem:[#allocation11 + $0x70] ss:$24 sps:$4 sm:$0xff]  }
  0xd3   :  { %1482 = vmatprep.subr.bf16.mxu0 %v4414_v49  ;;  %1507 = vmatprep.subr.bf16.mxu1 %v4418_v51  ;;  %v4442_v51 = vld [vmem:[#allocation11 + $0x1e8] ss:$24 sps:$4 sm:$0xff]   ;;  %6166 = vst [vmem:[#allocation28_spill] sm:$0xff] %v4444_v47  ;;  %v4448_v49 = vld [vmem:[#allocation11 + $0x21c] ss:$24 sps:$4 sm:$0xff]  }
  0xd4   :  { %1537 = vmatprep.mubr.bf16.mxu1 %v5932_v8  ;;  %6167 = vst [vmem:[#allocation29_spill] sm:$0xff] %v4448_v49  ;;  %v4450_v8 = vld [vmem:[#allocation11 + $0xa4] ss:$24 sps:$4 sm:$0xff]  }
  0xd5   :  { %6168 = vst [vmem:[#allocation30_spill] sm:$0xff] %v4450_v8 }
  0xd6   :  { %1483 = vmatpush1.bf16.msra.mxu0 %v4423_v53  ;;  %1508 = vmatpush1.bf16.msra.mxu1 %v4425_v54  ;;  %v4468_v54 = vld [vmem:[#allocation11 + $0xd0] ss:$24 sps:$4 sm:$0xff]  }
  0xd7   :  { %1484 = vmatprep.subr.bf16.mxu0 %v4431_v58  ;;  %1509 = vmatprep.subr.bf16.mxu1 %v4433_v60  ;;  %v4462_v60 = vld [vmem:[#allocation11 + $0xd4] ss:$24 sps:$4 sm:$0xff]   ;;  %6174 = vst [vmem:[#allocation36_spill] sm:$0xff] %v4468_v54 }
  0xd8   :  { %6172 = vst [vmem:[#allocation34_spill] sm:$0xff] %v4462_v60 }
  0xda   :  { %1485 = vmatpush1.bf16.msra.mxu0 %v4442_v51  ;;  %1510 = vmatpush1.bf16.msra.mxu1 %v4444_v47  ;;  %v4472_v47 = vld [vmem:[#allocation11 + $0x27c] ss:$24 sps:$4 sm:$0xff]  }
  0xdb   :  { %1486 = vmatprep.subr.bf16.mxu0 %v4448_v49  ;;  %1511 = vmatprep.subr.bf16.mxu1 %v4450_v8  ;;  %6175 = vst [vmem:[#allocation37_spill] sm:$0xff] %v4472_v47  ;;  %v4474_v49 = vld [vmem:[#allocation11 + $0x104] ss:$24 sps:$4 sm:$0xff]   ;;  %v4478_v8 = vld [vmem:[#allocation11 + $0x278] ss:$24 sps:$4 sm:$0xff]  }
  0xdc   :  { %6176 = vst [vmem:[#allocation38_spill] sm:$0xff] %v4474_v49  ;;  %6177 = vst [vmem:[#allocation39_spill] sm:$0xff] %v4478_v8 }
  0xde   :  { %1487 = vmatpush1.bf16.msra.mxu0 %v4454_v63  ;;  %1512 = vmatpush1.bf16.msra.mxu1 %v4456_v2  ;;  %v4480_v63 = vld [vmem:[#allocation11 + $0x100] ss:$24 sps:$4 sm:$0xff]   ;;  %v4484_v2 = vld [vmem:[#allocation11 + $0x2ac] ss:$24 sps:$4 sm:$0xff]  }
  0xdf   :  { %1488 = vmatprep.subr.bf16.mxu0 %v4460_v62  ;;  %1513 = vmatprep.subr.bf16.mxu1 %v4462_v60  ;;  %6178 = vst [vmem:[#allocation40_spill] sm:$0xff] %v4480_v63  ;;  %v4486_v62 = vld [vmem:[#allocation11 + $0x134] ss:$24 sps:$4 sm:$0xff]   ;;  %v4490_v60 = vld [vmem:[#allocation11 + $0x2a8] ss:$24 sps:$4 sm:$0xff]  }
  0xe0   :  { %6179 = vst [vmem:[#allocation41_spill] sm:$0xff] %v4486_v62  ;;  %6180 = vst [vmem:[#allocation42_spill] sm:$0xff] %v4490_v60 }
  0xe2   :  { %1489 = vmatpush1.bf16.msra.mxu0 %v4466_v4  ;;  %1514 = vmatpush1.bf16.msra.mxu1 %v4468_v54  ;;  %v4492_v4 = vld [vmem:[#allocation11 + $0x130] ss:$24 sps:$4 sm:$0xff]   ;;  %v4496_v54 = vld [vmem:[#allocation11 + $0x2dc] ss:$24 sps:$4 sm:$0xff]  }
  0xe3   :  { %1490 = vmatprep.subr.bf16.mxu0 %v4472_v47  ;;  %1515 = vmatprep.subr.bf16.mxu1 %v4474_v49  ;;  %6181 = vst [vmem:[#allocation43_spill] sm:$0xff] %v4492_v4  ;;  %6182 = vst [vmem:[#allocation44_spill] sm:$0xff] %v4496_v54  ;;  %v4498_v47 = vld [vmem:[#allocation11 + $0x164] ss:$24 sps:$4 sm:$0xff]   ;;  %v4502_v49 = vld [vmem:[#allocation11 + $0x2d8] ss:$24 sps:$4 sm:$0xff]  }
  0xe4   :  { %6183 = vst [vmem:[#allocation45_spill] sm:$0xff] %v4498_v47 }
  0xe6   :  { %1491 = vmatpush1.bf16.msra.mxu0 %v4478_v8  ;;  %1516 = vmatpush1.bf16.msra.mxu1 %v4480_v63  ;;  %v4504_v8 = vld [vmem:[#allocation11 + $0x160] ss:$24 sps:$4 sm:$0xff]   ;;  %v4508_v63 = vld [vmem:[#allocation11 + $0x194] ss:$24 sps:$4 sm:$0xff]  }
  0xe7   :  { %1492 = vmatprep.subr.bf16.mxu0 %v4484_v2  ;;  %1517 = vmatprep.subr.bf16.mxu1 %v4486_v62  ;;  %6184 = vst [vmem:[#allocation46_spill] sm:$0xff] %v4504_v8  ;;  %6185 = vst [vmem:[#allocation47_spill] sm:$0xff] %v4508_v63  ;;  %v4512_v62 = vld [vmem:[#allocation11 + $0x190] ss:$24 sps:$4 sm:$0xff]  }
  0xea   :  { %1493 = vmatpush1.bf16.msra.mxu0 %v4490_v60  ;;  %1518 = vmatpush1.bf16.msra.mxu1 %v4492_v4  ;;  %v4515_v60 = vld [vmem:[#allocation11 + $0x1c4] ss:$24 sps:$4 sm:$0xff]   ;;  %v6186_v4 = vmov 0.0|0.0  }
  0xeb   :  { %1494 = vmatprep.subr.bf16.mxu0 %v4496_v54  ;;  %1519 = vmatprep.subr.bf16.mxu1 %v4498_v47  ;;  %v4520_v54 = vld [vmem:[#allocation11 + $0x1c0] ss:$24 sps:$4 sm:$0xff]   ;;  %v4524_v47 = vld [vmem:[#allocation11 + $0x1f4] ss:$24 sps:$4 sm:$0xff]  }
  0xee   :  { %1495 = vmatpush1.bf16.msra.mxu0 %v4502_v49  ;;  %1520 = vmatpush1.bf16.msra.mxu1 %v4504_v8  ;;  %v4532_v8 = vld [vmem:[#allocation11 + $0x224] ss:$24 sps:$4 sm:$0xff]  }
  0xef   :  { %1521 = vmatprep.subr.bf16.mxu1 %v4508_v63  ;;  %1638 = vmatprep.subr.bf16.mxu0 %v4230_v34  ;;  %v4528_v63 = vld [vmem:[#allocation11 + $0x1f0] ss:$24 sps:$4 sm:$0xff]   ;;  %6187 = vst [vmem:[#allocation48_spill] sm:$0xff] %v4532_v8 }
  0xf1   :  { %1497 = vmatmul.mubr.bf16.vlgmr.msra.gmra.mrb[32].mxu0 %v6186_v4 }
  0xf2   :  { %1522 = vmatpush1.bf16.msra.mxu1 %v4512_v62  ;;  %1639 = vmatpush1.bf16.msra.mxu0 %v4234_v37  ;;  %v4536_v37 = vld [vmem:[#allocation11 + $0x220] ss:$24 sps:$4 sm:$0xff]  }
  0xf3   :  { %1523 = vmatprep.subr.bf16.mxu1 %v4515_v60  ;;  %1640 = vmatprep.subr.bf16.mxu0 %v4237_v39  ;;  %6188 = vst [vmem:[#allocation49_spill] sm:$0xff] %v4536_v37  ;;  %v4540_v39 = vld [vmem:[#allocation11 + $0x254] ss:$24 sps:$4 sm:$0xff]  }
  0xf4   :  { %6189 = vst [vmem:[#allocation50_spill] sm:$0xff] %v4540_v39 }
  0xf6   :  { %1524 = vmatpush1.bf16.msra.mxu1 %v4520_v54  ;;  %1641 = vmatpush1.bf16.msra.mxu0 %v4242_v41  ;;  %v4544_v41 = vld [vmem:[#allocation11 + $0x250] ss:$24 sps:$4 sm:$0xff]  }
  0xf7   :  { %1525 = vmatprep.subr.bf16.mxu1 %v4524_v47  ;;  %1642 = vmatprep.subr.bf16.mxu0 %v4245_v43  ;;  %v4548_v43 = vld [vmem:[#allocation11 + $0x284] ss:$24 sps:$4 sm:$0xff]  }
  0xfa   :  { %1526 = vmatpush1.bf16.msra.mxu1 %v4528_v63  ;;  %1643 = vmatpush1.bf16.msra.mxu0 %v4251_v46  ;;  %v4554_v46 = vld [vmem:[#allocation11 + $0x280] ss:$24 sps:$4 sm:$0xff]  }
  0xfb   :  { %1527 = vmatprep.subr.bf16.mxu1 %v4532_v8  ;;  %1644 = vmatprep.subr.bf16.mxu0 %v4255_v48  ;;  %v6190_v48 = vmov 0.0  }
  0xfc   :  { %v3240_v8 = vsel %vm1820_vm3, 1.0, %v6190_v48 }
  0xfe   :  { %1528 = vmatpush1.bf16.msra.mxu1 %v4536_v37  ;;  %1645 = vmatpush1.bf16.msra.mxu0 %v4258_v50  ;;  %v3239_v37 = vsel %vm1817_vm2, 1.0, %v6190_v48  ;;  %v4560_v50 = vld [vmem:[#allocation11 + $0x2b4] ss:$24 sps:$4 sm:$0xff]  }
  0xff   :  { %1529 = vmatprep.subr.bf16.mxu1 %v4540_v39  ;;  %1646 = vmatprep.subr.bf16.mxu0 %v4263_v52  ;;  %v3316_v39 = vpack.i.bf16 %v3239_v37, %v3240_v8  ;;  %v4564_v52 = vld [vmem:[#allocation11 + $0x2b0] ss:$24 sps:$4 sm:$0xff]   ;;  %v6199_v8 = vld [vmem:[#allocation44_spill] sm:$0xff] }
 0x101   :  { %3317 = vperm.xlu0 %3310, %v3316_v39  }
 0x102   :  { %1530 = vmatpush1.bf16.msra.mxu1 %v4544_v41  ;;  %1647 = vmatpush1.bf16.msra.mxu0 %v4270_v55  ;;  %v4572_v55 = vld [vmem:[#allocation11 + $0x2e0] ss:$24 sps:$4 sm:$0xff]  }
 0x103   :  { %1531 = vmatprep.subr.bf16.mxu1 %v4548_v43  ;;  %1648 = vmatprep.subr.bf16.mxu0 %v4273_v57  ;;  %v6191_v57 = vld [vmem:[#allocation24_spill] sm:$0xff] }
 0x106   :  { %1532 = vmatpush1.bf16.msra.mxu1 %v4554_v46  ;;  %1649 = vmatpush1.bf16.msra.mxu0 %v4276_v59  ;;  %v6192_v59 = vld [vmem:[#allocation29_spill] sm:$0xff] }
 0x107   :  { %1533 = vmatprep.subr.bf16.mxu1 %v4560_v50  ;;  %1650 = vmatprep.subr.bf16.mxu0 %v4281_v61  ;;  %v6193_v61 = vld [vmem:[#allocation31_spill] sm:$0xff] }
 0x10a   :  { %1534 = vmatpush1.bf16.msra.mxu1 %v4564_v52  ;;  %1651 = vmatpush1.bf16.msra.mxu0 %v4288_v1  ;;  %v6194_v1 = vld [vmem:[#allocation33_spill] sm:$0xff] }
 0x10b   :  { %1535 = vmatprep.subr.bf16.mxu1 %v4568_v56  ;;  %1652 = vmatprep.subr.bf16.mxu0 %v4291_v3  ;;  %v6195_v3 = vld [vmem:[#allocation35_spill] sm:$0xff] }
 0x10e   :  { %1536 = vmatpush1.bf16.msra.mxu1 %v4572_v55  ;;  %1653 = vmatpush1.bf16.msra.mxu0 %v4294_v5  ;;  %v6196_v5 = vld [vmem:[#allocation37_spill] sm:$0xff] }
 0x10f   :  { %1679 = vmatprep.subr.bf16.mxu1 %v4301_v7  ;;  %1654 = vmatprep.subr.bf16.mxu0 %v4298_v6  ;;  %v6197_v6 = vld [vmem:[#allocation39_spill] sm:$0xff]  ;;  %v6198_v7 = vld [vmem:[#allocation42_spill] sm:$0xff] }
 0x111   :  { %1538 = vmatmul.mubr.bf16.vlgmr.msra.gmra.mrb[20].mxu1 %v6186_v4 }
 0x112   :  { %1680 = vmatpush1.bf16.msra.mxu1 %v4308_v10  ;;  %1655 = vmatpush1.bf16.msra.mxu0 %v4305_v9  ;;  %v162_v9 = vlaneseq }
 0x113   :  { %1681 = vmatprep.subr.bf16.mxu1 %v4314_v12  ;;  %1656 = vmatprep.subr.bf16.mxu0 %v4310_v11 }
 0x114   :  { %v4630_v10 = vshrl.u32 %v162_v9, 7 }
 0x116   :  { %1682 = vmatpush1.bf16.msra.mxu1 %v4319_v14  ;;  %1657 = vmatpush1.bf16.msra.mxu0 %v4317_v13  ;;  %v172_v11 = vsub.s32 2, %v4630_v10  ;;  %v164_v12 = vsub.s32 0, %v4630_v10  ;;  %v4634_v13 = vld [vmem:[#allocation9] sm:$0x3f]  ;;  %v176_v14 = vsub.s32 3, %v4630_v10 }
 0x117   :  { %1683 = vmatprep.subr.bf16.mxu1 %v4327_v16  ;;  %1658 = vmatprep.subr.bf16.mxu0 %v4323_v15  ;;  %v168_v15 = vsub.s32 1, %v4630_v10 }
 0x118   :  { %v4639_v16 = vrot.slane %v4634_v13, %v172_v11 }
 0x11a   :  { %1684 = vmatpush1.bf16.msra.mxu1 %v4334_v18  ;;  %1659 = vmatpush1.bf16.msra.mxu0 %v4330_v17  ;;  %v4642_v17 = vrot.slane %v4634_v13, %v164_v12  ;;  %v4648_v18 = vrot.slane %v4634_v13, %v168_v15 }
 0x11b   :  { %1685 = vmatprep.subr.bf16.mxu1 %v4340_v20  ;;  %1660 = vmatprep.subr.bf16.mxu0 %v4336_v19 }
 0x11e   :  { %1686 = vmatpush1.bf16.msra.mxu1 %v4345_v22  ;;  %1661 = vmatpush1.bf16.msra.mxu0 %v4343_v21 }
 0x11f   :  { %1687 = vmatprep.subr.bf16.mxu1 %v4353_v24  ;;  %1662 = vmatprep.subr.bf16.mxu0 %v4349_v23 }
 0x122   :  { %1688 = vmatpush1.bf16.msra.mxu1 %v4360_v26  ;;  %1663 = vmatpush1.bf16.msra.mxu0 %v4356_v25 }
 0x123   :  { %1689 = vmatprep.subr.bf16.mxu1 %v4366_v28  ;;  %1664 = vmatprep.subr.bf16.mxu0 %v4362_v27 }
 0x126   :  { %1690 = vmatpush1.bf16.msra.mxu1 %v4371_v30  ;;  %1665 = vmatpush1.bf16.msra.mxu0 %v4369_v29 }
 0x127   :  { %1691 = vmatprep.subr.bf16.mxu1 %v4379_v32  ;;  %1666 = vmatprep.subr.bf16.mxu0 %v4375_v31 }
 0x12a   :  { %1692 = vmatpush1.bf16.msra.mxu1 %v4386_v35  ;;  %1667 = vmatpush1.bf16.msra.mxu0 %v4382_v33 }
 0x12b   :  { %1693 = vmatprep.subr.bf16.mxu1 %v4392_v38  ;;  %1668 = vmatprep.subr.bf16.mxu0 %v4388_v36 }
 0x12e   :  { %1694 = vmatpush1.bf16.msra.mxu1 %v4397_v0  ;;  %1669 = vmatpush1.bf16.msra.mxu0 %v4395_v40 }
 0x12f   :  { %1695 = vmatprep.subr.bf16.mxu1 %v4401_v42  ;;  %1720 = vmatprep.subr.bf16.mxu0 %v4405_v44 }
 0x132   :  { %1696 = vmatpush1.bf16.msra.mxu1 %v4408_v45 }
 0x133   :  { %1697 = vmatprep.subr.bf16.mxu1 %v6191_v57 }
 0x136   :  { %1698 = vmatpush1.bf16.msra.mxu1 %v4423_v53 }
 0x137   :  { %1699 = vmatprep.subr.bf16.mxu1 %v4431_v58 }
 0x13a   :  { %1700 = vmatpush1.bf16.msra.mxu1 %v4442_v51 }
 0x13b   :  { %1701 = vmatprep.subr.bf16.mxu1 %v6192_v59 }
 0x13e   :  { %1702 = vmatpush1.bf16.msra.mxu1 %v6193_v61 }
 0x13f   :  { %1703 = vmatprep.subr.bf16.mxu1 %v6194_v1 }
 0x142   :  { %1704 = vmatpush1.bf16.msra.mxu1 %v6195_v3 }
 0x143   :  { %1705 = vmatprep.subr.bf16.mxu1 %v6196_v5 }
 0x146   :  { %1706 = vmatpush1.bf16.msra.mxu1 %v6197_v6 }
 0x147   :  { %1707 = vmatprep.subr.bf16.mxu1 %v4484_v2 }
 0x14a   :  { %1708 = vmatpush1.bf16.msra.mxu1 %v6198_v7 }
 0x14b   :  { %1709 = vmatprep.subr.bf16.mxu1 %v6199_v8 }
 0x14e   :  { %1710 = vmatpush1.bf16.msra.mxu1 %v4502_v49 }
 0x14f   :  { %1847 = vmatprep.subr.bf16.mxu1 %v4230_v34  ;;  %v4645_v34 = vrot.slane %v4634_v13, %v176_v14 }
 0x164   :  { %v563_v19 = vpop.f32.mrb[0].mxu1  ;;  %v490_v20 = vpop.f32.mrb[0].mxu0 }
 0x165   :  { %v564_v21 = vadd.f32 %v563_v19, %v4639_v16  ;;  %v565_v22 = vpop.f32.mrb[1].mxu1  ;;  %v491_v23 = vadd.f32 %v490_v20, %v4642_v17  ;;  %v492_v24 = vpop.f32.mrb[1].mxu0 }
 0x166   :  { %v566_v25 = vadd.f32 %v565_v22, %v4645_v34  ;;  %v567_v26 = vpop.f32.mrb[2].mxu1  ;;  %v493_v27 = vadd.f32 %v492_v24, %v4648_v18  ;;  %v494_v28 = vpop.f32.mrb[2].mxu0 }
 0x167   :  { %v568_v29 = vadd.f32 %v567_v26, %v4639_v16  ;;  %v569_v30 = vpop.f32.mrb[3].mxu1  ;;  %v495_v31 = vadd.f32 %v494_v28, %v4642_v17  ;;  %v496_v32 = vpop.f32.mrb[3].mxu0 }
 0x168   :  { %v3270_v33 = vpack.c.bf16 %v566_v25, %v564_v21  ;;  %v570_v35 = vadd.f32 %v569_v30, %v4645_v34  ;;  %v4657_v38 = vpack.c.bf16 %v493_v27, %v491_v23  ;;  %v497_v0 = vadd.f32 %v496_v32, %v4648_v18 }
 0x16a   :  { %820 = vst [vmem:[#allocation2 + $0x8] sm:$0xff] %v3270_v33  ;;  %v3273_v42 = vpack.c.bf16 %v570_v35, %v568_v29  ;;  %v4660_v4 = vpack.c.bf16 %v497_v0, %v495_v31 }
 0x16c   :  { %823 = vst [vmem:[#allocation2 + $0x20] sm:$0xff] %v3273_v42  ;;  %v500_v37 = vpop.f32.mrb[4].mxu0  ;;  %v573_v39 = vpop.f32.mrb[4].mxu1 }
 0x16d   :  { %v501_v9 = vadd.f32 %v500_v37, %v4642_v17  ;;  %v502_v11 = vpop.f32.mrb[5].mxu0  ;;  %v574_v12 = vadd.f32 %v573_v39, %v4639_v16  ;;  %v575_v14 = vpop.f32.mrb[5].mxu1 }
 0x16e   :  { %v503_v15 = vadd.f32 %v502_v11, %v4648_v18  ;;  %v504_v19 = vpop.f32.mrb[6].mxu0  ;;  %v576_v20 = vadd.f32 %v575_v14, %v4645_v34  ;;  %v577_v21 = vpop.f32.mrb[6].mxu1 }
 0x16f   :  { %v505_v22 = vadd.f32 %v504_v19, %v4642_v17  ;;  %v506_v23 = vpop.f32.mrb[7].mxu0  ;;  %v578_v24 = vadd.f32 %v577_v21, %v4639_v16  ;;  %v579_v25 = vpop.f32.mrb[7].mxu1 }
 0x170   :  { %v4668_v26 = vpack.c.bf16 %v503_v15, %v501_v9  ;;  %v507_v27 = vadd.f32 %v506_v23, %v4648_v18  ;;  %v3276_v28 = vpack.c.bf16 %v576_v20, %v574_v12  ;;  %v580_v29 = vadd.f32 %v579_v25, %v4645_v34 }
 0x172   :  { %6200 = vst [vmem:[#allocation24_spill] sm:$0xff] %v4668_v26  ;;  %v3278_v30 = vpack.c.bf16 %v507_v27, %v505_v22  ;;  %826 = vst [vmem:[#allocation2 + $0x38] sm:$0xff] %v3276_v28  ;;  %v3279_v31 = vpack.c.bf16 %v580_v29, %v578_v24  ;;  %v4881_v26 = vld [vmem:[#allocation11 + $0x128] ss:$24 sps:$4 sm:$0xff]  }
 0x174   :  { %828 = vst [vmem:[#allocation2 + $0x48] sm:$0xff] %v3278_v30  ;;  %v510_v32 = vpop.f32.mrb[8].mxu0  ;;  %829 = vst [vmem:[#allocation2 + $0x50] sm:$0xff] %v3279_v31  ;;  %v583_v33 = vpop.f32.mrb[8].mxu1 }
 0x175   :  { %v511_v35 = vadd.f32 %v510_v32, %v4642_v17  ;;  %v512_v0 = vpop.f32.mrb[9].mxu0  ;;  %v584_v42 = vadd.f32 %v583_v33, %v4639_v16  ;;  %v585_v37 = vpop.f32.mrb[9].mxu1  ;;  %v180_v32 = vsub.s32 4, %v4630_v10 }
 0x176   :  { %v513_v39 = vadd.f32 %v512_v0, %v4648_v18  ;;  %v514_v9 = vpop.f32.mrb[10].mxu0  ;;  %v586_v11 = vadd.f32 %v585_v37, %v4645_v34  ;;  %v587_v12 = vpop.f32.mrb[10].mxu1  ;;  %v184_v37 = vsub.s32 5, %v4630_v10 }
 0x177   :  { %v515_v14 = vadd.f32 %v514_v9, %v4642_v17  ;;  %v516_v15 = vpop.f32.mrb[11].mxu0  ;;  %v588_v19 = vadd.f32 %v587_v12, %v4639_v16  ;;  %v589_v20 = vpop.f32.mrb[11].mxu1 }
 0x178   :  { %v3281_v21 = vpack.c.bf16 %v513_v39, %v511_v35  ;;  %v517_v22 = vadd.f32 %v516_v15, %v4648_v18  ;;  %v3282_v23 = vpack.c.bf16 %v586_v11, %v584_v42  ;;  %v590_v24 = vadd.f32 %v589_v20, %v4645_v34 }
 0x179   :  { %v185_v10 = vrot.slane %v4634_v13, %v184_v37 }
 0x17a   :  { %831 = vst [vmem:[#allocation2 + $0x60] sm:$0xff] %v3281_v21  ;;  %v3284_v25 = vpack.c.bf16 %v517_v22, %v515_v14  ;;  %832 = vst [vmem:[#allocation2 + $0x68] sm:$0xff] %v3282_v23  ;;  %v3285_v27 = vpack.c.bf16 %v590_v24, %v588_v19  ;;  %v181_v23 = vrot.slane %v4634_v13, %v180_v32 }
 0x17c   :  { %834 = vst [vmem:[#allocation2 + $0x78] sm:$0xff] %v3284_v25  ;;  %v520_v28 = vpop.f32.mrb[12].mxu0  ;;  %835 = vst [vmem:[#allocation2 + $0x80] sm:$0xff] %v3285_v27  ;;  %v593_v29 = vpop.f32.mrb[12].mxu1 }
 0x17d   :  { %v521_v30 = vadd.f32 %v520_v28, %v4642_v17  ;;  %v522_v31 = vpop.f32.mrb[13].mxu0  ;;  %v594_v33 = vadd.f32 %v593_v29, %v4639_v16  ;;  %v595_v35 = vpop.f32.mrb[13].mxu1 }
 0x17e   :  { %v523_v0 = vadd.f32 %v522_v31, %v4648_v18  ;;  %v524_v42 = vpop.f32.mrb[14].mxu0  ;;  %v596_v39 = vadd.f32 %v595_v35, %v4645_v34  ;;  %v597_v9 = vpop.f32.mrb[14].mxu1 }
 0x17f   :  { %v525_v11 = vadd.f32 %v524_v42, %v4642_v17  ;;  %v526_v12 = vpop.f32.mrb[15].mxu0  ;;  %v598_v14 = vadd.f32 %v597_v9, %v4639_v16  ;;  %v599_v15 = vpop.f32.mrb[15].mxu1 }
 0x180   :  { %v3287_v19 = vpack.c.bf16 %v523_v0, %v521_v30  ;;  %v527_v20 = vadd.f32 %v526_v12, %v4648_v18  ;;  %v3288_v21 = vpack.c.bf16 %v596_v39, %v594_v33  ;;  %v600_v22 = vadd.f32 %v599_v15, %v4645_v34 }
 0x182   :  { %837 = vst [vmem:[#allocation2 + $0x90] sm:$0xff] %v3287_v19  ;;  %v3290_v24 = vpack.c.bf16 %v527_v20, %v525_v11  ;;  %838 = vst [vmem:[#allocation2 + $0x98] sm:$0xff] %v3288_v21  ;;  %v3291_v25 = vpack.c.bf16 %v600_v22, %v598_v14 }
 0x184   :  { %840 = vst [vmem:[#allocation2 + $0xa8] sm:$0xff] %v3290_v24  ;;  %v636_v17 = vpop.f32.mrb[16].mxu0  ;;  %841 = vst [vmem:[#allocation2 + $0xb0] sm:$0xff] %v3291_v25 }
 0x185   :  { %v637_v27 = vadd.f32 %v636_v17, %v181_v23  ;;  %v638_v16 = vpop.f32.mrb[17].mxu0 }
 0x186   :  { %v639_v28 = vadd.f32 %v638_v16, %v185_v10  ;;  %v640_v29 = vpop.f32.mrb[18].mxu0 }
 0x187   :  { %v641_v30 = vadd.f32 %v640_v29, %v181_v23  ;;  %v642_v18 = vpop.f32.mrb[19].mxu0 }
 0x188   :  { %v3271_v31 = vpack.c.bf16 %v639_v28, %v637_v27  ;;  %v643_v33 = vadd.f32 %v642_v18, %v185_v10 }
 0x18a   :  { %821 = vst [vmem:[#allocation2 + $0x10] sm:$0xff] %v3271_v31  ;;  %v3274_v34 = vpack.c.bf16 %v643_v33, %v641_v30 }
 0x18c   :  { %824 = vst [vmem:[#allocation2 + $0x28] sm:$0xff] %v3274_v34  ;;  %v646_v32 = vpop.f32.mrb[20].mxu0 }
 0x18d   :  { %v647_v35 = vadd.f32 %v646_v32, %v181_v23  ;;  %v648_v0 = vpop.f32.mrb[21].mxu0 }
 0x18e   :  { %v649_v13 = vadd.f32 %v648_v0, %v185_v10  ;;  %v650_v42 = vpop.f32.mrb[22].mxu0  ;;  %v1548_v0 = vunpack.c.l.bf16 %v4657_v38 }
 0x18f   :  { %v651_v37 = vadd.f32 %v650_v42, %v181_v23  ;;  %v652_v39 = vpop.f32.mrb[23].mxu0  ;;  %v1549_v42 = vunpack.c.h.bf16 %v4657_v38 }
 0x190   :  { %v3277_v9 = vpack.c.bf16 %v649_v13, %v647_v35  ;;  %v653_v11 = vadd.f32 %v652_v39, %v185_v10 }
 0x192   :  { %827 = vst [vmem:[#allocation2 + $0x40] sm:$0xff] %v3277_v9  ;;  %v3280_v12 = vpack.c.bf16 %v653_v11, %v651_v37 }
 0x194   :  { %830 = vst [vmem:[#allocation2 + $0x58] sm:$0xff] %v3280_v12  ;;  %v656_v14 = vpop.f32.mrb[24].mxu0 }
 0x195   :  { %v657_v15 = vadd.f32 %v656_v14, %v181_v23  ;;  %v658_v19 = vpop.f32.mrb[25].mxu0 }
 0x196   :  { %v659_v20 = vadd.f32 %v658_v19, %v185_v10  ;;  %v660_v21 = vpop.f32.mrb[26].mxu0 }
 0x197   :  { %v661_v22 = vadd.f32 %v660_v21, %v181_v23  ;;  %v662_v24 = vpop.f32.mrb[27].mxu0  ;;  %v4694_v21 = vld [vmem:[#allocation12] ss:$0 sm:$0xff] }
 0x198   :  { %v3283_v25 = vpack.c.bf16 %v659_v20, %v657_v15  ;;  %v663_v17 = vadd.f32 %v662_v24, %v185_v10  ;;  %6201 = vst [vmem:[#allocation29_spill] sm:$0xff] %v4694_v21 }
 0x19a   :  { %833 = vst [vmem:[#allocation2 + $0x70] sm:$0xff] %v3283_v25  ;;  %v3286_v27 = vpack.c.bf16 %v663_v17, %v661_v22 }
 0x19c   :  { %836 = vst [vmem:[#allocation2 + $0x88] sm:$0xff] %v3286_v27  ;;  %v666_v16 = vpop.f32.mrb[28].mxu0 }
 0x19d   :  { %v667_v28 = vadd.f32 %v666_v16, %v181_v23  ;;  %v668_v29 = vpop.f32.mrb[29].mxu0 }
 0x19e   :  { %v669_v30 = vadd.f32 %v668_v29, %v185_v10  ;;  %v670_v18 = vpop.f32.mrb[30].mxu0 }
 0x19f   :  { %v671_v31 = vadd.f32 %v670_v18, %v181_v23  ;;  %v672_v33 = vpop.f32.mrb[31].mxu0 }
 0x1a0   :  { %v3289_v34 = vpack.c.bf16 %v669_v30, %v667_v28  ;;  %v673_v32 = vadd.f32 %v672_v33, %v185_v10 }
 0x1a2   :  { %839 = vst [vmem:[#allocation2 + $0xa0] sm:$0xff] %v3289_v34  ;;  %v3292_v35 = vpack.c.bf16 %v673_v32, %v671_v31 }
 0x1a4   :  { %842 = vst [vmem:[#allocation2 + $0xb8] sm:$0xff] %v3292_v35  ;;  %v1457_v13 = vpop.f32.mrb[16].mxu1  ;;  %v3313_v35 = vpop.permute.xlu0 %3312 }
 0x1a5   :  { %v1557_v37 = vadd.f32 %v1548_v0, %v1457_v13  ;;  %v1459_v39 = vpop.f32.mrb[17].mxu1 }
 0x1a6   :  { %v1564_v9 = vadd.f32 %v1549_v42, %v1459_v39  ;;  %v1461_v11 = vpop.f32.mrb[18].mxu1 }
 0x1a7   :  { %v3227_v12 = vmul.f32 -1.442695, %v1557_v37  ;;  %v1462_v14 = vpop.f32.mrb[19].mxu1  ;;  %v4697_v37 = vunpack.i.h.bf16 %v3313_v35 }
 0x1a8   :  { %v3228_v15 = vmul.f32 -1.442695, %v1564_v9 }
 0x1a9   :  { %3552 = vpow2.f32 %v3227_v12  ;;  %6202 = vst [vmem:[#allocation31_spill] sm:$0xff] %v4697_v37 }
 0x1aa   :  { %3554 = vpow2.f32 %v3228_v15 }
 0x1ab   :  { %v1552_v20 = vld [vmem:[#allocation2 + $0xb4] sm:$0xff]  ;;  %v1547_v25 = vld [vmem:[#allocation2 + $0x8] ss:$180 sps:$4 sm:$0xff]  }
 0x1ac   :  { %v1554_v38 = vunpack.c.l.bf16 %v1552_v20  ;;  %v1550_v30 = vunpack.c.l.bf16 %v1547_v25  ;;  %v1555_v15 = vunpack.c.h.bf16 %v1552_v20 }
 0x1b3   :  { %v3553_v23 = vpop.eup %3552 }
 0x1b4   :  { %v1561_v19 = vadd.f32 1.0, %v3553_v23  ;;  %v3555_v10 = vpop.eup %3554  ;;  %v4703_v23 = vld [vmem:[#allocation12 + $0x1] ss:$0 sm:$0xff] }
 0x1b5   :  { %v1568_v22 = vadd.f32 1.0, %v3555_v10 }
 0x1b6   :  { %3556 = vrcp.f32 %v1561_v19 }
 0x1b7   :  { %3558 = vrcp.f32 %v1568_v22 }
 0x1c0   :  { %v3557_v16 = vpop.eup %3556 }
 0x1c1   :  { %v3559_v32 = vpop.eup %3558 }
 0x1c2   :  { %v1581_v0 = vsub.f32 1.0, %v3559_v32  ;;  %v1583_v9 = vmul.f32 0.0, %v3559_v32  ;;  %v4706_v32 = vunpack.i.l.bf16 %v3313_v35  ;;  %v6204_v35 = vld [vmem:[#allocation23_spill] sm:$0xff] }
 0x1c4   :  { %v1498_v24 = vpop.f32.mrb[32].mxu0  ;;  %6203 = vst [vmem:[#allocation33_spill] sm:$0xff] %v4706_v32 }
 0x1c5   :  { %v1577_v17 = vadd.f32 %v4694_v21, %v1498_v24  ;;  %v1500_v27 = vpop.f32.mrb[33].mxu0 }
 0x1c6   :  { %v1585_v28 = vadd.f32 %v1554_v38, %v1500_v27  ;;  %v1502_v29 = vpop.f32.mrb[34].mxu0 }
 0x1c7   :  { %v1578_v18 = vmul.f32 %v3557_v16, %v1577_v17  ;;  %v1503_v31 = vpop.f32.mrb[35].mxu0  ;;  %v1556_v29 = vunpack.c.h.bf16 %v1547_v25 }
 0x1c8   :  { %v3230_v33 = vmul.f32 -1.442695, %v1585_v28 }
 0x1c9   :  { %v1579_v34 = vadd.f32 %v1578_v18, %v1550_v30 }
 0x1cb   :  { %3560 = vtanh.f32 %v1579_v34 }
 0x1cc   :  { %3562 = vpow2.f32 %v3230_v33 }
 0x1d5   :  { %v3561_v13 = vpop.eup %3560 }
 0x1d6   :  { %v3563_v42 = vpop.eup %3562  ;;  %v1582_v39 = vmul.f32 %v3561_v13, %v1581_v0 }
 0x1d7   :  { %v1589_v12 = vadd.f32 1.0, %v3563_v42 }
 0x1d8   :  { %v1584_v11 = vadd.f32 %v1583_v9, %v1582_v39 }
 0x1d9   :  { %3564 = vrcp.f32 %v1589_v12  ;;  %v4722_v12 = vld [vmem:[#allocation11] ss:$24 sps:$4 sm:$0xff]  }
 0x1da   :  { %v4700_v14 = vmul.f32 %v4697_v37, %v1584_v11  ;;  %v6205_v11 = vld [vmem:[#allocation25_spill] sm:$0xff]  ;;  %v4875_v37 = vld [vmem:[#allocation11 + $0xf8] ss:$24 sps:$4 sm:$0xff]  }
 0x1dc   :  { %1625 = vst [vmem:[#allocation14] sm:$0xff] %v4700_v14  ;;  %v4716_v9 = vpack.c.bf16 %v4700_v14, %v4700_v14 }
 0x1e3   :  { %v3565_v17 = vpop.eup %3564 }
 0x1e4   :  { %v1539_v19 = vpop.f32.mrb[20].mxu1 }
 0x1e5   :  { %v1592_v10 = vadd.f32 %v1555_v15, %v1539_v19  ;;  %v1541_v22 = vpop.f32.mrb[21].mxu1  ;;  %v4725_v15 = vld [vmem:[#allocation11 + $0x34] ss:$24 sps:$4 sm:$0xff]  }
 0x1e6   :  { %v1605_v24 = vadd.f32 %v4703_v23, %v1541_v22  ;;  %v1543_v38 = vpop.f32.mrb[22].mxu1  ;;  %v6206_v19 = vld [vmem:[#allocation26_spill] sm:$0xff] }
 0x1e7   :  { %v3231_v27 = vmul.f32 -1.442695, %v1592_v10  ;;  %v1544_v16 = vpop.f32.mrb[23].mxu1  ;;  %v6207_v10 = vld [vmem:[#allocation27_spill] sm:$0xff]  ;;  %v6208_v38 = vld [vmem:[#allocation28_spill] sm:$0xff] }
 0x1e8   :  { %v1606_v28 = vmul.f32 %v3565_v17, %v1605_v24  ;;  %v4730_v22 = vld [vmem:[#allocation11 + $0x30] ss:$24 sps:$4 sm:$0xff]   ;;  %v4733_v24 = vld [vmem:[#allocation11 + $0x64] ss:$24 sps:$4 sm:$0xff]   ;;  %v4741_v16 = vld [vmem:[#allocation11 + $0x94] ss:$24 sps:$4 sm:$0xff]  }
 0x1e9   :  { %3566 = vpow2.f32 %v3231_v27  ;;  %v6209_v17 = vld [vmem:[#allocation30_spill] sm:$0xff]  ;;  %v4738_v27 = vld [vmem:[#allocation11 + $0x60] ss:$24 sps:$4 sm:$0xff]  }
 0x1ea   :  { %v1607_v31 = vadd.f32 %v1606_v28, %v1556_v29  ;;  %v6210_v28 = vld [vmem:[#allocation32_spill] sm:$0xff]  ;;  %v6211_v29 = vld [vmem:[#allocation34_spill] sm:$0xff] }
 0x1f3   :  { %v3567_v30 = vpop.eup %3566 }
 0x1f4   :  { %v1596_v18 = vadd.f32 1.0, %v3567_v30  ;;  %v4746_v30 = vld [vmem:[#allocation11 + $0x90] ss:$24 sps:$4 sm:$0xff]  }
 0x1f6   :  { %3568 = vrcp.f32 %v1596_v18  ;;  %v4749_v18 = vld [vmem:[#allocation11 + $0xc4] ss:$24 sps:$4 sm:$0xff]  }
 0x1f7   :  { %3570 = vtanh.f32 %v1607_v31  ;;  %v6212_v31 = vld [vmem:[#allocation36_spill] sm:$0xff] }
 0x200   :  { %v3569_v20 = vpop.eup %3568 }
 0x201   :  { %v1609_v33 = vsub.f32 1.0, %v3569_v20  ;;  %v3571_v34 = vpop.eup %3570  ;;  %v1611_v0 = vmul.f32 0.0, %v3569_v20  ;;  %v6213_v20 = vld [vmem:[#allocation38_spill] sm:$0xff] }
 0x203   :  { %v1610_v13 = vmul.f32 %v3571_v34, %v1609_v33  ;;  %v4754_v33 = vld [vmem:[#allocation11 + $0xc0] ss:$24 sps:$4 sm:$0xff]   ;;  %v4757_v34 = vld [vmem:[#allocation11 + $0xf4] ss:$24 sps:$4 sm:$0xff]  }
 0x205   :  { %v1612_v42 = vadd.f32 %v1611_v0, %v1610_v13  ;;  %v6214_v0 = vld [vmem:[#allocation40_spill] sm:$0xff]  ;;  %v6215_v13 = vld [vmem:[#allocation41_spill] sm:$0xff] }
 0x207   :  { %v4709_v39 = vmul.f32 %v4706_v32, %v1612_v42  ;;  %v4762_v42 = vld [vmem:[#allocation11 + $0xf0] ss:$24 sps:$4 sm:$0xff]   ;;  %v4878_v32 = vld [vmem:[#allocation11 + $0x12c] ss:$24 sps:$4 sm:$0xff]  }
 0x209   :  { %1633 = vst [vmem:[#allocation14 + $0x78] sm:$0xff] %v4709_v39  ;;  %v1637_v25 = vpack.c.bf16 %v4709_v39, %v4709_v39 }
 0x20b   :  { %1670 = vmatprep.mubr.bf16.mxu0 %v1637_v25  ;;  %1711 = vmatprep.mubr.bf16.mxu1 %v1637_v25 }
 0x20c   :  { %1671 = vmatmul.mubr.bf16.vlgmr.msra.gmra.mrb[36].mxu0 %v4716_v9  ;;  %1712 = vmatmul.mubr.bf16.vlgmr.msra.gmra.mrb[24].mxu1 %v4716_v9 }
 0x20d   :  { %1721 = vmatpush1.bf16.msra.mxu0 %v6204_v35  ;;  %1752 = vmatprep.mubr.bf16.mxu0 %v1637_v25  ;;  %v4765_v25 = vld [vmem:[#allocation11 + $0x124] ss:$24 sps:$4 sm:$0xff]   ;;  %v6216_v35 = vld [vmem:[#allocation43_spill] sm:$0xff] }
 0x20e   :  { %1722 = vmatprep.subr.bf16.mxu0 %v6205_v11  ;;  %1848 = vmatpush1.bf16.msra.mxu1 %v4722_v12  ;;  %v6217_v11 = vld [vmem:[#allocation45_spill] sm:$0xff] }
 0x20f   :  { %1849 = vmatprep.subr.bf16.mxu1 %v4725_v15 }
 0x211   :  { %1723 = vmatpush1.bf16.msra.mxu0 %v6206_v19  ;;  %v4770_v19 = vld [vmem:[#allocation11 + $0x120] ss:$24 sps:$4 sm:$0xff]  }
 0x212   :  { %1724 = vmatprep.subr.bf16.mxu0 %v6207_v10  ;;  %1850 = vmatpush1.bf16.msra.mxu1 %v4730_v22  ;;  %v4773_v10 = vld [vmem:[#allocation11 + $0x154] ss:$24 sps:$4 sm:$0xff]  }
 0x213   :  { %1851 = vmatprep.subr.bf16.mxu1 %v4733_v24 }
 0x215   :  { %1725 = vmatpush1.bf16.msra.mxu0 %v6208_v38  ;;  %v6218_v38 = vld [vmem:[#allocation46_spill] sm:$0xff] }
 0x216   :  { %1726 = vmatprep.subr.bf16.mxu0 %v6209_v17  ;;  %1852 = vmatpush1.bf16.msra.mxu1 %v4738_v27  ;;  %v6219_v17 = vld [vmem:[#allocation47_spill] sm:$0xff]  ;;  %6242 = vst [vmem:[#allocation46_spill] sm:$0xff] %v4875_v37 }
 0x217   :  { %1853 = vmatprep.subr.bf16.mxu1 %v4741_v16  ;;  %6243 = vst [vmem:[#allocation47_spill] sm:$0xff] %v4878_v32 }
 0x219   :  { %1727 = vmatpush1.bf16.msra.mxu0 %v6210_v28  ;;  %v4778_v28 = vld [vmem:[#allocation11 + $0x150] ss:$24 sps:$4 sm:$0xff]  }
 0x21a   :  { %1728 = vmatprep.subr.bf16.mxu0 %v6211_v29  ;;  %1854 = vmatpush1.bf16.msra.mxu1 %v4746_v30  ;;  %v4781_v29 = vld [vmem:[#allocation11 + $0x184] ss:$24 sps:$4 sm:$0xff]  }
 0x21b   :  { %1855 = vmatprep.subr.bf16.mxu1 %v4749_v18 }
 0x21d   :  { %1729 = vmatpush1.bf16.msra.mxu0 %v6212_v31  ;;  %v4786_v31 = vld [vmem:[#allocation11 + $0x180] ss:$24 sps:$4 sm:$0xff]  }
 0x21e   :  { %1730 = vmatprep.subr.bf16.mxu0 %v6213_v20  ;;  %1856 = vmatpush1.bf16.msra.mxu1 %v4754_v33  ;;  %v4789_v20 = vld [vmem:[#allocation11 + $0x1b4] ss:$24 sps:$4 sm:$0xff]  }
 0x21f   :  { %1857 = vmatprep.subr.bf16.mxu1 %v4757_v34 }
 0x221   :  { %1731 = vmatpush1.bf16.msra.mxu0 %v6214_v0  ;;  %v4794_v0 = vld [vmem:[#allocation11 + $0x1b0] ss:$24 sps:$4 sm:$0xff]  }
 0x222   :  { %1732 = vmatprep.subr.bf16.mxu0 %v6215_v13  ;;  %1858 = vmatpush1.bf16.msra.mxu1 %v4762_v42  ;;  %v4797_v13 = vld [vmem:[#allocation11 + $0x1e4] ss:$24 sps:$4 sm:$0xff]  }
 0x223   :  { %1859 = vmatprep.subr.bf16.mxu1 %v4765_v25 }
 0x225   :  { %1733 = vmatpush1.bf16.msra.mxu0 %v6216_v35  ;;  %v4805_v35 = vld [vmem:[#allocation11 + $0x214] ss:$24 sps:$4 sm:$0xff]  }
 0x226   :  { %1734 = vmatprep.subr.bf16.mxu0 %v6217_v11  ;;  %1860 = vmatpush1.bf16.msra.mxu1 %v4770_v19  ;;  %6221 = vst [vmem:[#allocation35_spill] sm:$0xff] %v4805_v35  ;;  %v4810_v11 = vld [vmem:[#allocation11 + $0x210] ss:$24 sps:$4 sm:$0xff]  }
 0x227   :  { %1861 = vmatprep.subr.bf16.mxu1 %v4773_v10  ;;  %6224 = vst [vmem:[#allocation37_spill] sm:$0xff] %v4810_v11 }
 0x229   :  { %1735 = vmatpush1.bf16.msra.mxu0 %v6218_v38  ;;  %v4813_v38 = vld [vmem:[#allocation11 + $0x244] ss:$24 sps:$4 sm:$0xff]  }
 0x22a   :  { %1736 = vmatprep.subr.bf16.mxu0 %v6219_v17  ;;  %1862 = vmatpush1.bf16.msra.mxu1 %v4778_v28  ;;  %6225 = vst [vmem:[#allocation39_spill] sm:$0xff] %v4813_v38  ;;  %v4821_v17 = vld [vmem:[#allocation11 + $0x274] ss:$24 sps:$4 sm:$0xff]  }
 0x22b   :  { %1863 = vmatprep.subr.bf16.mxu1 %v4781_v29  ;;  %6227 = vst [vmem:[#allocation44_spill] sm:$0xff] %v4821_v17 }
 0x22d   :  { %1737 = vmatpush1.bf16.msra.mxu0 %v4512_v62  ;;  %v4802_v62 = vld [vmem:[#allocation11 + $0x1e0] ss:$24 sps:$4 sm:$0xff]  }
 0x22e   :  { %1738 = vmatprep.subr.bf16.mxu0 %v4515_v60  ;;  %1864 = vmatpush1.bf16.msra.mxu1 %v4786_v31  ;;  %v6220_v60 = vld [vmem:[#allocation48_spill] sm:$0xff] }
 0x22f   :  { %1865 = vmatprep.subr.bf16.mxu1 %v4789_v20  ;;  %6244 = vst [vmem:[#allocation48_spill] sm:$0xff] %v4881_v26 }
 0x231   :  { %1739 = vmatpush1.bf16.msra.mxu0 %v4520_v54  ;;  %v6223_v54 = vld [vmem:[#allocation50_spill] sm:$0xff] }
 0x232   :  { %1740 = vmatprep.subr.bf16.mxu0 %v4524_v47  ;;  %1866 = vmatpush1.bf16.msra.mxu1 %v4794_v0  ;;  %v6222_v47 = vld [vmem:[#allocation49_spill] sm:$0xff] }
 0x233   :  { %1867 = vmatprep.subr.bf16.mxu1 %v4797_v13 }
 0x235   :  { %1741 = vmatpush1.bf16.msra.mxu0 %v4528_v63  ;;  %v4818_v63 = vld [vmem:[#allocation11 + $0x240] ss:$24 sps:$4 sm:$0xff]  }
 0x236   :  { %1742 = vmatprep.subr.bf16.mxu0 %v6220_v60  ;;  %1868 = vmatpush1.bf16.msra.mxu1 %v4802_v62  ;;  %6226 = vst [vmem:[#allocation42_spill] sm:$0xff] %v4818_v63  ;;  %v4826_v60 = vld [vmem:[#allocation11 + $0x270] ss:$24 sps:$4 sm:$0xff]  }
 0x237   :  { %1869 = vmatprep.subr.bf16.mxu1 %v4805_v35  ;;  %6228 = vst [vmem:[#allocation23_spill] sm:$0xff] %v4826_v60 }
 0x239   :  { %1743 = vmatpush1.bf16.msra.mxu0 %v6222_v47  ;;  %v4829_v47 = vld [vmem:[#allocation11 + $0x2a4] ss:$24 sps:$4 sm:$0xff]  }
 0x23a   :  { %1744 = vmatprep.subr.bf16.mxu0 %v6223_v54  ;;  %1870 = vmatpush1.bf16.msra.mxu1 %v4810_v11  ;;  %6229 = vst [vmem:[#allocation25_spill] sm:$0xff] %v4829_v47  ;;  %v4872_v54 = vld [vmem:[#allocation11 + $0xfc] ss:$24 sps:$4 sm:$0xff]  }
 0x23b   :  { %1871 = vmatprep.subr.bf16.mxu1 %v4813_v38  ;;  %6241 = vst [vmem:[#allocation45_spill] sm:$0xff] %v4872_v54 }
 0x23d   :  { %1745 = vmatpush1.bf16.msra.mxu0 %v4544_v41  ;;  %v4834_v41 = vld [vmem:[#allocation11 + $0x2a0] ss:$24 sps:$4 sm:$0xff]  }
 0x23e   :  { %1746 = vmatprep.subr.bf16.mxu0 %v4548_v43  ;;  %1872 = vmatpush1.bf16.msra.mxu1 %v4818_v63  ;;  %6230 = vst [vmem:[#allocation26_spill] sm:$0xff] %v4834_v41  ;;  %v4839_v43 = vld [vmem:[#allocation11 + $0xc] ss:$24 sps:$4 sm:$0xff]  }
 0x23f   :  { %1873 = vmatprep.subr.bf16.mxu1 %v4821_v17  ;;  %6231 = vst [vmem:[#allocation27_spill] sm:$0xff] %v4839_v43 }
 0x241   :  { %1747 = vmatpush1.bf16.msra.mxu0 %v4554_v46  ;;  %v4845_v46 = vld [vmem:[#allocation11 + $0x8] ss:$24 sps:$4 sm:$0xff]  }
 0x242   :  { %1748 = vmatprep.subr.bf16.mxu0 %v4560_v50  ;;  %1874 = vmatpush1.bf16.msra.mxu1 %v4826_v60  ;;  %6232 = vst [vmem:[#allocation28_spill] sm:$0xff] %v4845_v46  ;;  %v4848_v50 = vld [vmem:[#allocation11 + $0x3c] ss:$24 sps:$4 sm:$0xff]  }
 0x243   :  { %1875 = vmatprep.subr.bf16.mxu1 %v4829_v47  ;;  %6233 = vst [vmem:[#allocation30_spill] sm:$0xff] %v4848_v50 }
 0x245   :  { %1749 = vmatpush1.bf16.msra.mxu0 %v4564_v52  ;;  %v4854_v52 = vld [vmem:[#allocation11 + $0x6c] ss:$24 sps:$4 sm:$0xff]  }
 0x246   :  { %1750 = vmatprep.subr.bf16.mxu0 %v4568_v56  ;;  %1876 = vmatpush1.bf16.msra.mxu1 %v4834_v41  ;;  %6235 = vst [vmem:[#allocation34_spill] sm:$0xff] %v4854_v52  ;;  %v4863_v56 = vld [vmem:[#allocation11 + $0x98] ss:$24 sps:$4 sm:$0xff]  }
 0x247   :  { %1877 = vmatprep.subr.bf16.mxu1 %v4388_v36  ;;  %v4851_v36 = vld [vmem:[#allocation11 + $0x38] ss:$24 sps:$4 sm:$0xff]   ;;  %6238 = vst [vmem:[#allocation40_spill] sm:$0xff] %v4863_v56 }
 0x248   :  { %6234 = vst [vmem:[#allocation32_spill] sm:$0xff] %v4851_v36 }
 0x249   :  { %1751 = vmatpush1.bf16.msra.mxu0 %v4572_v55  ;;  %v4866_v55 = vld [vmem:[#allocation11 + $0xcc] ss:$24 sps:$4 sm:$0xff]  }
 0x24a   :  { %1888 = vmatprep.subr.bf16.mxu0 %v4839_v43  ;;  %1878 = vmatpush1.bf16.msra.mxu1 %v4395_v40  ;;  %v4857_v40 = vld [vmem:[#allocation11 + $0x68] ss:$24 sps:$4 sm:$0xff]   ;;  %6239 = vst [vmem:[#allocation41_spill] sm:$0xff] %v4866_v55 }
 0x24b   :  { %1929 = vmatprep.subr.bf16.mxu1 %v4405_v44  ;;  %6236 = vst [vmem:[#allocation36_spill] sm:$0xff] %v4857_v40  ;;  %v4860_v44 = vld [vmem:[#allocation11 + $0x9c] ss:$24 sps:$4 sm:$0xff]  }
 0x24c   :  { %1753 = vmatmul.mubr.bf16.vlgmr.msra.gmra.mrb[40].mxu0 %v4716_v9  ;;  %6237 = vst [vmem:[#allocation38_spill] sm:$0xff] %v4860_v44  ;;  %v4869_v9 = vld [vmem:[#allocation11 + $0xc8] ss:$24 sps:$4 sm:$0xff]  }
 0x24d   :  { %1889 = vmatpush1.bf16.msra.mxu0 %v4845_v46  ;;  %6240 = vst [vmem:[#allocation43_spill] sm:$0xff] %v4869_v9 }
 0x24e   :  { %1890 = vmatprep.subr.bf16.mxu0 %v4848_v50 }
 0x251   :  { %1891 = vmatpush1.bf16.msra.mxu0 %v4851_v36 }
 0x252   :  { %1892 = vmatprep.subr.bf16.mxu0 %v4854_v52 }
 0x255   :  { %1893 = vmatpush1.bf16.msra.mxu0 %v4857_v40 }
 0x256   :  { %1894 = vmatprep.subr.bf16.mxu0 %v4860_v44 }
 0x259   :  { %1895 = vmatpush1.bf16.msra.mxu0 %v4863_v56 }
 0x25a   :  { %1896 = vmatprep.subr.bf16.mxu0 %v4866_v55  ;;  %v4884_v55 = vld [vmem:[#allocation11 + $0x15c] ss:$24 sps:$4 sm:$0xff]  }
 0x25b   :  { %6245 = vst [vmem:[#allocation49_spill] sm:$0xff] %v4884_v55 }
 0x25d   :  { %1897 = vmatpush1.bf16.msra.mxu0 %v4869_v9  ;;  %v4887_v9 = vld [vmem:[#allocation11 + $0x158] ss:$24 sps:$4 sm:$0xff]  }
 0x25e   :  { %1898 = vmatprep.subr.bf16.mxu0 %v4872_v54  ;;  %6246 = vst [vmem:[#allocation50_spill] sm:$0xff] %v4887_v9  ;;  %v4890_v54 = vld [vmem:[#allocation11 + $0x18c] ss:$24 sps:$4 sm:$0xff]  }
 0x25f   :  { %6247 = vst [vmem:[#allocation51_spill] sm:$0xff] %v4890_v54 }
 0x261   :  { %1899 = vmatpush1.bf16.msra.mxu0 %v4875_v37 }
 0x262   :  { %1900 = vmatprep.subr.bf16.mxu0 %v4878_v32 }
 0x265   :  { %1901 = vmatpush1.bf16.msra.mxu0 %v4881_v26  ;;  %v1763_v26 = vld [vmem:[#allocation2 + $0x20] ss:$132 sps:$4 sm:$0xff]  }
 0x266   :  { %1902 = vmatprep.subr.bf16.mxu0 %v4884_v55  ;;  %v1766_v32 = vunpack.c.l.bf16 %v1763_v26 }
 0x269   :  { %1903 = vmatpush1.bf16.msra.mxu0 %v4887_v9 }
 0x26a   :  { %1904 = vmatprep.subr.bf16.mxu0 %v4890_v54 }
 0x26d   :  { %1905 = vmatpush1.bf16.msra.mxu0 %v4408_v45  ;;  %v4908_v45 = vld [vmem:[#allocation11 + $0x4] ss:$24 sps:$4 sm:$0xff]  }
 0x26e   :  { %1906 = vmatprep.subr.bf16.mxu0 %v6191_v57  ;;  %6248 = vst [vmem:[#allocation52_spill] sm:$0xff] %v4908_v45  ;;  %v1765_v57 = vunpack.c.h.bf16 %v4660_v4 }
 0x271   :  { %1907 = vmatpush1.bf16.msra.mxu0 %v4423_v53 }
 0x272   :  { %1908 = vmatprep.subr.bf16.mxu0 %v4431_v58 }
 0x275   :  { %1909 = vmatpush1.bf16.msra.mxu0 %v4442_v51  ;;  %v1764_v51 = vunpack.c.l.bf16 %v4660_v4 }
 0x276   :  { %1910 = vmatprep.subr.bf16.mxu0 %v6192_v59 }
 0x279   :  { %1911 = vmatpush1.bf16.msra.mxu0 %v6193_v61 }
 0x27a   :  { %1912 = vmatprep.subr.bf16.mxu0 %v6194_v1 }
 0x27d   :  { %1913 = vmatpush1.bf16.msra.mxu0 %v6195_v3 }
 0x27e   :  { %1914 = vmatprep.subr.bf16.mxu0 %v6196_v5 }
 0x281   :  { %1915 = vmatpush1.bf16.msra.mxu0 %v6197_v6 }
 0x282   :  { %1916 = vmatprep.subr.bf16.mxu0 %v4484_v2 }
 0x285   :  { %1917 = vmatpush1.bf16.msra.mxu0 %v6198_v7 }
 0x286   :  { %1918 = vmatprep.subr.bf16.mxu0 %v6199_v8 }
 0x289   :  { %1919 = vmatpush1.bf16.msra.mxu0 %v4502_v49 }
 0x28a   :  { %2056 = vmatprep.subr.bf16.mxu0 %v4908_v45 }
 0x2df   :  { %v1672_v53 = vpop.f32.mrb[36].mxu0  ;;  %v1713_v58 = vpop.f32.mrb[24].mxu1 }
 0x2e0   :  { %v1773_v59 = vadd.f32 %v1764_v51, %v1672_v53  ;;  %v1674_v61 = vpop.f32.mrb[37].mxu0  ;;  %v1715_v1 = vpop.f32.mrb[25].mxu1  ;;  %v1787_v4 = vadd.f32 %v4694_v21, %v1713_v58  ;;  %v1768_v51 = vld [vmem:[#allocation2 + $0x9c] sm:$0xff] }
 0x2e1   :  { %v1780_v2 = vadd.f32 %v1765_v57, %v1674_v61  ;;  %v1676_v3 = vpop.f32.mrb[38].mxu0  ;;  %v1717_v5 = vpop.f32.mrb[26].mxu1  ;;  %v1770_v61 = vunpack.c.l.bf16 %v1768_v51 }
 0x2e2   :  { %v3235_v6 = vmul.f32 -1.442695, %v1773_v59  ;;  %v1677_v7 = vpop.f32.mrb[39].mxu0  ;;  %v1718_v8 = vpop.f32.mrb[27].mxu1 }
 0x2e3   :  { %v3236_v49 = vmul.f32 -1.442695, %v1780_v2  ;;  %v1795_v3 = vadd.f32 %v1770_v61, %v1715_v1  ;;  %v3759_v8 = vld [vmem:[#allocation6] sm:$0xff] }
 0x2e4   :  { %3572 = vpow2.f32 %v3235_v6  ;;  %vm2026_vm4 = vcmp.gt.s32.totalorder %v3759_v8, 2  ;;  %vm2029_vm5 = vcmp.gt.s32.totalorder %v3759_v8, 5  ;;  %vm2235_vm6 = vcmp.gt.s32.totalorder %v3759_v8, 3 }
 0x2e5   :  { %3574 = vpow2.f32 %v3236_v49  ;;  %v3237_v5 = vmul.f32 -1.442695, %v1795_v3  ;;  %v3245_v58 = vsel %vm2026_vm4, 1.0, %v6190_v48  ;;  %vm2238_vm7 = vcmp.gt.s32.totalorder %v3759_v8, 4 }
 0x2ee   :  { %v3573_v54 = vpop.eup %3572 }
 0x2ef   :  { %v1777_v45 = vadd.f32 1.0, %v3573_v54  ;;  %v3575_v9 = vpop.eup %3574 }
 0x2f0   :  { %v1784_v55 = vadd.f32 1.0, %v3575_v9 }
 0x2f1   :  { %3576 = vrcp.f32 %v1777_v45  ;;  %v3318_v45 = vpop.permute.xlu0 %3317 }
 0x2f2   :  { %3578 = vrcp.f32 %v1784_v55  ;;  %v3246_v55 = vsel %vm2029_vm5, 1.0, %v6190_v48  ;;  %v4918_v1 = vunpack.i.h.bf16 %v3318_v45 }
 0x2f4   :  { %6249 = vst [vmem:[#allocation53_spill] sm:$0xff] %v4918_v1 }
 0x2fb   :  { %v3577_v53 = vpop.eup %3576 }
 0x2fc   :  { %v1788_v57 = vmul.f32 %v3577_v53, %v1787_v4  ;;  %v3579_v2 = vpop.eup %3578  ;;  %v3322_v4 = vpack.i.bf16 %v3245_v58, %v3246_v55  ;;  %v3252_v53 = vsel %vm2238_vm7, 1.0, %v6190_v48  ;;  %v1772_v55 = vunpack.c.h.bf16 %v1763_v26 }
 0x2fd   :  { %v1791_v6 = vsub.f32 1.0, %v3579_v2  ;;  %v1793_v9 = vmul.f32 %v3579_v2, %v4700_v14 }
 0x2fe   :  { %v1789_v59 = vadd.f32 %v1788_v57, %v1766_v32  ;;  %v3251_v32 = vsel %vm2235_vm6, 1.0, %v6190_v48  ;;  %3323 = vperm.xlu1 %3321, %v3322_v4  }
 0x2ff   :  { %v3327_v61 = vpack.i.bf16 %v3251_v32, %v3252_v53 }
 0x300   :  { %3580 = vtanh.f32 %v1789_v59 }
 0x301   :  { %3582 = vpow2.f32 %v3237_v5  ;;  %v1771_v5 = vunpack.c.h.bf16 %v1768_v51 }
 0x302   :  { %3328 = vperm.xlu1 %3321, %v3327_v61  }
 0x30a   :  { %v3581_v54 = vpop.eup %3580 }
 0x30b   :  { %v1792_v7 = vmul.f32 %v3581_v54, %v1791_v6  ;;  %v3583_v59 = vpop.eup %3582 }
 0x30c   :  { %v1799_v3 = vadd.f32 1.0, %v3583_v59 }
 0x30d   :  { %v1794_v49 = vadd.f32 %v1793_v9, %v1792_v7 }
 0x30e   :  { %3584 = vrcp.f32 %v1799_v3 }
 0x30f   :  { %v1828_v57 = vmul.f32 %v4918_v1, %v1794_v49  ;;  %v1839_v59 = vsub.f32 %v1794_v49, %v4700_v14 }
 0x311   :  { %1830 = vst [vmem:[#allocation14 + $0x10] sm:$0xff] %v1828_v57 }
 0x318   :  { %v3585_v9 = vpop.eup %3584 }
 0x31f   :  { %v1754_v2 = vpop.f32.mrb[40].mxu0 }
 0x320   :  { %v1802_v6 = vadd.f32 %v1771_v5, %v1754_v2  ;;  %v1756_v54 = vpop.f32.mrb[41].mxu0 }
 0x321   :  { %v1809_v8 = vadd.f32 %v4703_v23, %v1756_v54  ;;  %v1758_v21 = vpop.f32.mrb[42].mxu0 }
 0x322   :  { %v3238_v7 = vmul.f32 -1.442695, %v1802_v6  ;;  %v1759_v58 = vpop.f32.mrb[43].mxu0  ;;  %v4925_v21 = vunpack.i.l.bf16 %v3318_v45  ;;  %v1840_v6 = vmul.f32 %v4918_v1, %v1839_v59  ;;  %v4988_v59 = vld [vmem:[#allocation11 + $0x134] ss:$24 sps:$4 sm:$0xff]  }
 0x323   :  { %v1810_v48 = vmul.f32 %v3585_v9, %v1809_v8  ;;  %v4945_v58 = vld [vmem:[#allocation11 + $0x10] ss:$24 sps:$4 sm:$0xff]  }
 0x324   :  { %3586 = vpow2.f32 %v3238_v7  ;;  %6250 = vst [vmem:[#allocation54_spill] sm:$0xff] %v4925_v21  ;;  %v4932_v9 = vadd.f32 %v1840_v6, %v4700_v14  ;;  %v4948_v14 = vld [vmem:[#allocation11 + $0x44] ss:$24 sps:$4 sm:$0xff]   ;;  %v5004_v6 = vld [vmem:[#allocation11 + $0x194] ss:$24 sps:$4 sm:$0xff]  }
 0x325   :  { %v1811_v53 = vadd.f32 %v1810_v48, %v1772_v55  ;;  %v4956_v48 = vld [vmem:[#allocation11 + $0x74] ss:$24 sps:$4 sm:$0xff]   ;;  %v4961_v55 = vld [vmem:[#allocation11 + $0x70] ss:$24 sps:$4 sm:$0xff]  }
 0x326   :  { %v4941_v7 = vpack.c.bf16 %v4932_v9, %v4932_v9  ;;  %v5025_v1 = vld [vmem:[#allocation11 + $0x1f0] ss:$24 sps:$4 sm:$0xff]  }
 0x327   :  { %6253 = vst [vmem:[#allocation57_spill] sm:$0xff] %v5025_v1 }
 0x32e   :  { %v3587_v4 = vpop.eup %3586 }
 0x32f   :  { %v1806_v32 = vadd.f32 1.0, %v3587_v4  ;;  %v4964_v4 = vld [vmem:[#allocation11 + $0xa4] ss:$24 sps:$4 sm:$0xff]  }
 0x331   :  { %3588 = vrcp.f32 %v1806_v32  ;;  %v4969_v32 = vld [vmem:[#allocation11 + $0xa0] ss:$24 sps:$4 sm:$0xff]  }
 0x332   :  { %3590 = vtanh.f32 %v1811_v53  ;;  %v4972_v53 = vld [vmem:[#allocation11 + $0xd4] ss:$24 sps:$4 sm:$0xff]  }
 0x33b   :  { %v3589_v57 = vpop.eup %3588 }
 0x33c   :  { %v1813_v61 = vsub.f32 1.0, %v3589_v57  ;;  %v3591_v51 = vpop.eup %3590  ;;  %v1815_v3 = vmul.f32 %v3589_v57, %v4709_v39  ;;  %v4977_v57 = vld [vmem:[#allocation11 + $0xd0] ss:$24 sps:$4 sm:$0xff]  }
 0x33e   :  { %v1814_v5 = vmul.f32 %v3591_v51, %v1813_v61  ;;  %v4980_v61 = vld [vmem:[#allocation11 + $0x104] ss:$24 sps:$4 sm:$0xff]   ;;  %v4985_v51 = vld [vmem:[#allocation11 + $0x100] ss:$24 sps:$4 sm:$0xff]  }
 0x340   :  { %v1816_v2 = vadd.f32 %v1815_v3, %v1814_v5  ;;  %v4993_v3 = vld [vmem:[#allocation11 + $0x130] ss:$24 sps:$4 sm:$0xff]   ;;  %v4996_v5 = vld [vmem:[#allocation11 + $0x164] ss:$24 sps:$4 sm:$0xff]  }
 0x342   :  { %v1836_v26 = vmul.f32 %v4925_v21, %v1816_v2  ;;  %v1842_v54 = vsub.f32 %v1816_v2, %v4709_v39  ;;  %v5001_v2 = vld [vmem:[#allocation11 + $0x160] ss:$24 sps:$4 sm:$0xff]  }
 0x344   :  { %1838 = vst [vmem:[#allocation14 + $0x68] sm:$0xff] %v1836_v26  ;;  %v1843_v8 = vmul.f32 %v4925_v21, %v1842_v54  ;;  %v5009_v26 = vld [vmem:[#allocation11 + $0x190] ss:$24 sps:$4 sm:$0xff]   ;;  %v5012_v54 = vld [vmem:[#allocation11 + $0x1c4] ss:$24 sps:$4 sm:$0xff]  }
 0x345   :  { %v5028_v21 = vld [vmem:[#allocation11 + $0x224] ss:$24 sps:$4 sm:$0xff]  }
 0x346   :  { %v4935_v49 = vadd.f32 %v1843_v8, %v4709_v39  ;;  %v4953_v39 = vld [vmem:[#allocation11 + $0x40] ss:$24 sps:$4 sm:$0xff]   ;;  %6254 = vst [vmem:[#allocation58_spill] sm:$0xff] %v5028_v21 }
 0x347   :  { %v5017_v8 = vld [vmem:[#allocation11 + $0x1c0] ss:$24 sps:$4 sm:$0xff]  }
 0x348   :  { %v1846_v45 = vpack.c.bf16 %v4935_v49, %v4935_v49  ;;  %6251 = vst [vmem:[#allocation55_spill] sm:$0xff] %v5017_v8 }
 0x34a   :  { %1879 = vmatprep.mubr.bf16.mxu1 %v1846_v45  ;;  %1920 = vmatprep.mubr.bf16.mxu0 %v1846_v45 }
 0x34b   :  { %1880 = vmatmul.mubr.bf16.vlgmr.msra.gmra.mrb[28].mxu1 %v4941_v7  ;;  %1921 = vmatmul.mubr.bf16.vlgmr.msra.gmra.mrb[44].mxu0 %v4941_v7 }
 0x34c   :  { %1930 = vmatpush1.bf16.msra.mxu1 %v4945_v58  ;;  %1961 = vmatprep.mubr.bf16.mxu1 %v1846_v45  ;;  %v5020_v45 = vld [vmem:[#allocation11 + $0x1f4] ss:$24 sps:$4 sm:$0xff]  }
 0x34d   :  { %1931 = vmatprep.subr.bf16.mxu1 %v4948_v14  ;;  %2057 = vmatpush1.bf16.msra.mxu0 %v4722_v12  ;;  %6252 = vst [vmem:[#allocation56_spill] sm:$0xff] %v5020_v45 }
 0x34e   :  { %2058 = vmatprep.subr.bf16.mxu0 %v4725_v15 }
 0x350   :  { %1932 = vmatpush1.bf16.msra.mxu1 %v4953_v39 }
 0x351   :  { %1933 = vmatprep.subr.bf16.mxu1 %v4956_v48  ;;  %2059 = vmatpush1.bf16.msra.mxu0 %v4730_v22 }
 0x352   :  { %2060 = vmatprep.subr.bf16.mxu0 %v4733_v24 }
 0x354   :  { %1934 = vmatpush1.bf16.msra.mxu1 %v4961_v55 }
 0x355   :  { %1935 = vmatprep.subr.bf16.mxu1 %v4964_v4  ;;  %2061 = vmatpush1.bf16.msra.mxu0 %v4738_v27 }
 0x356   :  { %2062 = vmatprep.subr.bf16.mxu0 %v4741_v16 }
 0x358   :  { %1936 = vmatpush1.bf16.msra.mxu1 %v4969_v32 }
 0x359   :  { %1937 = vmatprep.subr.bf16.mxu1 %v4972_v53  ;;  %2063 = vmatpush1.bf16.msra.mxu0 %v4746_v30 }
 0x35a   :  { %2064 = vmatprep.subr.bf16.mxu0 %v4749_v18 }
 0x35c   :  { %1938 = vmatpush1.bf16.msra.mxu1 %v4977_v57 }
 0x35d   :  { %1939 = vmatprep.subr.bf16.mxu1 %v4980_v61  ;;  %2065 = vmatpush1.bf16.msra.mxu0 %v4754_v33 }
 0x35e   :  { %2066 = vmatprep.subr.bf16.mxu0 %v4757_v34 }
 0x360   :  { %1940 = vmatpush1.bf16.msra.mxu1 %v4985_v51 }
 0x361   :  { %1941 = vmatprep.subr.bf16.mxu1 %v4988_v59  ;;  %2067 = vmatpush1.bf16.msra.mxu0 %v4762_v42 }
 0x362   :  { %2068 = vmatprep.subr.bf16.mxu0 %v4765_v25 }
 0x364   :  { %1942 = vmatpush1.bf16.msra.mxu1 %v4993_v3 }
 0x365   :  { %1943 = vmatprep.subr.bf16.mxu1 %v4996_v5  ;;  %2069 = vmatpush1.bf16.msra.mxu0 %v4770_v19 }
 0x366   :  { %2070 = vmatprep.subr.bf16.mxu0 %v4773_v10 }
 0x368   :  { %1944 = vmatpush1.bf16.msra.mxu1 %v5001_v2 }
 0x369   :  { %1945 = vmatprep.subr.bf16.mxu1 %v5004_v6  ;;  %2071 = vmatpush1.bf16.msra.mxu0 %v4778_v28 }
 0x36a   :  { %2072 = vmatprep.subr.bf16.mxu0 %v4781_v29 }
 0x36c   :  { %1946 = vmatpush1.bf16.msra.mxu1 %v5009_v26 }
 0x36d   :  { %1947 = vmatprep.subr.bf16.mxu1 %v5012_v54  ;;  %2073 = vmatpush1.bf16.msra.mxu0 %v4786_v31 }
 0x36e   :  { %2074 = vmatprep.subr.bf16.mxu0 %v4789_v20 }
 0x370   :  { %1948 = vmatpush1.bf16.msra.mxu1 %v5017_v8  ;;  %v5033_v8 = vld [vmem:[#allocation11 + $0x220] ss:$24 sps:$4 sm:$0xff]  }
 0x371   :  { %1949 = vmatprep.subr.bf16.mxu1 %v5020_v45  ;;  %2075 = vmatpush1.bf16.msra.mxu0 %v4794_v0  ;;  %6255 = vst [vmem:[#allocation59_spill] sm:$0xff] %v5033_v8  ;;  %v5036_v45 = vld [vmem:[#allocation11 + $0x254] ss:$24 sps:$4 sm:$0xff]  }
 0x372   :  { %2076 = vmatprep.subr.bf16.mxu0 %v4797_v13  ;;  %6256 = vst [vmem:[#allocation60_spill] sm:$0xff] %v5036_v45 }
 0x374   :  { %1950 = vmatpush1.bf16.msra.mxu1 %v5025_v1  ;;  %v5041_v1 = vld [vmem:[#allocation11 + $0x250] ss:$24 sps:$4 sm:$0xff]  }
 0x375   :  { %1951 = vmatprep.subr.bf16.mxu1 %v5028_v21  ;;  %2077 = vmatpush1.bf16.msra.mxu0 %v4802_v62  ;;  %6257 = vst [vmem:[#allocation61_spill] sm:$0xff] %v5041_v1  ;;  %v5044_v21 = vld [vmem:[#allocation11 + $0x284] ss:$24 sps:$4 sm:$0xff]  }
 0x376   :  { %2078 = vmatprep.subr.bf16.mxu0 %v4805_v35  ;;  %6258 = vst [vmem:[#allocation62_spill] sm:$0xff] %v5044_v21 }
 0x378   :  { %1952 = vmatpush1.bf16.msra.mxu1 %v5033_v8  ;;  %v5049_v8 = vld [vmem:[#allocation11 + $0x280] ss:$24 sps:$4 sm:$0xff]  }
 0x379   :  { %1953 = vmatprep.subr.bf16.mxu1 %v5036_v45  ;;  %2079 = vmatpush1.bf16.msra.mxu0 %v4810_v11  ;;  %6259 = vst [vmem:[#allocation63_spill] sm:$0xff] %v5049_v8  ;;  %v5052_v45 = vld [vmem:[#allocation11 + $0x2b4] ss:$24 sps:$4 sm:$0xff]   ;;  %v6292_v11 = vld [vmem:[#allocation29_spill] sm:$0xff] }
 0x37a   :  { %2080 = vmatprep.subr.bf16.mxu0 %v4813_v38  ;;  %6260 = vst [vmem:[#allocation64_spill] sm:$0xff] %v5052_v45  ;;  %v1972_v38 = vld [vmem:[#allocation2 + $0x38] ss:$84 sps:$4 sm:$0xff]  }
 0x37b   :  { %v1975_v35 = vunpack.c.l.bf16 %v1972_v38 }
 0x37c   :  { %1954 = vmatpush1.bf16.msra.mxu1 %v5041_v1  ;;  %v5057_v1 = vld [vmem:[#allocation11 + $0x2b0] ss:$24 sps:$4 sm:$0xff]  }
 0x37d   :  { %1955 = vmatprep.subr.bf16.mxu1 %v5044_v21  ;;  %2081 = vmatpush1.bf16.msra.mxu0 %v4818_v63  ;;  %6261 = vst [vmem:[#allocation65_spill] sm:$0xff] %v5057_v1  ;;  %v5060_v21 = vld [vmem:[#allocation11 + $0x2e4] ss:$24 sps:$4 sm:$0xff]  }
 0x37e   :  { %2082 = vmatprep.subr.bf16.mxu0 %v4821_v17  ;;  %6262 = vst [vmem:[#allocation66_spill] sm:$0xff] %v5060_v21  ;;  %v5064_v17 = vld [vmem:[#allocation11 + $0x2d4] ss:$24 sps:$4 sm:$0xff]  }
 0x37f   :  { %6263 = vst [vmem:[#allocation67_spill] sm:$0xff] %v5064_v17 }
 0x380   :  { %1956 = vmatpush1.bf16.msra.mxu1 %v5049_v8  ;;  %v5067_v8 = vld [vmem:[#allocation11 + $0x2e0] ss:$24 sps:$4 sm:$0xff]  }
 0x381   :  { %1957 = vmatprep.subr.bf16.mxu1 %v5052_v45  ;;  %2083 = vmatpush1.bf16.msra.mxu0 %v4826_v60  ;;  %6264 = vst [vmem:[#allocation68_spill] sm:$0xff] %v5067_v8 }
 0x382   :  { %2084 = vmatprep.subr.bf16.mxu0 %v4829_v47  ;;  %v5071_v47 = vld [vmem:[#allocation11 + $0x2d0] ss:$24 sps:$4 sm:$0xff]  }
 0x383   :  { %6265 = vst [vmem:[#allocation69_spill] sm:$0xff] %v5071_v47 }
 0x384   :  { %1958 = vmatpush1.bf16.msra.mxu1 %v5057_v1  ;;  %v5074_v1 = vld [vmem:[#allocation11 + $0x14] ss:$24 sps:$4 sm:$0xff]  }
 0x385   :  { %1959 = vmatprep.subr.bf16.mxu1 %v5060_v21  ;;  %2085 = vmatpush1.bf16.msra.mxu0 %v4834_v41  ;;  %6266 = vst [vmem:[#allocation70_spill] sm:$0xff] %v5074_v1 }
 0x386   :  { %2086 = vmatprep.subr.bf16.mxu0 %v5064_v17 }
 0x388   :  { %1960 = vmatpush1.bf16.msra.mxu1 %v5067_v8 }
 0x389   :  { %2097 = vmatprep.subr.bf16.mxu1 %v4839_v43  ;;  %2087 = vmatpush1.bf16.msra.mxu0 %v5071_v47  ;;  %v6267_v47 = vld [vmem:[#allocation41_spill] sm:$0xff]  ;;  %v6268_v43 = vld [vmem:[#allocation43_spill] sm:$0xff] }
 0x38a   :  { %2138 = vmatprep.subr.bf16.mxu0 %v5074_v1  ;;  %v6269_v1 = vld [vmem:[#allocation45_spill] sm:$0xff] }
 0x38b   :  { %1962 = vmatmul.mubr.bf16.vlgmr.msra.gmra.mrb[32].mxu1 %v4941_v7  ;;  %v6270_v7 = vld [vmem:[#allocation47_spill] sm:$0xff] }
 0x38c   :  { %2098 = vmatpush1.bf16.msra.mxu1 %v4845_v46 }
 0x38d   :  { %2099 = vmatprep.subr.bf16.mxu1 %v4848_v50  ;;  %v6271_v50 = vld [vmem:[#allocation48_spill] sm:$0xff] }
 0x390   :  { %2100 = vmatpush1.bf16.msra.mxu1 %v4851_v36  ;;  %v6272_v36 = vld [vmem:[#allocation49_spill] sm:$0xff] }
 0x391   :  { %2101 = vmatprep.subr.bf16.mxu1 %v4854_v52  ;;  %v6273_v52 = vld [vmem:[#allocation50_spill] sm:$0xff] }
 0x394   :  { %2102 = vmatpush1.bf16.msra.mxu1 %v4857_v40  ;;  %v6274_v40 = vld [vmem:[#allocation51_spill] sm:$0xff] }
 0x395   :  { %2103 = vmatprep.subr.bf16.mxu1 %v4860_v44  ;;  %v5094_v44 = vld [vmem:[#allocation11 + $0x188] ss:$24 sps:$4 sm:$0xff]  }
 0x396   :  { %6275 = vst [vmem:[#allocation71_spill] sm:$0xff] %v5094_v44 }
 0x398   :  { %2104 = vmatpush1.bf16.msra.mxu1 %v4863_v56 }
 0x399   :  { %2105 = vmatprep.subr.bf16.mxu1 %v6267_v47  ;;  %v5097_v47 = vld [vmem:[#allocation11 + $0x1bc] ss:$24 sps:$4 sm:$0xff]  }
 0x39a   :  { %6276 = vst [vmem:[#allocation72_spill] sm:$0xff] %v5097_v47 }
 0x39c   :  { %2106 = vmatpush1.bf16.msra.mxu1 %v6268_v43 }
 0x39d   :  { %2107 = vmatprep.subr.bf16.mxu1 %v6269_v1  ;;  %v5100_v1 = vld [vmem:[#allocation11 + $0x1b8] ss:$24 sps:$4 sm:$0xff]  }
 0x39e   :  { %6277 = vst [vmem:[#allocation73_spill] sm:$0xff] %v5100_v1 }
 0x3a0   :  { %2108 = vmatpush1.bf16.msra.mxu1 %v4875_v37 }
 0x3a1   :  { %2109 = vmatprep.subr.bf16.mxu1 %v6270_v7  ;;  %v5103_v7 = vld [vmem:[#allocation11 + $0x1ec] ss:$24 sps:$4 sm:$0xff]  }
 0x3a2   :  { %6278 = vst [vmem:[#allocation74_spill] sm:$0xff] %v5103_v7 }
 0x3a4   :  { %2110 = vmatpush1.bf16.msra.mxu1 %v6271_v50 }
 0x3a5   :  { %2111 = vmatprep.subr.bf16.mxu1 %v6272_v36  ;;  %v5106_v36 = vld [vmem:[#allocation11 + $0x1e8] ss:$24 sps:$4 sm:$0xff]  }
 0x3a6   :  { %6279 = vst [vmem:[#allocation75_spill] sm:$0xff] %v5106_v36 }
 0x3a8   :  { %2112 = vmatpush1.bf16.msra.mxu1 %v6273_v52  ;;  %v6291_v52 = vld [vmem:[#allocation24_spill] sm:$0xff] }
 0x3a9   :  { %2113 = vmatprep.subr.bf16.mxu1 %v6274_v40  ;;  %v5109_v40 = vld [vmem:[#allocation11 + $0x21c] ss:$24 sps:$4 sm:$0xff]  }
 0x3aa   :  { %6280 = vst [vmem:[#allocation76_spill] sm:$0xff] %v5109_v40 }
 0x3ac   :  { %2114 = vmatpush1.bf16.msra.mxu1 %v5094_v44  ;;  %v5112_v44 = vld [vmem:[#allocation11 + $0x218] ss:$24 sps:$4 sm:$0xff]  }
 0x3ad   :  { %2115 = vmatprep.subr.bf16.mxu1 %v5097_v47  ;;  %6281 = vst [vmem:[#allocation77_spill] sm:$0xff] %v5112_v44  ;;  %v5115_v47 = vld [vmem:[#allocation11 + $0x24c] ss:$24 sps:$4 sm:$0xff]  }
 0x3ae   :  { %6282 = vst [vmem:[#allocation78_spill] sm:$0xff] %v5115_v47 }
 0x3b0   :  { %2116 = vmatpush1.bf16.msra.mxu1 %v5100_v1  ;;  %v5118_v1 = vld [vmem:[#allocation11 + $0x248] ss:$24 sps:$4 sm:$0xff]  }
 0x3b1   :  { %2117 = vmatprep.subr.bf16.mxu1 %v5103_v7  ;;  %6283 = vst [vmem:[#allocation79_spill] sm:$0xff] %v5118_v1  ;;  %v5121_v7 = vld [vmem:[#allocation11 + $0x27c] ss:$24 sps:$4 sm:$0xff]  }
 0x3b2   :  { %6284 = vst [vmem:[#allocation80_spill] sm:$0xff] %v5121_v7 }
 0x3b4   :  { %2118 = vmatpush1.bf16.msra.mxu1 %v5106_v36  ;;  %v5124_v36 = vld [vmem:[#allocation11 + $0x278] ss:$24 sps:$4 sm:$0xff]  }
 0x3b5   :  { %2119 = vmatprep.subr.bf16.mxu1 %v5109_v40  ;;  %6285 = vst [vmem:[#allocation81_spill] sm:$0xff] %v5124_v36  ;;  %v5127_v40 = vld [vmem:[#allocation11 + $0x2ac] ss:$24 sps:$4 sm:$0xff]  }
 0x3b6   :  { %6286 = vst [vmem:[#allocation82_spill] sm:$0xff] %v5127_v40 }
 0x3b8   :  { %2120 = vmatpush1.bf16.msra.mxu1 %v5112_v44  ;;  %v5130_v44 = vld [vmem:[#allocation11 + $0x2a8] ss:$24 sps:$4 sm:$0xff]  }
 0x3b9   :  { %2121 = vmatprep.subr.bf16.mxu1 %v5115_v47  ;;  %6287 = vst [vmem:[#allocation83_spill] sm:$0xff] %v5130_v44  ;;  %v5133_v47 = vld [vmem:[#allocation11 + $0x2dc] ss:$24 sps:$4 sm:$0xff]  }
 0x3ba   :  { %6288 = vst [vmem:[#allocation84_spill] sm:$0xff] %v5133_v47 }
 0x3bc   :  { %2122 = vmatpush1.bf16.msra.mxu1 %v5118_v1  ;;  %v5136_v1 = vld [vmem:[#allocation11 + $0x2d8] ss:$24 sps:$4 sm:$0xff]  }
 0x3bd   :  { %2123 = vmatprep.subr.bf16.mxu1 %v5121_v7  ;;  %6289 = vst [vmem:[#allocation85_spill] sm:$0xff] %v5136_v1  ;;  %v6290_v7 = vld [vmem:[#allocation52_spill] sm:$0xff] }
 0x3c0   :  { %2124 = vmatpush1.bf16.msra.mxu1 %v5124_v36  ;;  %v1973_v36 = vunpack.c.l.bf16 %v6291_v52 }
 0x3c1   :  { %2125 = vmatprep.subr.bf16.mxu1 %v5127_v40  ;;  %v1974_v40 = vunpack.c.h.bf16 %v6291_v52 }
 0x3c4   :  { %2126 = vmatpush1.bf16.msra.mxu1 %v5130_v44 }
 0x3c5   :  { %2127 = vmatprep.subr.bf16.mxu1 %v5133_v47 }
 0x3c8   :  { %2128 = vmatpush1.bf16.msra.mxu1 %v5136_v1 }
 0x3c9   :  { %2265 = vmatprep.subr.bf16.mxu1 %v6290_v7 }
 0x41e   :  { %v1881_v50 = vpop.f32.mrb[28].mxu1  ;;  %v1922_v37 = vpop.f32.mrb[44].mxu0 }
 0x41f   :  { %v1982_v43 = vadd.f32 %v1973_v36, %v1881_v50  ;;  %v1883_v56 = vpop.f32.mrb[29].mxu1  ;;  %v1924_v46 = vpop.f32.mrb[45].mxu0  ;;  %v1996_v52 = vadd.f32 %v6292_v11, %v1922_v37  ;;  %v1977_v50 = vld [vmem:[#allocation2 + $0x84] sm:$0xff] }
 0x420   :  { %v1989_v44 = vadd.f32 %v1974_v40, %v1883_v56  ;;  %v1885_v8 = vpop.f32.mrb[30].mxu1  ;;  %v1926_v17 = vpop.f32.mrb[46].mxu0 }
 0x421   :  { %v3241_v41 = vmul.f32 -1.442695, %v1982_v43  ;;  %v1886_v47 = vpop.f32.mrb[31].mxu1  ;;  %v1927_v21 = vpop.f32.mrb[47].mxu0  ;;  %v1979_v17 = vunpack.c.l.bf16 %v1977_v50 }
 0x422   :  { %v3242_v60 = vmul.f32 -1.442695, %v1989_v44 }
 0x423   :  { %3592 = vpow2.f32 %v3241_v41  ;;  %v2004_v47 = vadd.f32 %v1979_v17, %v1924_v46 }
 0x424   :  { %3594 = vpow2.f32 %v3242_v60  ;;  %v3324_v60 = vpop.permute.xlu1 %3323 }
 0x425   :  { %v3243_v41 = vmul.f32 -1.442695, %v2004_v47  ;;  %v5143_v21 = vunpack.i.h.bf16 %v3324_v60 }
 0x427   :  { %6293 = vst [vmem:[#allocation24_spill] sm:$0xff] %v5143_v21 }
 0x42d   :  { %v3593_v1 = vpop.eup %3592 }
 0x42e   :  { %v1986_v7 = vadd.f32 1.0, %v3593_v1  ;;  %v3595_v45 = vpop.eup %3594 }
 0x42f   :  { %v1993_v63 = vadd.f32 1.0, %v3595_v45 }
 0x430   :  { %3596 = vrcp.f32 %v1986_v7 }
 0x431   :  { %3598 = vrcp.f32 %v1993_v63 }
 0x43a   :  { %v3597_v36 = vpop.eup %3596 }
 0x43b   :  { %v1997_v40 = vmul.f32 %v3597_v36, %v1996_v52  ;;  %v3599_v44 = vpop.eup %3598 }
 0x43c   :  { %v2000_v56 = vsub.f32 1.0, %v3599_v44  ;;  %v2002_v37 = vmul.f32 %v3599_v44, %v4932_v9  ;;  %v1981_v44 = vunpack.c.h.bf16 %v1972_v38 }
 0x43d   :  { %v1998_v43 = vadd.f32 %v1997_v40, %v1975_v35  ;;  %v1980_v35 = vunpack.c.h.bf16 %v1977_v50 }
 0x43f   :  { %3600 = vtanh.f32 %v1998_v43 }
 0x440   :  { %3602 = vpow2.f32 %v3243_v41 }
 0x449   :  { %v3601_v1 = vpop.eup %3600 }
 0x44a   :  { %v2001_v8 = vmul.f32 %v3601_v1, %v2000_v56  ;;  %v3603_v7 = vpop.eup %3602 }
 0x44b   :  { %v2008_v63 = vadd.f32 1.0, %v3603_v7 }
 0x44c   :  { %v2003_v11 = vadd.f32 %v2002_v37, %v2001_v8 }
 0x44d   :  { %3604 = vrcp.f32 %v2008_v63 }
 0x44e   :  { %v2037_v45 = vmul.f32 %v5143_v21, %v2003_v11  ;;  %v2048_v63 = vsub.f32 %v2003_v11, %v4932_v9 }
 0x450   :  { %2039 = vst [vmem:[#allocation14 + $0x20] sm:$0xff] %v2037_v45 }
 0x457   :  { %v3605_v43 = vpop.eup %3604 }
 0x45e   :  { %v1963_v46 = vpop.f32.mrb[32].mxu1 }
 0x45f   :  { %v2011_v52 = vadd.f32 %v1980_v35, %v1963_v46  ;;  %v1965_v36 = vpop.f32.mrb[33].mxu1  ;;  %v5149_v35 = vunpack.i.l.bf16 %v3324_v60 }
 0x460   :  { %v2018_v40 = vadd.f32 %v4703_v23, %v1965_v36  ;;  %v1967_v17 = vpop.f32.mrb[34].mxu1  ;;  %v2049_v36 = vmul.f32 %v5143_v21, %v2048_v63  ;;  %v6327_v63 = vld [vmem:[#allocation41_spill] sm:$0xff] }
 0x461   :  { %v3244_v47 = vmul.f32 -1.442695, %v2011_v52  ;;  %v1968_v41 = vpop.f32.mrb[35].mxu1  ;;  %6294 = vst [vmem:[#allocation29_spill] sm:$0xff] %v5149_v35 }
 0x462   :  { %v2019_v56 = vmul.f32 %v3605_v43, %v2018_v40  ;;  %v5157_v43 = vadd.f32 %v2049_v36, %v4932_v9  ;;  %v6316_v9 = vld [vmem:[#allocation68_spill] sm:$0xff]  ;;  %v6318_v41 = vld [vmem:[#allocation69_spill] sm:$0xff]  ;;  %v6331_v36 = vld [vmem:[#allocation47_spill] sm:$0xff] }
 0x463   :  { %3606 = vpow2.f32 %v3244_v47 }
 0x464   :  { %v2020_v37 = vadd.f32 %v2019_v56, %v1981_v44  ;;  %v5166_v47 = vpack.c.bf16 %v5157_v43, %v5157_v43  ;;  %v6319_v56 = vld [vmem:[#allocation70_spill] sm:$0xff]  ;;  %v6320_v44 = vld [vmem:[#allocation28_spill] sm:$0xff] }
 0x46d   :  { %v3607_v1 = vpop.eup %3606 }
 0x46e   :  { %v2015_v8 = vadd.f32 1.0, %v3607_v1  ;;  %v6321_v1 = vld [vmem:[#allocation30_spill] sm:$0xff] }
 0x470   :  { %3608 = vrcp.f32 %v2015_v8  ;;  %v6322_v8 = vld [vmem:[#allocation32_spill] sm:$0xff] }
 0x471   :  { %3610 = vtanh.f32 %v2020_v37  ;;  %v6323_v37 = vld [vmem:[#allocation34_spill] sm:$0xff] }
 0x47a   :  { %v3609_v45 = vpop.eup %3608 }
 0x47b   :  { %v2022_v7 = vsub.f32 1.0, %v3609_v45  ;;  %v3611_v50 = vpop.eup %3610  ;;  %v2024_v23 = vmul.f32 %v3609_v45, %v4935_v49  ;;  %v6324_v45 = vld [vmem:[#allocation36_spill] sm:$0xff] }
 0x47d   :  { %v2023_v46 = vmul.f32 %v3611_v50, %v2022_v7  ;;  %v6325_v7 = vld [vmem:[#allocation38_spill] sm:$0xff]  ;;  %v6326_v50 = vld [vmem:[#allocation40_spill] sm:$0xff] }
 0x47f   :  { %v2025_v52 = vadd.f32 %v2024_v23, %v2023_v46  ;;  %v6328_v23 = vld [vmem:[#allocation43_spill] sm:$0xff]  ;;  %v6329_v46 = vld [vmem:[#allocation45_spill] sm:$0xff] }
 0x481   :  { %v2045_v38 = vmul.f32 %v5149_v35, %v2025_v52  ;;  %v2051_v40 = vsub.f32 %v2025_v52, %v4935_v49  ;;  %v6330_v52 = vld [vmem:[#allocation46_spill] sm:$0xff] }
 0x483   :  { %2047 = vst [vmem:[#allocation14 + $0x58] sm:$0xff] %v2045_v38  ;;  %v2052_v17 = vmul.f32 %v5149_v35, %v2051_v40  ;;  %v6332_v38 = vld [vmem:[#allocation48_spill] sm:$0xff]  ;;  %v6333_v40 = vld [vmem:[#allocation49_spill] sm:$0xff] }
 0x485   :  { %v5160_v11 = vadd.f32 %v2052_v17, %v4935_v49  ;;  %v6317_v49 = vld [vmem:[#allocation27_spill] sm:$0xff]  ;;  %v6334_v17 = vld [vmem:[#allocation50_spill] sm:$0xff] }
 0x487   :  { %v2055_v60 = vpack.c.bf16 %v5160_v11, %v5160_v11 }
 0x489   :  { %2088 = vmatprep.mubr.bf16.mxu0 %v2055_v60  ;;  %2129 = vmatprep.mubr.bf16.mxu1 %v2055_v60 }
 0x48a   :  { %2089 = vmatmul.mubr.bf16.vlgmr.msra.gmra.mrb[48].mxu0 %v5166_v47  ;;  %2130 = vmatmul.mubr.bf16.vlgmr.msra.gmra.mrb[36].mxu1 %v5166_v47 }
 0x48b   :  { %2139 = vmatpush1.bf16.msra.mxu0 %v4945_v58  ;;  %2170 = vmatprep.mubr.bf16.mxu0 %v2055_v60  ;;  %v6335_v60 = vld [vmem:[#allocation51_spill] sm:$0xff] }
 0x48c   :  { %2140 = vmatprep.subr.bf16.mxu0 %v4948_v14  ;;  %2266 = vmatpush1.bf16.msra.mxu1 %v4722_v12  ;;  %v6295_v12 = vld [vmem:[#allocation55_spill] sm:$0xff] }
 0x48d   :  { %2267 = vmatprep.subr.bf16.mxu1 %v4725_v15  ;;  %v6296_v15 = vld [vmem:[#allocation56_spill] sm:$0xff] }
 0x48f   :  { %2141 = vmatpush1.bf16.msra.mxu0 %v4953_v39 }
 0x490   :  { %2142 = vmatprep.subr.bf16.mxu0 %v4956_v48  ;;  %2268 = vmatpush1.bf16.msra.mxu1 %v4730_v22  ;;  %v6297_v22 = vld [vmem:[#allocation57_spill] sm:$0xff] }
 0x491   :  { %2269 = vmatprep.subr.bf16.mxu1 %v4733_v24  ;;  %v6298_v24 = vld [vmem:[#allocation58_spill] sm:$0xff] }
 0x493   :  { %2143 = vmatpush1.bf16.msra.mxu0 %v4961_v55 }
 0x494   :  { %2144 = vmatprep.subr.bf16.mxu0 %v4964_v4  ;;  %2270 = vmatpush1.bf16.msra.mxu1 %v4738_v27  ;;  %v6299_v27 = vld [vmem:[#allocation35_spill] sm:$0xff] }
 0x495   :  { %2271 = vmatprep.subr.bf16.mxu1 %v4741_v16  ;;  %v6300_v16 = vld [vmem:[#allocation59_spill] sm:$0xff] }
 0x497   :  { %2145 = vmatpush1.bf16.msra.mxu0 %v4969_v32 }
 0x498   :  { %2146 = vmatprep.subr.bf16.mxu0 %v4972_v53  ;;  %2272 = vmatpush1.bf16.msra.mxu1 %v4746_v30  ;;  %v6301_v30 = vld [vmem:[#allocation60_spill] sm:$0xff] }
 0x499   :  { %2273 = vmatprep.subr.bf16.mxu1 %v4749_v18  ;;  %v6302_v18 = vld [vmem:[#allocation37_spill] sm:$0xff] }
 0x49b   :  { %2147 = vmatpush1.bf16.msra.mxu0 %v4977_v57 }
 0x49c   :  { %2148 = vmatprep.subr.bf16.mxu0 %v4980_v61  ;;  %2274 = vmatpush1.bf16.msra.mxu1 %v4754_v33  ;;  %v6303_v33 = vld [vmem:[#allocation39_spill] sm:$0xff] }
 0x49d   :  { %2275 = vmatprep.subr.bf16.mxu1 %v4757_v34  ;;  %v6304_v34 = vld [vmem:[#allocation61_spill] sm:$0xff] }
 0x49f   :  { %2149 = vmatpush1.bf16.msra.mxu0 %v4985_v51 }
 0x4a0   :  { %2150 = vmatprep.subr.bf16.mxu0 %v4988_v59  ;;  %2276 = vmatpush1.bf16.msra.mxu1 %v4762_v42  ;;  %v6305_v42 = vld [vmem:[#allocation62_spill] sm:$0xff] }
 0x4a1   :  { %2277 = vmatprep.subr.bf16.mxu1 %v4765_v25  ;;  %v6306_v25 = vld [vmem:[#allocation42_spill] sm:$0xff] }
 0x4a3   :  { %2151 = vmatpush1.bf16.msra.mxu0 %v4993_v3 }
 0x4a4   :  { %2152 = vmatprep.subr.bf16.mxu0 %v4996_v5  ;;  %2278 = vmatpush1.bf16.msra.mxu1 %v4770_v19  ;;  %v6307_v19 = vld [vmem:[#allocation44_spill] sm:$0xff] }
 0x4a5   :  { %2279 = vmatprep.subr.bf16.mxu1 %v4773_v10  ;;  %v6308_v10 = vld [vmem:[#allocation63_spill] sm:$0xff] }
 0x4a7   :  { %2153 = vmatpush1.bf16.msra.mxu0 %v5001_v2 }
 0x4a8   :  { %2154 = vmatprep.subr.bf16.mxu0 %v5004_v6  ;;  %2280 = vmatpush1.bf16.msra.mxu1 %v4778_v28  ;;  %v6309_v28 = vld [vmem:[#allocation64_spill] sm:$0xff] }
 0x4a9   :  { %2281 = vmatprep.subr.bf16.mxu1 %v4781_v29  ;;  %v6310_v29 = vld [vmem:[#allocation23_spill] sm:$0xff] }
 0x4ab   :  { %2155 = vmatpush1.bf16.msra.mxu0 %v5009_v26 }
 0x4ac   :  { %2156 = vmatprep.subr.bf16.mxu0 %v5012_v54  ;;  %2282 = vmatpush1.bf16.msra.mxu1 %v4786_v31  ;;  %v6311_v31 = vld [vmem:[#allocation25_spill] sm:$0xff] }
 0x4ad   :  { %2283 = vmatprep.subr.bf16.mxu1 %v4789_v20  ;;  %v6312_v20 = vld [vmem:[#allocation65_spill] sm:$0xff] }
 0x4af   :  { %2157 = vmatpush1.bf16.msra.mxu0 %v6295_v12 }
 0x4b0   :  { %2158 = vmatprep.subr.bf16.mxu0 %v6296_v15  ;;  %2284 = vmatpush1.bf16.msra.mxu1 %v4794_v0  ;;  %v6313_v0 = vld [vmem:[#allocation66_spill] sm:$0xff] }
 0x4b1   :  { %2285 = vmatprep.subr.bf16.mxu1 %v4797_v13  ;;  %v6314_v13 = vld [vmem:[#allocation26_spill] sm:$0xff] }
 0x4b3   :  { %2159 = vmatpush1.bf16.msra.mxu0 %v6297_v22 }
 0x4b4   :  { %2160 = vmatprep.subr.bf16.mxu0 %v6298_v24  ;;  %2286 = vmatpush1.bf16.msra.mxu1 %v4802_v62  ;;  %v6315_v62 = vld [vmem:[#allocation67_spill] sm:$0xff] }
 0x4b5   :  { %2287 = vmatprep.subr.bf16.mxu1 %v6299_v27  ;;  %v6337_v27 = vld [vmem:[#allocation72_spill] sm:$0xff] }
 0x4b7   :  { %2161 = vmatpush1.bf16.msra.mxu0 %v6300_v16 }
 0x4b8   :  { %2162 = vmatprep.subr.bf16.mxu0 %v6301_v30  ;;  %2288 = vmatpush1.bf16.msra.mxu1 %v6302_v18  ;;  %v6338_v18 = vld [vmem:[#allocation73_spill] sm:$0xff] }
 0x4b9   :  { %2289 = vmatprep.subr.bf16.mxu1 %v6303_v33  ;;  %v6339_v33 = vld [vmem:[#allocation74_spill] sm:$0xff] }
 0x4bb   :  { %2163 = vmatpush1.bf16.msra.mxu0 %v6304_v34 }
 0x4bc   :  { %2164 = vmatprep.subr.bf16.mxu0 %v6305_v42  ;;  %2290 = vmatpush1.bf16.msra.mxu1 %v6306_v25  ;;  %v6340_v25 = vld [vmem:[#allocation75_spill] sm:$0xff] }
 0x4bd   :  { %2291 = vmatprep.subr.bf16.mxu1 %v6307_v19  ;;  %v6341_v19 = vld [vmem:[#allocation76_spill] sm:$0xff] }
 0x4bf   :  { %2165 = vmatpush1.bf16.msra.mxu0 %v6308_v10 }
 0x4c0   :  { %2166 = vmatprep.subr.bf16.mxu0 %v6309_v28  ;;  %2292 = vmatpush1.bf16.msra.mxu1 %v6310_v29  ;;  %v6342_v29 = vld [vmem:[#allocation77_spill] sm:$0xff] }
 0x4c1   :  { %2293 = vmatprep.subr.bf16.mxu1 %v6311_v31  ;;  %v6343_v31 = vld [vmem:[#allocation78_spill] sm:$0xff] }
 0x4c3   :  { %2167 = vmatpush1.bf16.msra.mxu0 %v6312_v20 }
 0x4c4   :  { %2168 = vmatprep.subr.bf16.mxu0 %v6313_v0  ;;  %2294 = vmatpush1.bf16.msra.mxu1 %v6314_v13  ;;  %v6344_v13 = vld [vmem:[#allocation79_spill] sm:$0xff] }
 0x4c5   :  { %2295 = vmatprep.subr.bf16.mxu1 %v6315_v62 }
 0x4c7   :  { %2169 = vmatpush1.bf16.msra.mxu0 %v6316_v9 }
 0x4c8   :  { %2306 = vmatprep.subr.bf16.mxu0 %v6317_v49  ;;  %2296 = vmatpush1.bf16.msra.mxu1 %v6318_v41  ;;  %v6345_v49 = vld [vmem:[#allocation80_spill] sm:$0xff] }
 0x4c9   :  { %2347 = vmatprep.subr.bf16.mxu1 %v6319_v56 }
 0x4ca   :  { %2171 = vmatmul.mubr.bf16.vlgmr.msra.gmra.mrb[52].mxu0 %v5166_v47  ;;  %v6336_v47 = vld [vmem:[#allocation71_spill] sm:$0xff] }
 0x4cb   :  { %2307 = vmatpush1.bf16.msra.mxu0 %v6320_v44  ;;  %v6346_v44 = vld [vmem:[#allocation81_spill] sm:$0xff] }
 0x4cc   :  { %2308 = vmatprep.subr.bf16.mxu0 %v6321_v1  ;;  %v6347_v1 = vld [vmem:[#allocation82_spill] sm:$0xff] }
 0x4cf   :  { %2309 = vmatpush1.bf16.msra.mxu0 %v6322_v8  ;;  %v6348_v8 = vld [vmem:[#allocation83_spill] sm:$0xff] }
 0x4d0   :  { %2310 = vmatprep.subr.bf16.mxu0 %v6323_v37  ;;  %v6349_v37 = vld [vmem:[#allocation84_spill] sm:$0xff] }
 0x4d3   :  { %2311 = vmatpush1.bf16.msra.mxu0 %v6324_v45  ;;  %v6350_v45 = vld [vmem:[#allocation85_spill] sm:$0xff] }
 0x4d4   :  { %2312 = vmatprep.subr.bf16.mxu0 %v6325_v7  ;;  %v6351_v7 = vld [vmem:[#allocation52_spill] sm:$0xff] }
 0x4d7   :  { %2313 = vmatpush1.bf16.msra.mxu0 %v6326_v50  ;;  %v2180_v50 = vld [vmem:[#allocation2 + $0x48] sm:$0xff] }
 0x4d8   :  { %2314 = vmatprep.subr.bf16.mxu0 %v6327_v63  ;;  %v2182_v63 = vunpack.c.l.bf16 %v2180_v50 }
 0x4db   :  { %2315 = vmatpush1.bf16.msra.mxu0 %v6328_v23 }
 0x4dc   :  { %2316 = vmatprep.subr.bf16.mxu0 %v6329_v46 }
 0x4df   :  { %2317 = vmatpush1.bf16.msra.mxu0 %v6330_v52 }
 0x4e0   :  { %2318 = vmatprep.subr.bf16.mxu0 %v6331_v36 }
 0x4e3   :  { %2319 = vmatpush1.bf16.msra.mxu0 %v6332_v38 }
 0x4e4   :  { %2320 = vmatprep.subr.bf16.mxu0 %v6333_v40  ;;  %v2183_v40 = vunpack.c.h.bf16 %v2180_v50  ;;  %v2186_v50 = vld [vmem:[#allocation2 + $0x6c] sm:$0xff] }
 0x4e7   :  { %2321 = vmatpush1.bf16.msra.mxu0 %v6334_v17 }
 0x4e8   :  { %2322 = vmatprep.subr.bf16.mxu0 %v6335_v60 }
 0x4eb   :  { %2323 = vmatpush1.bf16.msra.mxu0 %v6336_v47 }
 0x4ec   :  { %2324 = vmatprep.subr.bf16.mxu0 %v6337_v27 }
 0x4ef   :  { %2325 = vmatpush1.bf16.msra.mxu0 %v6338_v18 }
 0x4f0   :  { %2326 = vmatprep.subr.bf16.mxu0 %v6339_v33 }
 0x4f3   :  { %2327 = vmatpush1.bf16.msra.mxu0 %v6340_v25 }
 0x4f4   :  { %2328 = vmatprep.subr.bf16.mxu0 %v6341_v19 }
 0x4f7   :  { %2329 = vmatpush1.bf16.msra.mxu0 %v6342_v29 }
 0x4f8   :  { %2330 = vmatprep.subr.bf16.mxu0 %v6343_v31  ;;  %v5267_v31 = vld [vmem:[#allocation12] ss:$0 sm:$0xff] }
 0x4f9   :  { %6352 = vst [vmem:[#allocation55_spill] sm:$0xff] %v5267_v31 }
 0x4fb   :  { %2331 = vmatpush1.bf16.msra.mxu0 %v6344_v13  ;;  %v2181_v13 = vld [vmem:[#allocation2 + $0x50] ss:$36 sps:$4 sm:$0xff]  }
 0x4fc   :  { %2332 = vmatprep.subr.bf16.mxu0 %v6345_v49 }
 0x4ff   :  { %2333 = vmatpush1.bf16.msra.mxu0 %v6346_v44 }
 0x500   :  { %2334 = vmatprep.subr.bf16.mxu0 %v6347_v1 }
 0x503   :  { %2335 = vmatpush1.bf16.msra.mxu0 %v6348_v8 }
 0x504   :  { %2336 = vmatprep.subr.bf16.mxu0 %v6349_v37 }
 0x507   :  { %2337 = vmatpush1.bf16.msra.mxu0 %v6350_v45 }
 0x508   :  { %2454 = vmatprep.subr.bf16.mxu0 %v6351_v7 }
 0x55d   :  { %v2090_v23 = vpop.f32.mrb[48].mxu0  ;;  %v2131_v46 = vpop.f32.mrb[36].mxu1 }
 0x55e   :  { %v2191_v52 = vadd.f32 %v2182_v63, %v2090_v23  ;;  %v2092_v36 = vpop.f32.mrb[49].mxu0  ;;  %v2133_v38 = vpop.f32.mrb[37].mxu1  ;;  %v2205_v63 = vadd.f32 %v5267_v31, %v2131_v46 }
 0x55f   :  { %v2094_v17 = vpop.f32.mrb[50].mxu0  ;;  %v2135_v60 = vpop.f32.mrb[38].mxu1  ;;  %v2198_v8 = vadd.f32 %v2183_v40, %v2092_v36 }
 0x560   :  { %v3247_v21 = vmul.f32 -1.442695, %v2191_v52  ;;  %v2095_v35 = vpop.f32.mrb[51].mxu0  ;;  %v2136_v1 = vpop.f32.mrb[39].mxu1  ;;  %v2184_v17 = vunpack.c.l.bf16 %v2181_v13 }
 0x561   :  { %v3248_v37 = vmul.f32 -1.442695, %v2198_v8  ;;  %v2188_v35 = vunpack.c.l.bf16 %v2186_v50  ;;  %v3329_v36 = vpop.permute.xlu1 %3328 }
 0x562   :  { %3612 = vpow2.f32 %v3247_v21 }
 0x563   :  { %3614 = vpow2.f32 %v3248_v37  ;;  %v2213_v21 = vadd.f32 %v2188_v35, %v2133_v38  ;;  %v2189_v38 = vunpack.c.h.bf16 %v2186_v50  ;;  %v5274_v35 = vld [vmem:[#allocation12 + $0x1] ss:$0 sm:$0xff] }
 0x565   :  { %v3249_v8 = vmul.f32 -1.442695, %v2213_v21 }
 0x56c   :  { %v3613_v45 = vpop.eup %3612 }
 0x56d   :  { %v2195_v44 = vadd.f32 1.0, %v3613_v45  ;;  %v3615_v7 = vpop.eup %3614 }
 0x56e   :  { %v2202_v49 = vadd.f32 1.0, %v3615_v7  ;;  %v5271_v7 = vunpack.i.h.bf16 %v3329_v36 }
 0x56f   :  { %3616 = vrcp.f32 %v2195_v44 }
 0x570   :  { %3618 = vrcp.f32 %v2202_v49 }
 0x579   :  { %v3617_v23 = vpop.eup %3616 }
 0x57a   :  { %v2206_v52 = vmul.f32 %v3617_v23, %v2205_v63  ;;  %v3619_v37 = vpop.eup %3618 }
 0x57b   :  { %v2209_v44 = vsub.f32 1.0, %v3619_v37  ;;  %v2211_v60 = vmul.f32 %v3619_v37, %v5157_v43 }
 0x57c   :  { %v2207_v1 = vadd.f32 %v2206_v52, %v2184_v17 }
 0x57e   :  { %3620 = vtanh.f32 %v2207_v1 }
 0x57f   :  { %3622 = vpow2.f32 %v3249_v8 }
 0x588   :  { %v3621_v45 = vpop.eup %3620 }
 0x589   :  { %v2210_v40 = vmul.f32 %v3621_v45, %v2209_v44  ;;  %v3623_v63 = vpop.eup %3622 }
 0x58a   :  { %v2217_v49 = vadd.f32 1.0, %v3623_v63 }
 0x58b   :  { %v2212_v46 = vadd.f32 %v2211_v60, %v2210_v40  ;;  %v2190_v40 = vunpack.c.h.bf16 %v2181_v13 }
 0x58c   :  { %3624 = vrcp.f32 %v2217_v49 }
 0x58d   :  { %v2246_v31 = vmul.f32 %v5271_v7, %v2212_v46 }
 0x58f   :  { %2248 = vst [vmem:[#allocation14 + $0x30] sm:$0xff] %v2246_v31 }
 0x596   :  { %v3625_v8 = vpop.eup %3624 }
 0x59d   :  { %v2172_v23 = vpop.f32.mrb[52].mxu0 }
 0x59e   :  { %v2220_v17 = vadd.f32 %v2189_v38, %v2172_v23  ;;  %v2174_v52 = vpop.f32.mrb[53].mxu0  ;;  %v2257_v38 = vsub.f32 %v2212_v46, %v5157_v43 }
 0x59f   :  { %v2227_v1 = vadd.f32 %v5274_v35, %v2174_v52  ;;  %v2176_v21 = vpop.f32.mrb[54].mxu0 }
 0x5a0   :  { %v3250_v37 = vmul.f32 -1.442695, %v2220_v17  ;;  %v2177_v44 = vpop.f32.mrb[55].mxu0  ;;  %v5279_v21 = vunpack.i.l.bf16 %v3329_v36 }
 0x5a1   :  { %v2228_v45 = vmul.f32 %v3625_v8, %v2227_v1  ;;  %v2258_v1 = vmul.f32 %v5271_v7, %v2257_v38  ;;  %v5463_v38 = vld [vmem:[#allocation11 + $0x15c] ss:$24 sps:$4 sm:$0xff]  }
 0x5a2   :  { %3626 = vpow2.f32 %v3250_v37  ;;  %6375 = vst [vmem:[#allocation69_spill] sm:$0xff] %v5463_v38 }
 0x5a3   :  { %v2229_v31 = vadd.f32 %v2228_v45, %v2190_v40  ;;  %v5286_v37 = vadd.f32 %v2258_v1, %v5157_v43  ;;  %v5301_v43 = vld [vmem:[#allocation11] ss:$24 sps:$4 sm:$0xff]   ;;  %v5309_v45 = vld [vmem:[#allocation11 + $0x30] ss:$24 sps:$4 sm:$0xff]   ;;  %v5320_v40 = vld [vmem:[#allocation11 + $0x94] ss:$24 sps:$4 sm:$0xff]  }
 0x5a4   :  { %v6379_v1 = vld [vmem:[#allocation78_spill] sm:$0xff] }
 0x5a5   :  { %v5295_v44 = vpack.c.bf16 %v5286_v37, %v5286_v37 }
 0x5ac   :  { %v3627_v60 = vpop.eup %3626 }
 0x5ad   :  { %v2224_v29 = vadd.f32 1.0, %v3627_v60  ;;  %v5448_v60 = vld [vmem:[#allocation11 + $0xc8] ss:$24 sps:$4 sm:$0xff]  }
 0x5ae   :  { %6370 = vst [vmem:[#allocation66_spill] sm:$0xff] %v5448_v60 }
 0x5af   :  { %3628 = vrcp.f32 %v2224_v29 }
 0x5b0   :  { %3630 = vtanh.f32 %v2229_v31  ;;  %v5451_v31 = vld [vmem:[#allocation11 + $0xfc] ss:$24 sps:$4 sm:$0xff]  }
 0x5b1   :  { %6371 = vst [vmem:[#allocation26_spill] sm:$0xff] %v5451_v31 }
 0x5b9   :  { %v3629_v50 = vpop.eup %3628 }
 0x5ba   :  { %v2231_v63 = vsub.f32 1.0, %v3629_v50  ;;  %v3631_v49 = vpop.eup %3630  ;;  %v2233_v23 = vmul.f32 %v3629_v50, %v5160_v11  ;;  %v5454_v50 = vld [vmem:[#allocation11 + $0xf8] ss:$24 sps:$4 sm:$0xff]  }
 0x5bb   :  { %6372 = vst [vmem:[#allocation67_spill] sm:$0xff] %v5454_v50 }
 0x5bc   :  { %v2232_v52 = vmul.f32 %v3631_v49, %v2231_v63  ;;  %v5457_v63 = vld [vmem:[#allocation11 + $0x12c] ss:$24 sps:$4 sm:$0xff]   ;;  %v5460_v49 = vld [vmem:[#allocation11 + $0x128] ss:$24 sps:$4 sm:$0xff]  }
 0x5bd   :  { %6373 = vst [vmem:[#allocation68_spill] sm:$0xff] %v5457_v63  ;;  %6374 = vst [vmem:[#allocation27_spill] sm:$0xff] %v5460_v49 }
 0x5be   :  { %v2234_v17 = vadd.f32 %v2233_v23, %v2232_v52  ;;  %v5466_v23 = vld [vmem:[#allocation11 + $0x158] ss:$24 sps:$4 sm:$0xff]   ;;  %v5469_v52 = vld [vmem:[#allocation11 + $0x18c] ss:$24 sps:$4 sm:$0xff]  }
 0x5bf   :  { %6376 = vst [vmem:[#allocation70_spill] sm:$0xff] %v5466_v23  ;;  %6377 = vst [vmem:[#allocation28_spill] sm:$0xff] %v5469_v52 }
 0x5c0   :  { %v2254_v13 = vmul.f32 %v5279_v21, %v2234_v17  ;;  %v2260_v8 = vsub.f32 %v2234_v17, %v5160_v11  ;;  %v6378_v17 = vld [vmem:[#allocation77_spill] sm:$0xff] }
 0x5c2   :  { %2256 = vst [vmem:[#allocation14 + $0x48] sm:$0xff] %v2254_v13  ;;  %v2261_v29 = vmul.f32 %v5279_v21, %v2260_v8  ;;  %v6380_v13 = vld [vmem:[#allocation79_spill] sm:$0xff]  ;;  %v6381_v8 = vld [vmem:[#allocation80_spill] sm:$0xff] }
 0x5c4   :  { %v5289_v46 = vadd.f32 %v2261_v29, %v5160_v11  ;;  %v5304_v11 = vld [vmem:[#allocation11 + $0x34] ss:$24 sps:$4 sm:$0xff]   ;;  %v6382_v29 = vld [vmem:[#allocation81_spill] sm:$0xff] }
 0x5c6   :  { %v2264_v36 = vpack.c.bf16 %v5289_v46, %v5289_v46 }
 0x5c8   :  { %2297 = vmatprep.mubr.bf16.mxu1 %v2264_v36  ;;  %2338 = vmatprep.mubr.bf16.mxu0 %v2264_v36 }
 0x5c9   :  { %2298 = vmatmul.mubr.bf16.vlgmr.msra.gmra.mrb[40].mxu1 %v5295_v44  ;;  %2339 = vmatmul.mubr.bf16.vlgmr.msra.gmra.mrb[56].mxu0 %v5295_v44 }
 0x5ca   :  { %2348 = vmatpush1.bf16.msra.mxu1 %v4945_v58  ;;  %2379 = vmatprep.mubr.bf16.mxu1 %v2264_v36  ;;  %v5312_v58 = vld [vmem:[#allocation11 + $0x64] ss:$24 sps:$4 sm:$0xff]  }
 0x5cb   :  { %2349 = vmatprep.subr.bf16.mxu1 %v4948_v14  ;;  %2455 = vmatpush1.bf16.msra.mxu0 %v5301_v43  ;;  %v5317_v14 = vld [vmem:[#allocation11 + $0x60] ss:$24 sps:$4 sm:$0xff]  }
 0x5cc   :  { %2456 = vmatprep.subr.bf16.mxu0 %v5304_v11 }
 0x5ce   :  { %2350 = vmatpush1.bf16.msra.mxu1 %v4953_v39  ;;  %v5325_v39 = vld [vmem:[#allocation11 + $0x90] ss:$24 sps:$4 sm:$0xff]  }
 0x5cf   :  { %2351 = vmatprep.subr.bf16.mxu1 %v4956_v48  ;;  %2457 = vmatpush1.bf16.msra.mxu0 %v5309_v45  ;;  %v5328_v48 = vld [vmem:[#allocation11 + $0xc4] ss:$24 sps:$4 sm:$0xff]  }
 0x5d0   :  { %2458 = vmatprep.subr.bf16.mxu0 %v5312_v58 }
 0x5d2   :  { %2352 = vmatpush1.bf16.msra.mxu1 %v4961_v55  ;;  %v5333_v55 = vld [vmem:[#allocation11 + $0xc0] ss:$24 sps:$4 sm:$0xff]  }
 0x5d3   :  { %2353 = vmatprep.subr.bf16.mxu1 %v4964_v4  ;;  %2459 = vmatpush1.bf16.msra.mxu0 %v5317_v14  ;;  %v5336_v4 = vld [vmem:[#allocation11 + $0xf4] ss:$24 sps:$4 sm:$0xff]  }
 0x5d4   :  { %2460 = vmatprep.subr.bf16.mxu0 %v5320_v40 }
 0x5d6   :  { %2354 = vmatpush1.bf16.msra.mxu1 %v4969_v32  ;;  %v5341_v32 = vld [vmem:[#allocation11 + $0xf0] ss:$24 sps:$4 sm:$0xff]  }
 0x5d7   :  { %2355 = vmatprep.subr.bf16.mxu1 %v4972_v53  ;;  %2461 = vmatpush1.bf16.msra.mxu0 %v5325_v39  ;;  %v5344_v53 = vld [vmem:[#allocation11 + $0x124] ss:$24 sps:$4 sm:$0xff]  }
 0x5d8   :  { %2462 = vmatprep.subr.bf16.mxu0 %v5328_v48 }
 0x5da   :  { %2356 = vmatpush1.bf16.msra.mxu1 %v4977_v57  ;;  %v5349_v57 = vld [vmem:[#allocation11 + $0x120] ss:$24 sps:$4 sm:$0xff]  }
 0x5db   :  { %2357 = vmatprep.subr.bf16.mxu1 %v4980_v61  ;;  %2463 = vmatpush1.bf16.msra.mxu0 %v5333_v55  ;;  %v5352_v61 = vld [vmem:[#allocation11 + $0x154] ss:$24 sps:$4 sm:$0xff]  }
 0x5dc   :  { %2464 = vmatprep.subr.bf16.mxu0 %v5336_v4 }
 0x5de   :  { %2358 = vmatpush1.bf16.msra.mxu1 %v4985_v51  ;;  %v5357_v51 = vld [vmem:[#allocation11 + $0x150] ss:$24 sps:$4 sm:$0xff]  }
 0x5df   :  { %2359 = vmatprep.subr.bf16.mxu1 %v4988_v59  ;;  %2465 = vmatpush1.bf16.msra.mxu0 %v5341_v32  ;;  %v5360_v59 = vld [vmem:[#allocation11 + $0x184] ss:$24 sps:$4 sm:$0xff]  }
 0x5e0   :  { %2466 = vmatprep.subr.bf16.mxu0 %v5344_v53 }
 0x5e2   :  { %2360 = vmatpush1.bf16.msra.mxu1 %v4993_v3  ;;  %v5365_v3 = vld [vmem:[#allocation11 + $0x180] ss:$24 sps:$4 sm:$0xff]  }
 0x5e3   :  { %2361 = vmatprep.subr.bf16.mxu1 %v4996_v5  ;;  %2467 = vmatpush1.bf16.msra.mxu0 %v5349_v57  ;;  %v5368_v5 = vld [vmem:[#allocation11 + $0x1b4] ss:$24 sps:$4 sm:$0xff]  }
 0x5e4   :  { %2468 = vmatprep.subr.bf16.mxu0 %v5352_v61 }
 0x5e6   :  { %2362 = vmatpush1.bf16.msra.mxu1 %v5001_v2  ;;  %v5373_v2 = vld [vmem:[#allocation11 + $0x1b0] ss:$24 sps:$4 sm:$0xff]  }
 0x5e7   :  { %2363 = vmatprep.subr.bf16.mxu1 %v5004_v6  ;;  %2469 = vmatpush1.bf16.msra.mxu0 %v5357_v51  ;;  %v5376_v6 = vld [vmem:[#allocation11 + $0x1e4] ss:$24 sps:$4 sm:$0xff]  }
 0x5e8   :  { %2470 = vmatprep.subr.bf16.mxu0 %v5360_v59 }
 0x5ea   :  { %2364 = vmatpush1.bf16.msra.mxu1 %v5009_v26  ;;  %v5381_v26 = vld [vmem:[#allocation11 + $0x1e0] ss:$24 sps:$4 sm:$0xff]  }
 0x5eb   :  { %2365 = vmatprep.subr.bf16.mxu1 %v5012_v54  ;;  %2471 = vmatpush1.bf16.msra.mxu0 %v5365_v3  ;;  %v5384_v54 = vld [vmem:[#allocation11 + $0x214] ss:$24 sps:$4 sm:$0xff]  }
 0x5ec   :  { %2472 = vmatprep.subr.bf16.mxu0 %v5368_v5  ;;  %6353 = vst [vmem:[#allocation56_spill] sm:$0xff] %v5384_v54 }
 0x5ee   :  { %2366 = vmatpush1.bf16.msra.mxu1 %v6295_v12  ;;  %v5389_v12 = vld [vmem:[#allocation11 + $0x210] ss:$24 sps:$4 sm:$0xff]  }
 0x5ef   :  { %2367 = vmatprep.subr.bf16.mxu1 %v6296_v15  ;;  %2473 = vmatpush1.bf16.msra.mxu0 %v5373_v2  ;;  %6354 = vst [vmem:[#allocation57_spill] sm:$0xff] %v5389_v12  ;;  %v5392_v15 = vld [vmem:[#allocation11 + $0x244] ss:$24 sps:$4 sm:$0xff]  }
 0x5f0   :  { %2474 = vmatprep.subr.bf16.mxu0 %v5376_v6  ;;  %6355 = vst [vmem:[#allocation58_spill] sm:$0xff] %v5392_v15 }
 0x5f2   :  { %2368 = vmatpush1.bf16.msra.mxu1 %v6297_v22  ;;  %v5397_v22 = vld [vmem:[#allocation11 + $0x240] ss:$24 sps:$4 sm:$0xff]  }
 0x5f3   :  { %2369 = vmatprep.subr.bf16.mxu1 %v6298_v24  ;;  %2475 = vmatpush1.bf16.msra.mxu0 %v5381_v26  ;;  %6356 = vst [vmem:[#allocation35_spill] sm:$0xff] %v5397_v22  ;;  %v5400_v24 = vld [vmem:[#allocation11 + $0x274] ss:$24 sps:$4 sm:$0xff]  }
 0x5f4   :  { %2476 = vmatprep.subr.bf16.mxu0 %v5384_v54  ;;  %6357 = vst [vmem:[#allocation59_spill] sm:$0xff] %v5400_v24 }
 0x5f6   :  { %2370 = vmatpush1.bf16.msra.mxu1 %v6300_v16  ;;  %v5405_v16 = vld [vmem:[#allocation11 + $0x270] ss:$24 sps:$4 sm:$0xff]  }
 0x5f7   :  { %2371 = vmatprep.subr.bf16.mxu1 %v6301_v30  ;;  %2477 = vmatpush1.bf16.msra.mxu0 %v5389_v12  ;;  %6358 = vst [vmem:[#allocation60_spill] sm:$0xff] %v5405_v16  ;;  %v5408_v30 = vld [vmem:[#allocation11 + $0x2a4] ss:$24 sps:$4 sm:$0xff]  }
 0x5f8   :  { %2478 = vmatprep.subr.bf16.mxu0 %v5392_v15  ;;  %6359 = vst [vmem:[#allocation37_spill] sm:$0xff] %v5408_v30 }
 0x5fa   :  { %2372 = vmatpush1.bf16.msra.mxu1 %v6304_v34  ;;  %v5413_v34 = vld [vmem:[#allocation11 + $0x2a0] ss:$24 sps:$4 sm:$0xff]  }
 0x5fb   :  { %2373 = vmatprep.subr.bf16.mxu1 %v6305_v42  ;;  %2479 = vmatpush1.bf16.msra.mxu0 %v5397_v22  ;;  %6360 = vst [vmem:[#allocation39_spill] sm:$0xff] %v5413_v34  ;;  %v5418_v42 = vld [vmem:[#allocation11 + $0xc] ss:$24 sps:$4 sm:$0xff]  }
 0x5fc   :  { %2480 = vmatprep.subr.bf16.mxu0 %v5400_v24  ;;  %6361 = vst [vmem:[#allocation61_spill] sm:$0xff] %v5418_v42 }
 0x5fe   :  { %2374 = vmatpush1.bf16.msra.mxu1 %v6308_v10  ;;  %v5424_v10 = vld [vmem:[#allocation11 + $0x8] ss:$24 sps:$4 sm:$0xff]  }
 0x5ff   :  { %2375 = vmatprep.subr.bf16.mxu1 %v6309_v28  ;;  %2481 = vmatpush1.bf16.msra.mxu0 %v5405_v16  ;;  %6362 = vst [vmem:[#allocation62_spill] sm:$0xff] %v5424_v10  ;;  %v5427_v28 = vld [vmem:[#allocation11 + $0x3c] ss:$24 sps:$4 sm:$0xff]  }
 0x600   :  { %2482 = vmatprep.subr.bf16.mxu0 %v5408_v30  ;;  %6363 = vst [vmem:[#allocation42_spill] sm:$0xff] %v5427_v28 }
 0x602   :  { %2376 = vmatpush1.bf16.msra.mxu1 %v6312_v20  ;;  %v5430_v20 = vld [vmem:[#allocation11 + $0x38] ss:$24 sps:$4 sm:$0xff]  }
 0x603   :  { %2377 = vmatprep.subr.bf16.mxu1 %v6313_v0  ;;  %2483 = vmatpush1.bf16.msra.mxu0 %v5413_v34  ;;  %6364 = vst [vmem:[#allocation44_spill] sm:$0xff] %v5430_v20  ;;  %v5433_v0 = vld [vmem:[#allocation11 + $0x6c] ss:$24 sps:$4 sm:$0xff]  }
 0x604   :  { %2484 = vmatprep.subr.bf16.mxu0 %v6315_v62  ;;  %6365 = vst [vmem:[#allocation63_spill] sm:$0xff] %v5433_v0  ;;  %v5436_v62 = vld [vmem:[#allocation11 + $0x68] ss:$24 sps:$4 sm:$0xff]  }
 0x605   :  { %6366 = vst [vmem:[#allocation64_spill] sm:$0xff] %v5436_v62 }
 0x606   :  { %2378 = vmatpush1.bf16.msra.mxu1 %v6316_v9  ;;  %v5439_v9 = vld [vmem:[#allocation11 + $0x9c] ss:$24 sps:$4 sm:$0xff]  }
 0x607   :  { %2495 = vmatprep.subr.bf16.mxu1 %v5418_v42  ;;  %2485 = vmatpush1.bf16.msra.mxu0 %v6318_v41  ;;  %6367 = vst [vmem:[#allocation23_spill] sm:$0xff] %v5439_v9  ;;  %v5442_v41 = vld [vmem:[#allocation11 + $0x98] ss:$24 sps:$4 sm:$0xff]  }
 0x608   :  { %2536 = vmatprep.subr.bf16.mxu0 %v6319_v56  ;;  %6368 = vst [vmem:[#allocation25_spill] sm:$0xff] %v5442_v41  ;;  %v5445_v56 = vld [vmem:[#allocation11 + $0xcc] ss:$24 sps:$4 sm:$0xff]  }
 0x609   :  { %2380 = vmatmul.mubr.bf16.vlgmr.msra.gmra.mrb[44].mxu1 %v5295_v44  ;;  %6369 = vst [vmem:[#allocation65_spill] sm:$0xff] %v5445_v56 }
 0x60a   :  { %2496 = vmatpush1.bf16.msra.mxu1 %v5424_v10 }
 0x60b   :  { %2497 = vmatprep.subr.bf16.mxu1 %v5427_v28 }
 0x60e   :  { %2498 = vmatpush1.bf16.msra.mxu1 %v5430_v20 }
 0x60f   :  { %2499 = vmatprep.subr.bf16.mxu1 %v5433_v0 }
 0x612   :  { %2500 = vmatpush1.bf16.msra.mxu1 %v5436_v62 }
 0x613   :  { %2501 = vmatprep.subr.bf16.mxu1 %v5439_v9 }
 0x616   :  { %2502 = vmatpush1.bf16.msra.mxu1 %v5442_v41 }
 0x617   :  { %2503 = vmatprep.subr.bf16.mxu1 %v5445_v56 }
 0x61a   :  { %2504 = vmatpush1.bf16.msra.mxu1 %v5448_v60  ;;  %v6388_v60 = vld [vmem:[#allocation55_spill] sm:$0xff] }
 0x61b   :  { %2505 = vmatprep.subr.bf16.mxu1 %v5451_v31  ;;  %v2389_v31 = vld [vmem:[#allocation2 + $0x5c] ss:$12 sps:$4 sm:$0xff]  }
 0x61e   :  { %2506 = vmatpush1.bf16.msra.mxu1 %v5454_v50 }
 0x61f   :  { %2507 = vmatprep.subr.bf16.mxu1 %v5457_v63 }
 0x622   :  { %2508 = vmatpush1.bf16.msra.mxu1 %v5460_v49 }
 0x623   :  { %2509 = vmatprep.subr.bf16.mxu1 %v5463_v38 }
 0x626   :  { %2510 = vmatpush1.bf16.msra.mxu1 %v5466_v23 }
 0x627   :  { %2511 = vmatprep.subr.bf16.mxu1 %v5469_v52 }
 0x62a   :  { %2512 = vmatpush1.bf16.msra.mxu1 %v6336_v47  ;;  %v6383_v47 = vld [vmem:[#allocation82_spill] sm:$0xff] }
 0x62b   :  { %2513 = vmatprep.subr.bf16.mxu1 %v6337_v27  ;;  %v6384_v27 = vld [vmem:[#allocation83_spill] sm:$0xff] }
 0x62e   :  { %2514 = vmatpush1.bf16.msra.mxu1 %v6338_v18  ;;  %v6385_v18 = vld [vmem:[#allocation84_spill] sm:$0xff] }
 0x62f   :  { %2515 = vmatprep.subr.bf16.mxu1 %v6339_v33  ;;  %v6386_v33 = vld [vmem:[#allocation85_spill] sm:$0xff] }
 0x632   :  { %2516 = vmatpush1.bf16.msra.mxu1 %v6340_v25  ;;  %v5487_v25 = vld [vmem:[#allocation11 + $0x4] ss:$24 sps:$4 sm:$0xff]  }
 0x633   :  { %2517 = vmatprep.subr.bf16.mxu1 %v6341_v19  ;;  %6387 = vst [vmem:[#allocation30_spill] sm:$0xff] %v5487_v25  ;;  %v2388_v19 = vld [vmem:[#allocation2 + $0x60] sm:$0xff] }
 0x634   :  { %v2390_v36 = vunpack.c.l.bf16 %v2388_v19 }
 0x636   :  { %2518 = vmatpush1.bf16.msra.mxu1 %v6378_v17 }
 0x637   :  { %2519 = vmatprep.subr.bf16.mxu1 %v6379_v1 }
 0x63a   :  { %2520 = vmatpush1.bf16.msra.mxu1 %v6380_v13 }
 0x63b   :  { %2521 = vmatprep.subr.bf16.mxu1 %v6381_v8 }
 0x63e   :  { %2522 = vmatpush1.bf16.msra.mxu1 %v6382_v29  ;;  %v2391_v29 = vunpack.c.h.bf16 %v2388_v19  ;;  %v2392_v19 = vunpack.c.h.bf16 %v2389_v31 }
 0x63f   :  { %2523 = vmatprep.subr.bf16.mxu1 %v6383_v47 }
 0x642   :  { %2524 = vmatpush1.bf16.msra.mxu1 %v6384_v27 }
 0x643   :  { %2525 = vmatprep.subr.bf16.mxu1 %v6385_v18 }
 0x646   :  { %2526 = vmatpush1.bf16.msra.mxu1 %v6386_v33 }
 0x647   :  { %2643 = vmatprep.subr.bf16.mxu1 %v5487_v25 }
 0x69c   :  { %v2299_v44 = vpop.f32.mrb[40].mxu1  ;;  %v2340_v17 = vpop.f32.mrb[56].mxu0 }
 0x69d   :  { %v2398_v1 = vadd.f32 %v2390_v36, %v2299_v44  ;;  %v2301_v13 = vpop.f32.mrb[41].mxu1  ;;  %v2342_v8 = vpop.f32.mrb[57].mxu0  ;;  %v2412_v36 = vadd.f32 %v6388_v60, %v2340_v17  ;;  %v2393_v44 = vld [vmem:[#allocation2 + $0x54] sm:$0xff] }
 0x69e   :  { %v2303_v52 = vpop.f32.mrb[42].mxu1  ;;  %v2344_v47 = vpop.f32.mrb[58].mxu0  ;;  %v2405_v18 = vadd.f32 %v2391_v29, %v2301_v13 }
 0x69f   :  { %v3253_v23 = vmul.f32 -1.442695, %v2398_v1  ;;  %v2304_v27 = vpop.f32.mrb[43].mxu1  ;;  %v2345_v38 = vpop.f32.mrb[59].mxu0  ;;  %v2395_v1 = vunpack.c.l.bf16 %v2393_v44 }
 0x6a0   :  { %v3254_v33 = vmul.f32 -1.442695, %v2405_v18 }
 0x6a1   :  { %3632 = vpow2.f32 %v3253_v23  ;;  %v2420_v38 = vadd.f32 %v2395_v1, %v2342_v8 }
 0x6a2   :  { %3634 = vpow2.f32 %v3254_v33 }
 0x6a3   :  { %v3255_v23 = vmul.f32 -1.442695, %v2420_v38 }
 0x6ab   :  { %v3633_v49 = vpop.eup %3632 }
 0x6ac   :  { %v2402_v63 = vadd.f32 1.0, %v3633_v49  ;;  %v3635_v25 = vpop.eup %3634 }
 0x6ad   :  { %v2409_v50 = vadd.f32 1.0, %v3635_v25 }
 0x6ae   :  { %3636 = vrcp.f32 %v2402_v63 }
 0x6af   :  { %3638 = vrcp.f32 %v2409_v50 }
 0x6b8   :  { %v3637_v56 = vpop.eup %3636 }
 0x6b9   :  { %v2413_v52 = vmul.f32 %v3637_v56, %v2412_v36  ;;  %v3639_v13 = vpop.eup %3638  ;;  %v2396_v56 = vunpack.c.h.bf16 %v2393_v44 }
 0x6ba   :  { %v2416_v29 = vsub.f32 1.0, %v3639_v13  ;;  %v2418_v25 = vmul.f32 %v3639_v13, %v5286_v37  ;;  %v2397_v13 = vunpack.c.l.bf16 %v2389_v31 }
 0x6bb   :  { %v2414_v47 = vadd.f32 %v2413_v52, %v2392_v19 }
 0x6bd   :  { %3640 = vtanh.f32 %v2414_v47 }
 0x6be   :  { %3642 = vpow2.f32 %v3255_v23 }
 0x6c7   :  { %v3641_v49 = vpop.eup %3640 }
 0x6c8   :  { %v2417_v63 = vmul.f32 %v3641_v49, %v2416_v29  ;;  %v3643_v18 = vpop.eup %3642 }
 0x6c9   :  { %v2424_v33 = vadd.f32 1.0, %v3643_v18 }
 0x6ca   :  { %v2419_v27 = vadd.f32 %v2418_v25, %v2417_v63 }
 0x6cb   :  { %3644 = vrcp.f32 %v2424_v33 }
 0x6cc   :  { %v2442_v17 = vmul.f32 %v5279_v21, %v2419_v27  ;;  %v2446_v18 = vsub.f32 %v2419_v27, %v5286_v37 }
 0x6ce   :  { %2443 = vst [vmem:[#allocation14 + $0x40] sm:$0xff] %v2442_v17 }
 0x6d5   :  { %v3645_v1 = vpop.eup %3644 }
 0x6dc   :  { %v2381_v50 = vpop.f32.mrb[44].mxu1 }
 0x6dd   :  { %v2427_v36 = vadd.f32 %v2396_v56, %v2381_v50  ;;  %v2383_v8 = vpop.f32.mrb[45].mxu1 }
 0x6de   :  { %v2434_v19 = vadd.f32 %v5274_v35, %v2383_v8  ;;  %v2385_v52 = vpop.f32.mrb[46].mxu1 }
 0x6df   :  { %v3256_v47 = vmul.f32 -1.442695, %v2427_v36  ;;  %v2386_v38 = vpop.f32.mrb[47].mxu1  ;;  %v2447_v36 = vmul.f32 %v5279_v21, %v2446_v18  ;;  %v5517_v21 = vld [vmem:[#allocation11 + $0x44] ss:$24 sps:$4 sm:$0xff]  }
 0x6e0   :  { %v2435_v23 = vmul.f32 %v3645_v1, %v2434_v19  ;;  %v5530_v38 = vld [vmem:[#allocation11 + $0x70] ss:$24 sps:$4 sm:$0xff]   ;;  %v5565_v18 = vld [vmem:[#allocation11 + $0x164] ss:$24 sps:$4 sm:$0xff]  }
 0x6e1   :  { %3646 = vpow2.f32 %v3256_v47  ;;  %v5501_v52 = vadd.f32 %v2447_v36, %v5286_v37  ;;  %v5522_v37 = vld [vmem:[#allocation11 + $0x40] ss:$24 sps:$4 sm:$0xff]   ;;  %v5581_v36 = vld [vmem:[#allocation11 + $0x1c4] ss:$24 sps:$4 sm:$0xff]  }
 0x6e2   :  { %v2436_v63 = vadd.f32 %v2435_v23, %v2397_v13  ;;  %v5533_v23 = vld [vmem:[#allocation11 + $0xa4] ss:$24 sps:$4 sm:$0xff]   ;;  %v5538_v13 = vld [vmem:[#allocation11 + $0xa0] ss:$24 sps:$4 sm:$0xff]  }
 0x6e3   :  { %v5510_v47 = vpack.c.bf16 %v5501_v52, %v5501_v52 }
 0x6eb   :  { %v3647_v29 = vpop.eup %3646 }
 0x6ec   :  { %v2431_v49 = vadd.f32 1.0, %v3647_v29  ;;  %v5541_v29 = vld [vmem:[#allocation11 + $0xd4] ss:$24 sps:$4 sm:$0xff]  }
 0x6ee   :  { %3648 = vrcp.f32 %v2431_v49  ;;  %v5546_v49 = vld [vmem:[#allocation11 + $0xd0] ss:$24 sps:$4 sm:$0xff]  }
 0x6ef   :  { %3650 = vtanh.f32 %v2436_v63  ;;  %v5549_v63 = vld [vmem:[#allocation11 + $0x104] ss:$24 sps:$4 sm:$0xff]  }
 0x6f8   :  { %v3649_v25 = vpop.eup %3648 }
 0x6f9   :  { %v2438_v17 = vsub.f32 1.0, %v3649_v25  ;;  %v3651_v44 = vpop.eup %3650  ;;  %v2440_v33 = vmul.f32 %v3649_v25, %v5289_v46  ;;  %v5554_v25 = vld [vmem:[#allocation11 + $0x100] ss:$24 sps:$4 sm:$0xff]  }
 0x6fb   :  { %v2439_v56 = vmul.f32 %v3651_v44, %v2438_v17  ;;  %v5557_v17 = vld [vmem:[#allocation11 + $0x134] ss:$24 sps:$4 sm:$0xff]   ;;  %v5562_v44 = vld [vmem:[#allocation11 + $0x130] ss:$24 sps:$4 sm:$0xff]  }
 0x6fd   :  { %v2441_v50 = vadd.f32 %v2440_v33, %v2439_v56  ;;  %v5570_v33 = vld [vmem:[#allocation11 + $0x160] ss:$24 sps:$4 sm:$0xff]   ;;  %v5573_v56 = vld [vmem:[#allocation11 + $0x194] ss:$24 sps:$4 sm:$0xff]  }
 0x6ff   :  { %v2444_v8 = vmul.f32 %v5271_v7, %v2441_v50  ;;  %v2449_v31 = vsub.f32 %v2441_v50, %v5289_v46  ;;  %v5578_v50 = vld [vmem:[#allocation11 + $0x190] ss:$24 sps:$4 sm:$0xff]  }
 0x701   :  { %2445 = vst [vmem:[#allocation14 + $0x38] sm:$0xff] %v2444_v8  ;;  %v2450_v19 = vmul.f32 %v5271_v7, %v2449_v31  ;;  %v5514_v7 = vld [vmem:[#allocation11 + $0x10] ss:$24 sps:$4 sm:$0xff]   ;;  %v5586_v8 = vld [vmem:[#allocation11 + $0x1c0] ss:$24 sps:$4 sm:$0xff]  }
 0x702   :  { %6389 = vst [vmem:[#allocation32_spill] sm:$0xff] %v5586_v8  ;;  %v5589_v31 = vld [vmem:[#allocation11 + $0x1f4] ss:$24 sps:$4 sm:$0xff]  }
 0x703   :  { %v5504_v1 = vadd.f32 %v2450_v19, %v5289_v46  ;;  %v5525_v46 = vld [vmem:[#allocation11 + $0x74] ss:$24 sps:$4 sm:$0xff]   ;;  %6390 = vst [vmem:[#allocation34_spill] sm:$0xff] %v5589_v31  ;;  %v5594_v19 = vld [vmem:[#allocation11 + $0x1f0] ss:$24 sps:$4 sm:$0xff]  }
 0x704   :  { %6391 = vst [vmem:[#allocation36_spill] sm:$0xff] %v5594_v19 }
 0x705   :  { %v2453_v27 = vpack.c.bf16 %v5504_v1, %v5504_v1 }
 0x707   :  { %2486 = vmatprep.mubr.bf16.mxu0 %v2453_v27  ;;  %2527 = vmatprep.mubr.bf16.mxu1 %v2453_v27 }
 0x708   :  { %2487 = vmatmul.mubr.bf16.vlgmr.msra.gmra.mrb[60].mxu0 %v5510_v47  ;;  %2528 = vmatmul.mubr.bf16.vlgmr.msra.gmra.mrb[48].mxu1 %v5510_v47 }
 0x709   :  { %2537 = vmatpush1.bf16.msra.mxu0 %v5514_v7  ;;  %2568 = vmatprep.mubr.bf16.mxu0 %v2453_v27  ;;  %v5597_v27 = vld [vmem:[#allocation11 + $0x224] ss:$24 sps:$4 sm:$0xff]  }
 0x70a   :  { %2538 = vmatprep.subr.bf16.mxu0 %v5517_v21  ;;  %2644 = vmatpush1.bf16.msra.mxu1 %v5301_v43  ;;  %6392 = vst [vmem:[#allocation38_spill] sm:$0xff] %v5597_v27 }
 0x70b   :  { %2645 = vmatprep.subr.bf16.mxu1 %v5304_v11 }
 0x70d   :  { %2539 = vmatpush1.bf16.msra.mxu0 %v5522_v37 }
 0x70e   :  { %2540 = vmatprep.subr.bf16.mxu0 %v5525_v46  ;;  %2646 = vmatpush1.bf16.msra.mxu1 %v5309_v45 }
 0x70f   :  { %2647 = vmatprep.subr.bf16.mxu1 %v5312_v58 }
 0x711   :  { %2541 = vmatpush1.bf16.msra.mxu0 %v5530_v38 }
 0x712   :  { %2542 = vmatprep.subr.bf16.mxu0 %v5533_v23  ;;  %2648 = vmatpush1.bf16.msra.mxu1 %v5317_v14 }
 0x713   :  { %2649 = vmatprep.subr.bf16.mxu1 %v5320_v40 }
 0x715   :  { %2543 = vmatpush1.bf16.msra.mxu0 %v5538_v13 }
 0x716   :  { %2544 = vmatprep.subr.bf16.mxu0 %v5541_v29  ;;  %2650 = vmatpush1.bf16.msra.mxu1 %v5325_v39 }
 0x717   :  { %2651 = vmatprep.subr.bf16.mxu1 %v5328_v48 }
 0x719   :  { %2545 = vmatpush1.bf16.msra.mxu0 %v5546_v49 }
 0x71a   :  { %2546 = vmatprep.subr.bf16.mxu0 %v5549_v63  ;;  %2652 = vmatpush1.bf16.msra.mxu1 %v5333_v55 }
 0x71b   :  { %2653 = vmatprep.subr.bf16.mxu1 %v5336_v4 }
 0x71d   :  { %2547 = vmatpush1.bf16.msra.mxu0 %v5554_v25 }
 0x71e   :  { %2548 = vmatprep.subr.bf16.mxu0 %v5557_v17  ;;  %2654 = vmatpush1.bf16.msra.mxu1 %v5341_v32 }
 0x71f   :  { %2655 = vmatprep.subr.bf16.mxu1 %v5344_v53 }
 0x721   :  { %2549 = vmatpush1.bf16.msra.mxu0 %v5562_v44 }
 0x722   :  { %2550 = vmatprep.subr.bf16.mxu0 %v5565_v18  ;;  %2656 = vmatpush1.bf16.msra.mxu1 %v5349_v57 }
 0x723   :  { %2657 = vmatprep.subr.bf16.mxu1 %v5352_v61 }
 0x725   :  { %2551 = vmatpush1.bf16.msra.mxu0 %v5570_v33 }
 0x726   :  { %2552 = vmatprep.subr.bf16.mxu0 %v5573_v56  ;;  %2658 = vmatpush1.bf16.msra.mxu1 %v5357_v51 }
 0x727   :  { %2659 = vmatprep.subr.bf16.mxu1 %v5360_v59 }
 0x729   :  { %2553 = vmatpush1.bf16.msra.mxu0 %v5578_v50 }
 0x72a   :  { %2554 = vmatprep.subr.bf16.mxu0 %v5581_v36  ;;  %2660 = vmatpush1.bf16.msra.mxu1 %v5365_v3 }
 0x72b   :  { %2661 = vmatprep.subr.bf16.mxu1 %v5368_v5 }
 0x72d   :  { %2555 = vmatpush1.bf16.msra.mxu0 %v5586_v8  ;;  %v5602_v8 = vld [vmem:[#allocation11 + $0x220] ss:$24 sps:$4 sm:$0xff]  }
 0x72e   :  { %2556 = vmatprep.subr.bf16.mxu0 %v5589_v31  ;;  %2662 = vmatpush1.bf16.msra.mxu1 %v5373_v2  ;;  %6393 = vst [vmem:[#allocation40_spill] sm:$0xff] %v5602_v8  ;;  %v5605_v31 = vld [vmem:[#allocation11 + $0x254] ss:$24 sps:$4 sm:$0xff]  }
 0x72f   :  { %2663 = vmatprep.subr.bf16.mxu1 %v5376_v6  ;;  %6394 = vst [vmem:[#allocation41_spill] sm:$0xff] %v5605_v31 }
 0x731   :  { %2557 = vmatpush1.bf16.msra.mxu0 %v5594_v19  ;;  %v5610_v19 = vld [vmem:[#allocation11 + $0x250] ss:$24 sps:$4 sm:$0xff]  }
 0x732   :  { %2558 = vmatprep.subr.bf16.mxu0 %v5597_v27  ;;  %2664 = vmatpush1.bf16.msra.mxu1 %v5381_v26  ;;  %6395 = vst [vmem:[#allocation43_spill] sm:$0xff] %v5610_v19  ;;  %v5613_v27 = vld [vmem:[#allocation11 + $0x284] ss:$24 sps:$4 sm:$0xff]  }
 0x733   :  { %2665 = vmatprep.subr.bf16.mxu1 %v5384_v54  ;;  %6396 = vst [vmem:[#allocation45_spill] sm:$0xff] %v5613_v27 }
 0x735   :  { %2559 = vmatpush1.bf16.msra.mxu0 %v5602_v8  ;;  %v5618_v8 = vld [vmem:[#allocation11 + $0x280] ss:$24 sps:$4 sm:$0xff]  }
 0x736   :  { %2560 = vmatprep.subr.bf16.mxu0 %v5605_v31  ;;  %2666 = vmatpush1.bf16.msra.mxu1 %v5389_v12  ;;  %6397 = vst [vmem:[#allocation46_spill] sm:$0xff] %v5618_v8  ;;  %v5621_v31 = vld [vmem:[#allocation11 + $0x2b4] ss:$24 sps:$4 sm:$0xff]  }
 0x737   :  { %2667 = vmatprep.subr.bf16.mxu1 %v5392_v15  ;;  %6398 = vst [vmem:[#allocation47_spill] sm:$0xff] %v5621_v31  ;;  %v2578_v12 = vld [vmem:[#allocation2 + $0x44] ss:$60 sps:$4 sm:$0xff]  }
 0x739   :  { %2561 = vmatpush1.bf16.msra.mxu0 %v5610_v19  ;;  %v5626_v19 = vld [vmem:[#allocation11 + $0x2b0] ss:$24 sps:$4 sm:$0xff]  }
 0x73a   :  { %2562 = vmatprep.subr.bf16.mxu0 %v5613_v27  ;;  %2668 = vmatpush1.bf16.msra.mxu1 %v5397_v22  ;;  %6399 = vst [vmem:[#allocation48_spill] sm:$0xff] %v5626_v19  ;;  %v5629_v27 = vld [vmem:[#allocation11 + $0x2e4] ss:$24 sps:$4 sm:$0xff]  }
 0x73b   :  { %2669 = vmatprep.subr.bf16.mxu1 %v5400_v24  ;;  %6400 = vst [vmem:[#allocation49_spill] sm:$0xff] %v5629_v27  ;;  %v5633_v24 = vld [vmem:[#allocation11 + $0x2d4] ss:$24 sps:$4 sm:$0xff]  }
 0x73c   :  { %6401 = vst [vmem:[#allocation50_spill] sm:$0xff] %v5633_v24 }
 0x73d   :  { %2563 = vmatpush1.bf16.msra.mxu0 %v5618_v8  ;;  %v5636_v8 = vld [vmem:[#allocation11 + $0x2e0] ss:$24 sps:$4 sm:$0xff]  }
 0x73e   :  { %2564 = vmatprep.subr.bf16.mxu0 %v5621_v31  ;;  %2670 = vmatpush1.bf16.msra.mxu1 %v5405_v16  ;;  %6402 = vst [vmem:[#allocation51_spill] sm:$0xff] %v5636_v8 }
 0x73f   :  { %2671 = vmatprep.subr.bf16.mxu1 %v5408_v30  ;;  %v5640_v30 = vld [vmem:[#allocation11 + $0x2d0] ss:$24 sps:$4 sm:$0xff]  }
 0x740   :  { %6403 = vst [vmem:[#allocation71_spill] sm:$0xff] %v5640_v30 }
 0x741   :  { %2565 = vmatpush1.bf16.msra.mxu0 %v5626_v19  ;;  %v5643_v19 = vld [vmem:[#allocation11 + $0x14] ss:$24 sps:$4 sm:$0xff]  }
 0x742   :  { %2566 = vmatprep.subr.bf16.mxu0 %v5629_v27  ;;  %2672 = vmatpush1.bf16.msra.mxu1 %v5413_v34  ;;  %6404 = vst [vmem:[#allocation72_spill] sm:$0xff] %v5643_v19 }
 0x743   :  { %2673 = vmatprep.subr.bf16.mxu1 %v5633_v24 }
 0x745   :  { %2567 = vmatpush1.bf16.msra.mxu0 %v5636_v8 }
 0x746   :  { %2684 = vmatprep.subr.bf16.mxu0 %v5418_v42  ;;  %2674 = vmatpush1.bf16.msra.mxu1 %v5640_v30  ;;  %v6405_v30 = vld [vmem:[#allocation65_spill] sm:$0xff]  ;;  %v6406_v42 = vld [vmem:[#allocation66_spill] sm:$0xff] }
 0x747   :  { %2725 = vmatprep.subr.bf16.mxu1 %v5643_v19  ;;  %v6407_v19 = vld [vmem:[#allocation26_spill] sm:$0xff] }
 0x748   :  { %2569 = vmatmul.mubr.bf16.vlgmr.msra.gmra.mrb[64].mxu0 %v5510_v47  ;;  %v6408_v47 = vld [vmem:[#allocation67_spill] sm:$0xff] }
 0x749   :  { %2685 = vmatpush1.bf16.msra.mxu0 %v5424_v10  ;;  %v6409_v10 = vld [vmem:[#allocation68_spill] sm:$0xff] }
 0x74a   :  { %2686 = vmatprep.subr.bf16.mxu0 %v5427_v28  ;;  %v6410_v28 = vld [vmem:[#allocation27_spill] sm:$0xff] }
 0x74d   :  { %2687 = vmatpush1.bf16.msra.mxu0 %v5430_v20  ;;  %v6411_v20 = vld [vmem:[#allocation69_spill] sm:$0xff] }
 0x74e   :  { %2688 = vmatprep.subr.bf16.mxu0 %v5433_v0  ;;  %v6412_v0 = vld [vmem:[#allocation70_spill] sm:$0xff] }
 0x751   :  { %2689 = vmatpush1.bf16.msra.mxu0 %v5436_v62  ;;  %v6413_v62 = vld [vmem:[#allocation28_spill] sm:$0xff] }
 0x752   :  { %2690 = vmatprep.subr.bf16.mxu0 %v5439_v9  ;;  %v5663_v9 = vld [vmem:[#allocation11 + $0x188] ss:$24 sps:$4 sm:$0xff]  }
 0x753   :  { %6414 = vst [vmem:[#allocation73_spill] sm:$0xff] %v5663_v9 }
 0x755   :  { %2691 = vmatpush1.bf16.msra.mxu0 %v5442_v41 }
 0x756   :  { %2692 = vmatprep.subr.bf16.mxu0 %v6405_v30  ;;  %v5666_v30 = vld [vmem:[#allocation11 + $0x1bc] ss:$24 sps:$4 sm:$0xff]  }
 0x757   :  { %6415 = vst [vmem:[#allocation74_spill] sm:$0xff] %v5666_v30 }
 0x759   :  { %2693 = vmatpush1.bf16.msra.mxu0 %v6406_v42 }
 0x75a   :  { %2694 = vmatprep.subr.bf16.mxu0 %v6407_v19  ;;  %v5669_v19 = vld [vmem:[#allocation11 + $0x1b8] ss:$24 sps:$4 sm:$0xff]  }
 0x75b   :  { %6416 = vst [vmem:[#allocation75_spill] sm:$0xff] %v5669_v19 }
 0x75d   :  { %2695 = vmatpush1.bf16.msra.mxu0 %v6408_v47 }
 0x75e   :  { %2696 = vmatprep.subr.bf16.mxu0 %v6409_v10  ;;  %v5672_v10 = vld [vmem:[#allocation11 + $0x1ec] ss:$24 sps:$4 sm:$0xff]  }
 0x75f   :  { %6417 = vst [vmem:[#allocation76_spill] sm:$0xff] %v5672_v10 }
 0x761   :  { %2697 = vmatpush1.bf16.msra.mxu0 %v6410_v28 }
 0x762   :  { %2698 = vmatprep.subr.bf16.mxu0 %v6411_v20  ;;  %v5675_v20 = vld [vmem:[#allocation11 + $0x1e8] ss:$24 sps:$4 sm:$0xff]  }
 0x763   :  { %6418 = vst [vmem:[#allocation52_spill] sm:$0xff] %v5675_v20 }
 0x765   :  { %2699 = vmatpush1.bf16.msra.mxu0 %v6412_v0  ;;  %v2577_v0 = vld [vmem:[#allocation2 + $0x78] sm:$0xff] }
 0x766   :  { %2700 = vmatprep.subr.bf16.mxu0 %v6413_v62  ;;  %v5678_v62 = vld [vmem:[#allocation11 + $0x21c] ss:$24 sps:$4 sm:$0xff]   ;;  %v2580_v8 = vunpack.c.h.bf16 %v2577_v0 }
 0x767   :  { %6419 = vst [vmem:[#allocation77_spill] sm:$0xff] %v5678_v62 }
 0x769   :  { %2701 = vmatpush1.bf16.msra.mxu0 %v5663_v9  ;;  %v5681_v9 = vld [vmem:[#allocation11 + $0x218] ss:$24 sps:$4 sm:$0xff]  }
 0x76a   :  { %2702 = vmatprep.subr.bf16.mxu0 %v5666_v30  ;;  %6420 = vst [vmem:[#allocation78_spill] sm:$0xff] %v5681_v9  ;;  %v5684_v30 = vld [vmem:[#allocation11 + $0x24c] ss:$24 sps:$4 sm:$0xff]  }
 0x76b   :  { %6421 = vst [vmem:[#allocation79_spill] sm:$0xff] %v5684_v30 }
 0x76d   :  { %2703 = vmatpush1.bf16.msra.mxu0 %v5669_v19  ;;  %v5687_v19 = vld [vmem:[#allocation11 + $0x248] ss:$24 sps:$4 sm:$0xff]  }
 0x76e   :  { %2704 = vmatprep.subr.bf16.mxu0 %v5672_v10  ;;  %6422 = vst [vmem:[#allocation80_spill] sm:$0xff] %v5687_v19  ;;  %v5690_v10 = vld [vmem:[#allocation11 + $0x27c] ss:$24 sps:$4 sm:$0xff]  }
 0x76f   :  { %6423 = vst [vmem:[#allocation81_spill] sm:$0xff] %v5690_v10 }
 0x771   :  { %2705 = vmatpush1.bf16.msra.mxu0 %v5675_v20  ;;  %v5693_v20 = vld [vmem:[#allocation11 + $0x278] ss:$24 sps:$4 sm:$0xff]  }
 0x772   :  { %2706 = vmatprep.subr.bf16.mxu0 %v5678_v62  ;;  %6424 = vst [vmem:[#allocation82_spill] sm:$0xff] %v5693_v20  ;;  %v5696_v62 = vld [vmem:[#allocation11 + $0x2ac] ss:$24 sps:$4 sm:$0xff]  }
 0x773   :  { %6425 = vst [vmem:[#allocation83_spill] sm:$0xff] %v5696_v62 }
 0x775   :  { %2707 = vmatpush1.bf16.msra.mxu0 %v5681_v9  ;;  %v5699_v9 = vld [vmem:[#allocation11 + $0x2a8] ss:$24 sps:$4 sm:$0xff]  }
 0x776   :  { %2708 = vmatprep.subr.bf16.mxu0 %v5684_v30  ;;  %6426 = vst [vmem:[#allocation84_spill] sm:$0xff] %v5699_v9  ;;  %v5702_v30 = vld [vmem:[#allocation11 + $0x2dc] ss:$24 sps:$4 sm:$0xff]  }
 0x777   :  { %6427 = vst [vmem:[#allocation85_spill] sm:$0xff] %v5702_v30 }
 0x779   :  { %2709 = vmatpush1.bf16.msra.mxu0 %v5687_v19  ;;  %v5705_v19 = vld [vmem:[#allocation11 + $0x2d8] ss:$24 sps:$4 sm:$0xff]  }
 0x77a   :  { %2710 = vmatprep.subr.bf16.mxu0 %v5690_v10  ;;  %6428 = vst [vmem:[#allocation55_spill] sm:$0xff] %v5705_v19  ;;  %v6429_v10 = vld [vmem:[#allocation30_spill] sm:$0xff] }
 0x77d   :  { %2711 = vmatpush1.bf16.msra.mxu0 %v5693_v20  ;;  %v2579_v20 = vunpack.c.l.bf16 %v2577_v0  ;;  %v2581_v0 = vunpack.c.h.bf16 %v2578_v12 }
 0x77e   :  { %2712 = vmatprep.subr.bf16.mxu0 %v5696_v62 }
 0x781   :  { %2713 = vmatpush1.bf16.msra.mxu0 %v5699_v9 }
 0x782   :  { %2714 = vmatprep.subr.bf16.mxu0 %v5702_v30 }
 0x785   :  { %2715 = vmatpush1.bf16.msra.mxu0 %v5705_v19 }
 0x786   :  { %2832 = vmatprep.subr.bf16.mxu0 %v6429_v10 }
 0x7db   :  { %v2488_v28 = vpop.f32.mrb[60].mxu0  ;;  %v2529_v47 = vpop.f32.mrb[48].mxu1 }
 0x7dc   :  { %v2587_v42 = vadd.f32 %v2579_v20, %v2488_v28  ;;  %v2490_v62 = vpop.f32.mrb[61].mxu0  ;;  %v2531_v41 = vpop.f32.mrb[49].mxu1  ;;  %v2601_v28 = vadd.f32 %v6388_v60, %v2529_v47  ;;  %v2582_v20 = vld [vmem:[#allocation2 + $0x3c] sm:$0xff] }
 0x7dd   :  { %v2492_v24 = vpop.f32.mrb[62].mxu0  ;;  %v2533_v9 = vpop.f32.mrb[50].mxu1  ;;  %v2594_v30 = vadd.f32 %v2580_v8, %v2490_v62 }
 0x7de   :  { %v3257_v34 = vmul.f32 -1.442695, %v2587_v42  ;;  %v2493_v27 = vpop.f32.mrb[63].mxu0  ;;  %v2534_v16 = vpop.f32.mrb[51].mxu1  ;;  %v2584_v42 = vunpack.c.l.bf16 %v2582_v20 }
 0x7df   :  { %v3258_v31 = vmul.f32 -1.442695, %v2594_v30  ;;  %v6430_v27 = vld [vmem:[#allocation29_spill] sm:$0xff] }
 0x7e0   :  { %3652 = vpow2.f32 %v3257_v34  ;;  %v2609_v16 = vadd.f32 %v2584_v42, %v2531_v41 }
 0x7e1   :  { %3654 = vpow2.f32 %v3258_v31 }
 0x7e2   :  { %v3259_v34 = vmul.f32 -1.442695, %v2609_v16 }
 0x7ea   :  { %v3653_v19 = vpop.eup %3652 }
 0x7eb   :  { %v2591_v22 = vadd.f32 1.0, %v3653_v19  ;;  %v3655_v10 = vpop.eup %3654 }
 0x7ec   :  { %v2598_v15 = vadd.f32 1.0, %v3655_v10 }
 0x7ed   :  { %3656 = vrcp.f32 %v2591_v22 }
 0x7ee   :  { %3658 = vrcp.f32 %v2598_v15 }
 0x7f7   :  { %v3657_v54 = vpop.eup %3656 }
 0x7f8   :  { %v2602_v24 = vmul.f32 %v3657_v54, %v2601_v28  ;;  %v3659_v30 = vpop.eup %3658  ;;  %v2585_v54 = vunpack.c.h.bf16 %v2582_v20 }
 0x7f9   :  { %v2605_v62 = vsub.f32 1.0, %v3659_v30  ;;  %v2607_v31 = vmul.f32 %v3659_v30, %v5501_v52  ;;  %v2586_v30 = vunpack.c.l.bf16 %v2578_v12 }
 0x7fa   :  { %v2603_v9 = vadd.f32 %v2602_v24, %v2581_v0 }
 0x7fc   :  { %3660 = vtanh.f32 %v2603_v9 }
 0x7fd   :  { %3662 = vpow2.f32 %v3259_v34 }
 0x806   :  { %v3661_v8 = vpop.eup %3660 }
 0x807   :  { %v2606_v22 = vmul.f32 %v3661_v8, %v2605_v62  ;;  %v3663_v47 = vpop.eup %3662 }
 0x808   :  { %v2613_v10 = vadd.f32 1.0, %v3663_v47 }
 0x809   :  { %v2608_v19 = vadd.f32 %v2607_v31, %v2606_v22 }
 0x80a   :  { %3664 = vrcp.f32 %v2613_v10 }
 0x80b   :  { %v2631_v60 = vmul.f32 %v6430_v27, %v2608_v19  ;;  %v2635_v47 = vsub.f32 %v2608_v19, %v5501_v52 }
 0x80d   :  { %2632 = vst [vmem:[#allocation14 + $0x50] sm:$0xff] %v2631_v60 }
 0x814   :  { %v3665_v42 = vpop.eup %3664 }
 0x81b   :  { %v2570_v15 = vpop.f32.mrb[64].mxu0 }
 0x81c   :  { %v2616_v28 = vadd.f32 %v2585_v54, %v2570_v15  ;;  %v2572_v41 = vpop.f32.mrb[65].mxu0  ;;  %v2636_v15 = vmul.f32 %v6430_v27, %v2635_v47  ;;  %v6455_v27 = vld [vmem:[#allocation71_spill] sm:$0xff]  ;;  %v6465_v47 = vld [vmem:[#allocation66_spill] sm:$0xff] }
 0x81d   :  { %v2623_v0 = vadd.f32 %v5274_v35, %v2572_v41  ;;  %v2574_v24 = vpop.f32.mrb[66].mxu0 }
 0x81e   :  { %v3260_v9 = vmul.f32 -1.442695, %v2616_v28  ;;  %v2575_v16 = vpop.f32.mrb[67].mxu0  ;;  %v6431_v28 = vld [vmem:[#allocation24_spill] sm:$0xff]  ;;  %v5720_v24 = vadd.f32 %v2636_v15, %v5501_v52  ;;  %v6453_v52 = vld [vmem:[#allocation51_spill] sm:$0xff] }
 0x81f   :  { %v2624_v34 = vmul.f32 %v3665_v42, %v2623_v0  ;;  %v6456_v16 = vld [vmem:[#allocation72_spill] sm:$0xff]  ;;  %v6469_v15 = vld [vmem:[#allocation27_spill] sm:$0xff] }
 0x820   :  { %3666 = vpow2.f32 %v3260_v9  ;;  %v5729_v9 = vpack.c.bf16 %v5720_v24, %v5720_v24 }
 0x821   :  { %v2625_v22 = vadd.f32 %v2624_v34, %v2586_v30  ;;  %v6457_v34 = vld [vmem:[#allocation62_spill] sm:$0xff] }
 0x822   :  { %v6458_v30 = vld [vmem:[#allocation42_spill] sm:$0xff] }
 0x82a   :  { %v3667_v62 = vpop.eup %3666 }
 0x82b   :  { %v2620_v8 = vadd.f32 1.0, %v3667_v62  ;;  %v6459_v62 = vld [vmem:[#allocation44_spill] sm:$0xff] }
 0x82d   :  { %3668 = vrcp.f32 %v2620_v8  ;;  %v6460_v8 = vld [vmem:[#allocation63_spill] sm:$0xff] }
 0x82e   :  { %3670 = vtanh.f32 %v2625_v22  ;;  %v6461_v22 = vld [vmem:[#allocation64_spill] sm:$0xff] }
 0x837   :  { %v3669_v31 = vpop.eup %3668 }
 0x838   :  { %v2627_v60 = vsub.f32 1.0, %v3669_v31  ;;  %v3671_v20 = vpop.eup %3670  ;;  %v2629_v10 = vmul.f32 %v3669_v31, %v5504_v1  ;;  %v6462_v31 = vld [vmem:[#allocation23_spill] sm:$0xff] }
 0x83a   :  { %v2628_v35 = vmul.f32 %v3671_v20, %v2627_v60  ;;  %v6463_v60 = vld [vmem:[#allocation25_spill] sm:$0xff] }
 0x83b   :  { %v6464_v20 = vld [vmem:[#allocation65_spill] sm:$0xff] }
 0x83c   :  { %v2630_v54 = vadd.f32 %v2629_v10, %v2628_v35  ;;  %v6466_v10 = vld [vmem:[#allocation26_spill] sm:$0xff]  ;;  %v6467_v35 = vld [vmem:[#allocation67_spill] sm:$0xff] }
 0x83e   :  { %v2633_v41 = vmul.f32 %v6431_v28, %v2630_v54  ;;  %v2638_v12 = vsub.f32 %v2630_v54, %v5504_v1  ;;  %v6468_v54 = vld [vmem:[#allocation68_spill] sm:$0xff] }
 0x840   :  { %2634 = vst [vmem:[#allocation14 + $0x28] sm:$0xff] %v2633_v41  ;;  %v2639_v0 = vmul.f32 %v6431_v28, %v2638_v12  ;;  %v6470_v28 = vld [vmem:[#allocation69_spill] sm:$0xff]  ;;  %v6471_v41 = vld [vmem:[#allocation70_spill] sm:$0xff]  ;;  %v6472_v12 = vld [vmem:[#allocation28_spill] sm:$0xff] }
 0x842   :  { %v5723_v42 = vadd.f32 %v2639_v0, %v5504_v1  ;;  %v6454_v1 = vld [vmem:[#allocation61_spill] sm:$0xff] }
 0x843   :  { %v6473_v0 = vld [vmem:[#allocation73_spill] sm:$0xff] }
 0x844   :  { %v2642_v19 = vpack.c.bf16 %v5723_v42, %v5723_v42 }
 0x846   :  { %2675 = vmatprep.mubr.bf16.mxu1 %v2642_v19  ;;  %2716 = vmatprep.mubr.bf16.mxu0 %v2642_v19 }
 0x847   :  { %2676 = vmatmul.mubr.bf16.vlgmr.msra.gmra.mrb[52].mxu1 %v5729_v9  ;;  %2717 = vmatmul.mubr.bf16.vlgmr.msra.gmra.mrb[68].mxu0 %v5729_v9 }
 0x848   :  { %2726 = vmatpush1.bf16.msra.mxu1 %v5514_v7  ;;  %2757 = vmatprep.mubr.bf16.mxu1 %v2642_v19  ;;  %v6474_v19 = vld [vmem:[#allocation74_spill] sm:$0xff] }
 0x849   :  { %2727 = vmatprep.subr.bf16.mxu1 %v5517_v21  ;;  %2833 = vmatpush1.bf16.msra.mxu0 %v5301_v43  ;;  %v6432_v43 = vld [vmem:[#allocation32_spill] sm:$0xff] }
 0x84a   :  { %2834 = vmatprep.subr.bf16.mxu0 %v5304_v11  ;;  %v6433_v11 = vld [vmem:[#allocation34_spill] sm:$0xff] }
 0x84c   :  { %2728 = vmatpush1.bf16.msra.mxu1 %v5522_v37 }
 0x84d   :  { %2729 = vmatprep.subr.bf16.mxu1 %v5525_v46  ;;  %2835 = vmatpush1.bf16.msra.mxu0 %v5309_v45  ;;  %v6434_v45 = vld [vmem:[#allocation36_spill] sm:$0xff] }
 0x84e   :  { %2836 = vmatprep.subr.bf16.mxu0 %v5312_v58  ;;  %v6435_v58 = vld [vmem:[#allocation38_spill] sm:$0xff] }
 0x850   :  { %2730 = vmatpush1.bf16.msra.mxu1 %v5530_v38 }
 0x851   :  { %2731 = vmatprep.subr.bf16.mxu1 %v5533_v23  ;;  %2837 = vmatpush1.bf16.msra.mxu0 %v5317_v14  ;;  %v6436_v14 = vld [vmem:[#allocation56_spill] sm:$0xff] }
 0x852   :  { %2838 = vmatprep.subr.bf16.mxu0 %v5320_v40  ;;  %v6437_v40 = vld [vmem:[#allocation40_spill] sm:$0xff] }
 0x854   :  { %2732 = vmatpush1.bf16.msra.mxu1 %v5538_v13 }
 0x855   :  { %2733 = vmatprep.subr.bf16.mxu1 %v5541_v29  ;;  %2839 = vmatpush1.bf16.msra.mxu0 %v5325_v39  ;;  %v6438_v39 = vld [vmem:[#allocation41_spill] sm:$0xff] }
 0x856   :  { %2840 = vmatprep.subr.bf16.mxu0 %v5328_v48  ;;  %v6439_v48 = vld [vmem:[#allocation57_spill] sm:$0xff] }
 0x858   :  { %2734 = vmatpush1.bf16.msra.mxu1 %v5546_v49 }
 0x859   :  { %2735 = vmatprep.subr.bf16.mxu1 %v5549_v63  ;;  %2841 = vmatpush1.bf16.msra.mxu0 %v5333_v55  ;;  %v6440_v55 = vld [vmem:[#allocation58_spill] sm:$0xff] }
 0x85a   :  { %2842 = vmatprep.subr.bf16.mxu0 %v5336_v4  ;;  %v6441_v4 = vld [vmem:[#allocation43_spill] sm:$0xff] }
 0x85c   :  { %2736 = vmatpush1.bf16.msra.mxu1 %v5554_v25 }
 0x85d   :  { %2737 = vmatprep.subr.bf16.mxu1 %v5557_v17  ;;  %2843 = vmatpush1.bf16.msra.mxu0 %v5341_v32  ;;  %v6442_v32 = vld [vmem:[#allocation45_spill] sm:$0xff] }
 0x85e   :  { %2844 = vmatprep.subr.bf16.mxu0 %v5344_v53  ;;  %v6443_v53 = vld [vmem:[#allocation35_spill] sm:$0xff] }
 0x860   :  { %2738 = vmatpush1.bf16.msra.mxu1 %v5562_v44 }
 0x861   :  { %2739 = vmatprep.subr.bf16.mxu1 %v5565_v18  ;;  %2845 = vmatpush1.bf16.msra.mxu0 %v5349_v57  ;;  %v6444_v57 = vld [vmem:[#allocation59_spill] sm:$0xff] }
 0x862   :  { %2846 = vmatprep.subr.bf16.mxu0 %v5352_v61  ;;  %v6445_v61 = vld [vmem:[#allocation46_spill] sm:$0xff] }
 0x864   :  { %2740 = vmatpush1.bf16.msra.mxu1 %v5570_v33 }
 0x865   :  { %2741 = vmatprep.subr.bf16.mxu1 %v5573_v56  ;;  %2847 = vmatpush1.bf16.msra.mxu0 %v5357_v51  ;;  %v6446_v51 = vld [vmem:[#allocation47_spill] sm:$0xff] }
 0x866   :  { %2848 = vmatprep.subr.bf16.mxu0 %v5360_v59  ;;  %v6447_v59 = vld [vmem:[#allocation60_spill] sm:$0xff] }
 0x868   :  { %2742 = vmatpush1.bf16.msra.mxu1 %v5578_v50 }
 0x869   :  { %2743 = vmatprep.subr.bf16.mxu1 %v5581_v36  ;;  %2849 = vmatpush1.bf16.msra.mxu0 %v5365_v3  ;;  %v6448_v3 = vld [vmem:[#allocation37_spill] sm:$0xff] }
 0x86a   :  { %2850 = vmatprep.subr.bf16.mxu0 %v5368_v5  ;;  %v6449_v5 = vld [vmem:[#allocation48_spill] sm:$0xff] }
 0x86c   :  { %2744 = vmatpush1.bf16.msra.mxu1 %v6432_v43 }
 0x86d   :  { %2745 = vmatprep.subr.bf16.mxu1 %v6433_v11  ;;  %2851 = vmatpush1.bf16.msra.mxu0 %v5373_v2  ;;  %v6450_v2 = vld [vmem:[#allocation49_spill] sm:$0xff] }
 0x86e   :  { %2852 = vmatprep.subr.bf16.mxu0 %v5376_v6  ;;  %v6451_v6 = vld [vmem:[#allocation39_spill] sm:$0xff] }
 0x870   :  { %2746 = vmatpush1.bf16.msra.mxu1 %v6434_v45 }
 0x871   :  { %2747 = vmatprep.subr.bf16.mxu1 %v6435_v58  ;;  %2853 = vmatpush1.bf16.msra.mxu0 %v5381_v26  ;;  %v6452_v26 = vld [vmem:[#allocation50_spill] sm:$0xff] }
 0x872   :  { %2854 = vmatprep.subr.bf16.mxu0 %v6436_v14  ;;  %v6476_v14 = vld [vmem:[#allocation76_spill] sm:$0xff] }
 0x874   :  { %2748 = vmatpush1.bf16.msra.mxu1 %v6437_v40 }
 0x875   :  { %2749 = vmatprep.subr.bf16.mxu1 %v6438_v39  ;;  %2855 = vmatpush1.bf16.msra.mxu0 %v6439_v48  ;;  %v6477_v48 = vld [vmem:[#allocation52_spill] sm:$0xff] }
 0x876   :  { %2856 = vmatprep.subr.bf16.mxu0 %v6440_v55  ;;  %v6478_v55 = vld [vmem:[#allocation77_spill] sm:$0xff] }
 0x878   :  { %2750 = vmatpush1.bf16.msra.mxu1 %v6441_v4 }
 0x879   :  { %2751 = vmatprep.subr.bf16.mxu1 %v6442_v32  ;;  %2857 = vmatpush1.bf16.msra.mxu0 %v6443_v53  ;;  %v6479_v53 = vld [vmem:[#allocation78_spill] sm:$0xff] }
 0x87a   :  { %2858 = vmatprep.subr.bf16.mxu0 %v6444_v57  ;;  %v6480_v57 = vld [vmem:[#allocation79_spill] sm:$0xff] }
 0x87c   :  { %2752 = vmatpush1.bf16.msra.mxu1 %v6445_v61 }
 0x87d   :  { %2753 = vmatprep.subr.bf16.mxu1 %v6446_v51  ;;  %2859 = vmatpush1.bf16.msra.mxu0 %v6447_v59  ;;  %v6481_v59 = vld [vmem:[#allocation80_spill] sm:$0xff] }
 0x87e   :  { %2860 = vmatprep.subr.bf16.mxu0 %v6448_v3  ;;  %v6482_v3 = vld [vmem:[#allocation81_spill] sm:$0xff] }
 0x880   :  { %2754 = vmatpush1.bf16.msra.mxu1 %v6449_v5 }
 0x881   :  { %2755 = vmatprep.subr.bf16.mxu1 %v6450_v2  ;;  %2861 = vmatpush1.bf16.msra.mxu0 %v6451_v6  ;;  %v6483_v6 = vld [vmem:[#allocation82_spill] sm:$0xff] }
 0x882   :  { %2862 = vmatprep.subr.bf16.mxu0 %v6452_v26  ;;  %v6484_v26 = vld [vmem:[#allocation83_spill] sm:$0xff] }
 0x884   :  { %2756 = vmatpush1.bf16.msra.mxu1 %v6453_v52 }
 0x885   :  { %2873 = vmatprep.subr.bf16.mxu1 %v6454_v1  ;;  %2863 = vmatpush1.bf16.msra.mxu0 %v6455_v27  ;;  %v6485_v1 = vld [vmem:[#allocation84_spill] sm:$0xff]  ;;  %v6486_v27 = vld [vmem:[#allocation85_spill] sm:$0xff] }
 0x886   :  { %2914 = vmatprep.subr.bf16.mxu0 %v6456_v16  ;;  %v6487_v16 = vld [vmem:[#allocation55_spill] sm:$0xff] }
 0x887   :  { %2758 = vmatmul.mubr.bf16.vlgmr.msra.gmra.mrb[56].mxu1 %v5729_v9  ;;  %v6475_v9 = vld [vmem:[#allocation75_spill] sm:$0xff] }
 0x888   :  { %2874 = vmatpush1.bf16.msra.mxu1 %v6457_v34  ;;  %v2766_v34 = vld [vmem:[#allocation2 + $0x90] sm:$0xff] }
 0x889   :  { %2875 = vmatprep.subr.bf16.mxu1 %v6458_v30  ;;  %v2768_v30 = vunpack.c.l.bf16 %v2766_v34 }
 0x88c   :  { %2876 = vmatpush1.bf16.msra.mxu1 %v6459_v62 }
 0x88d   :  { %2877 = vmatprep.subr.bf16.mxu1 %v6460_v8 }
 0x890   :  { %2878 = vmatpush1.bf16.msra.mxu1 %v6461_v22 }
 0x891   :  { %2879 = vmatprep.subr.bf16.mxu1 %v6462_v31 }
 0x894   :  { %2880 = vmatpush1.bf16.msra.mxu1 %v6463_v60 }
 0x895   :  { %2881 = vmatprep.subr.bf16.mxu1 %v6464_v20  ;;  %v2769_v20 = vunpack.c.h.bf16 %v2766_v34 }
 0x898   :  { %2882 = vmatpush1.bf16.msra.mxu1 %v6465_v47 }
 0x899   :  { %2883 = vmatprep.subr.bf16.mxu1 %v6466_v10 }
 0x89c   :  { %2884 = vmatpush1.bf16.msra.mxu1 %v6467_v35 }
 0x89d   :  { %2885 = vmatprep.subr.bf16.mxu1 %v6468_v54 }
 0x8a0   :  { %2886 = vmatpush1.bf16.msra.mxu1 %v6469_v15 }
 0x8a1   :  { %2887 = vmatprep.subr.bf16.mxu1 %v6470_v28 }
 0x8a4   :  { %2888 = vmatpush1.bf16.msra.mxu1 %v6471_v41 }
 0x8a5   :  { %2889 = vmatprep.subr.bf16.mxu1 %v6472_v12 }
 0x8a8   :  { %2890 = vmatpush1.bf16.msra.mxu1 %v6473_v0 }
 0x8a9   :  { %2891 = vmatprep.subr.bf16.mxu1 %v6474_v19 }
 0x8ac   :  { %2892 = vmatpush1.bf16.msra.mxu1 %v6475_v9 }
 0x8ad   :  { %2893 = vmatprep.subr.bf16.mxu1 %v6476_v14  ;;  %v2767_v14 = vld [vmem:[#allocation2 + $0x2c] ss:$108 sps:$4 sm:$0xff]  }
 0x8b0   :  { %2894 = vmatpush1.bf16.msra.mxu1 %v6477_v48  ;;  %v5829_v48 = vld [vmem:[#allocation12] ss:$0 sm:$0xff] }
 0x8b1   :  { %2895 = vmatprep.subr.bf16.mxu1 %v6478_v55 }
 0x8b4   :  { %2896 = vmatpush1.bf16.msra.mxu1 %v6479_v53  ;;  %v2771_v53 = vld [vmem:[#allocation2 + $0x24] sm:$0xff] }
 0x8b5   :  { %2897 = vmatprep.subr.bf16.mxu1 %v6480_v57 }
 0x8b8   :  { %2898 = vmatpush1.bf16.msra.mxu1 %v6481_v59  ;;  %v2770_v59 = vunpack.c.h.bf16 %v2767_v14 }
 0x8b9   :  { %2899 = vmatprep.subr.bf16.mxu1 %v6482_v3 }
 0x8bc   :  { %2900 = vmatpush1.bf16.msra.mxu1 %v6483_v6  ;;  %v2773_v6 = vunpack.c.l.bf16 %v2771_v53 }
 0x8bd   :  { %2901 = vmatprep.subr.bf16.mxu1 %v6484_v26 }
 0x8c0   :  { %2902 = vmatpush1.bf16.msra.mxu1 %v6485_v1 }
 0x8c1   :  { %2903 = vmatprep.subr.bf16.mxu1 %v6486_v27 }
 0x8c4   :  { %2904 = vmatpush1.bf16.msra.mxu1 %v6487_v16 }
 0x91a   :  { %v2677_v62 = vpop.f32.mrb[52].mxu1  ;;  %v2718_v8 = vpop.f32.mrb[68].mxu0 }
 0x91b   :  { %v2776_v22 = vadd.f32 %v2768_v30, %v2677_v62  ;;  %v2679_v31 = vpop.f32.mrb[53].mxu1  ;;  %v2720_v60 = vpop.f32.mrb[69].mxu0  ;;  %v2790_v55 = vadd.f32 %v5829_v48, %v2718_v8 }
 0x91c   :  { %v2681_v47 = vpop.f32.mrb[54].mxu1  ;;  %v2722_v10 = vpop.f32.mrb[70].mxu0  ;;  %v2783_v28 = vadd.f32 %v2769_v20, %v2679_v31  ;;  %v2798_v1 = vadd.f32 %v2773_v6, %v2720_v60  ;;  %v6488_v20 = vld [vmem:[#allocation54_spill] sm:$0xff] }
 0x91d   :  { %v3261_v35 = vmul.f32 -1.442695, %v2776_v22  ;;  %v2682_v54 = vpop.f32.mrb[55].mxu1  ;;  %v2723_v15 = vpop.f32.mrb[71].mxu0 }
 0x91e   :  { %v3262_v41 = vmul.f32 -1.442695, %v2783_v28  ;;  %v3263_v27 = vmul.f32 -1.442695, %v2798_v1  ;;  %v5834_v28 = vld [vmem:[#allocation12 + $0x1] ss:$0 sm:$0xff] }
 0x91f   :  { %3672 = vpow2.f32 %v3261_v35  ;;  %v2774_v35 = vunpack.c.h.bf16 %v2771_v53 }
 0x920   :  { %3674 = vpow2.f32 %v3262_v41 }
 0x929   :  { %v3673_v12 = vpop.eup %3672 }
 0x92a   :  { %v2780_v0 = vadd.f32 1.0, %v3673_v12  ;;  %v3675_v19 = vpop.eup %3674 }
 0x92b   :  { %v2787_v9 = vadd.f32 1.0, %v3675_v19 }
 0x92c   :  { %3676 = vrcp.f32 %v2780_v0 }
 0x92d   :  { %3678 = vrcp.f32 %v2787_v9 }
 0x936   :  { %v3677_v57 = vpop.eup %3676 }
 0x937   :  { %v2791_v3 = vmul.f32 %v3677_v57, %v2790_v55  ;;  %v3679_v16 = vpop.eup %3678  ;;  %v2775_v57 = vunpack.c.l.bf16 %v2767_v14 }
 0x938   :  { %v2794_v34 = vsub.f32 1.0, %v3679_v16  ;;  %v2796_v22 = vmul.f32 %v3679_v16, %v5720_v24 }
 0x939   :  { %v2792_v26 = vadd.f32 %v2791_v3, %v2770_v59 }
 0x93b   :  { %3680 = vtanh.f32 %v2792_v26 }
 0x93c   :  { %3682 = vpow2.f32 %v3263_v27 }
 0x945   :  { %v3681_v30 = vpop.eup %3680 }
 0x946   :  { %v2795_v62 = vmul.f32 %v3681_v30, %v2794_v34  ;;  %v3683_v47 = vpop.eup %3682 }
 0x947   :  { %v2802_v10 = vadd.f32 1.0, %v3683_v47 }
 0x948   :  { %v2797_v31 = vadd.f32 %v2796_v22, %v2795_v62  ;;  %v6489_v22 = vld [vmem:[#allocation53_spill] sm:$0xff] }
 0x949   :  { %3684 = vrcp.f32 %v2802_v10 }
 0x94a   :  { %v2820_v8 = vmul.f32 %v6488_v20, %v2797_v31  ;;  %v2824_v27 = vsub.f32 %v2797_v31, %v5720_v24 }
 0x94c   :  { %2821 = vst [vmem:[#allocation14 + $0x60] sm:$0xff] %v2820_v8  ;;  %v2825_v62 = vmul.f32 %v6488_v20, %v2824_v27 }
 0x94e   :  { %v5844_v10 = vadd.f32 %v2825_v62, %v5720_v24 }
 0x953   :  { %v3685_v0 = vpop.eup %3684 }
 0x95a   :  { %v2759_v54 = vpop.f32.mrb[56].mxu1 }
 0x95b   :  { %v2805_v15 = vadd.f32 %v2774_v35, %v2759_v54  ;;  %v2761_v60 = vpop.f32.mrb[57].mxu1  ;;  %v2830_v54 = vpack.c.bf16 %v5844_v10, %v5844_v10 }
 0x95c   :  { %v2812_v41 = vadd.f32 %v5834_v28, %v2761_v60  ;;  %v2763_v12 = vpop.f32.mrb[58].mxu1  ;;  %v6490_v60 = vld [vmem:[#allocation33_spill] sm:$0xff] }
 0x95d   :  { %v3264_v19 = vmul.f32 -1.442695, %v2805_v15  ;;  %v2764_v9 = vpop.f32.mrb[59].mxu1 }
 0x95e   :  { %v2813_v55 = vmul.f32 %v3685_v0, %v2812_v41 }
 0x95f   :  { %3686 = vpow2.f32 %v3264_v19 }
 0x960   :  { %v2814_v6 = vadd.f32 %v2813_v55, %v2775_v57 }
 0x969   :  { %v3687_v59 = vpop.eup %3686 }
 0x96a   :  { %v2809_v3 = vadd.f32 1.0, %v3687_v59 }
 0x96c   :  { %3688 = vrcp.f32 %v2809_v3 }
 0x96d   :  { %3690 = vtanh.f32 %v2814_v6 }
 0x976   :  { %v3689_v53 = vpop.eup %3688 }
 0x977   :  { %v2816_v26 = vsub.f32 1.0, %v3689_v53  ;;  %v3691_v1 = vpop.eup %3690  ;;  %v2818_v16 = vmul.f32 %v3689_v53, %v5723_v42 }
 0x979   :  { %v2817_v34 = vmul.f32 %v3691_v1, %v2816_v26 }
 0x97b   :  { %v2819_v30 = vadd.f32 %v2818_v16, %v2817_v34 }
 0x97d   :  { %v2822_v8 = vmul.f32 %v6489_v22, %v2819_v30  ;;  %v2827_v14 = vsub.f32 %v2819_v30, %v5723_v42 }
 0x97f   :  { %2823 = vst [vmem:[#allocation14 + $0x18] sm:$0xff] %v2822_v8  ;;  %v2828_v47 = vmul.f32 %v6489_v22, %v2827_v14 }
 0x981   :  { %v5847_v35 = vadd.f32 %v2828_v47, %v5723_v42  ;;  %v2956_v42 = vld [vmem:[#allocation2 + $0x14] ss:$156 sps:$4 sm:$0xff]  }
 0x982   :  { %v2964_v34 = vunpack.c.l.bf16 %v2956_v42 }
 0x983   :  { %v2831_v31 = vpack.c.bf16 %v5847_v35, %v5847_v35 }
 0x985   :  { %2864 = vmatprep.mubr.bf16.mxu0 %v2831_v31  ;;  %2905 = vmatprep.mubr.bf16.mxu1 %v2831_v31 }
 0x986   :  { %2865 = vmatmul.mubr.bf16.vlgmr.msra.gmra.mrb[72].mxu0 %v2830_v54  ;;  %2906 = vmatmul.mubr.bf16.vlgmr.msra.gmra.mrb[60].mxu1 %v2830_v54 }
 0x987   :  { %2915 = vmatpush1.bf16.msra.mxu0 %v5514_v7  ;;  %2946 = vmatprep.mubr.bf16.mxu0 %v2831_v31  ;;  %v2955_v7 = vld [vmem:[#allocation2 + $0xa8] sm:$0xff] }
 0x988   :  { %2916 = vmatprep.subr.bf16.mxu0 %v5517_v21  ;;  %v2957_v21 = vunpack.c.l.bf16 %v2955_v7 }
 0x98b   :  { %2917 = vmatpush1.bf16.msra.mxu0 %v5522_v37 }
 0x98c   :  { %2918 = vmatprep.subr.bf16.mxu0 %v5525_v46 }
 0x98f   :  { %2919 = vmatpush1.bf16.msra.mxu0 %v5530_v38 }
 0x990   :  { %2920 = vmatprep.subr.bf16.mxu0 %v5533_v23 }
 0x993   :  { %2921 = vmatpush1.bf16.msra.mxu0 %v5538_v13 }
 0x994   :  { %2922 = vmatprep.subr.bf16.mxu0 %v5541_v29  ;;  %v2958_v29 = vunpack.c.h.bf16 %v2955_v7 }
 0x997   :  { %2923 = vmatpush1.bf16.msra.mxu0 %v5546_v49 }
 0x998   :  { %2924 = vmatprep.subr.bf16.mxu0 %v5549_v63 }
 0x99b   :  { %2925 = vmatpush1.bf16.msra.mxu0 %v5554_v25 }
 0x99c   :  { %2926 = vmatprep.subr.bf16.mxu0 %v5557_v17 }
 0x99f   :  { %2927 = vmatpush1.bf16.msra.mxu0 %v5562_v44 }
 0x9a0   :  { %2928 = vmatprep.subr.bf16.mxu0 %v5565_v18 }
 0x9a3   :  { %2929 = vmatpush1.bf16.msra.mxu0 %v5570_v33 }
 0x9a4   :  { %2930 = vmatprep.subr.bf16.mxu0 %v5573_v56 }
 0x9a7   :  { %2931 = vmatpush1.bf16.msra.mxu0 %v5578_v50 }
 0x9a8   :  { %2932 = vmatprep.subr.bf16.mxu0 %v5581_v36 }
 0x9ab   :  { %2933 = vmatpush1.bf16.msra.mxu0 %v6432_v43 }
 0x9ac   :  { %2934 = vmatprep.subr.bf16.mxu0 %v6433_v11  ;;  %v2960_v11 = vld [vmem:[#allocation2 + $0xc] sm:$0xff] }
 0x9ad   :  { %v2963_v55 = vunpack.c.h.bf16 %v2960_v11 }
 0x9af   :  { %2935 = vmatpush1.bf16.msra.mxu0 %v6434_v45 }
 0x9b0   :  { %2936 = vmatprep.subr.bf16.mxu0 %v6435_v58  ;;  %v2959_v58 = vunpack.c.h.bf16 %v2956_v42 }
 0x9b3   :  { %2937 = vmatpush1.bf16.msra.mxu0 %v6437_v40 }
 0x9b4   :  { %2938 = vmatprep.subr.bf16.mxu0 %v6438_v39  ;;  %v2962_v39 = vunpack.c.l.bf16 %v2960_v11 }
 0x9b7   :  { %2939 = vmatpush1.bf16.msra.mxu0 %v6441_v4 }
 0x9b8   :  { %2940 = vmatprep.subr.bf16.mxu0 %v6442_v32 }
 0x9bb   :  { %2941 = vmatpush1.bf16.msra.mxu0 %v6445_v61 }
 0x9bc   :  { %2942 = vmatprep.subr.bf16.mxu0 %v6446_v51 }
 0x9bf   :  { %2943 = vmatpush1.bf16.msra.mxu0 %v6449_v5 }
 0x9c0   :  { %2944 = vmatprep.subr.bf16.mxu0 %v6450_v2 }
 0x9c3   :  { %2945 = vmatpush1.bf16.msra.mxu0 %v6453_v52 }
 0x9c6   :  { %2947 = vmatmul.mubr.bf16.vlgmr.msra.gmra.mrb[76].mxu0 %v2830_v54  ;;  %v6491_v54 = vld [vmem:[#allocation31_spill] sm:$0xff] }
 0xa59   :  { %v2866_v37 = vpop.f32.mrb[72].mxu0  ;;  %v2907_v46 = vpop.f32.mrb[60].mxu1 }
 0xa5a   :  { %v2965_v38 = vadd.f32 %v2957_v21, %v2866_v37  ;;  %v2868_v23 = vpop.f32.mrb[73].mxu0  ;;  %v2909_v13 = vpop.f32.mrb[61].mxu1  ;;  %v2979_v43 = vadd.f32 %v5829_v48, %v2907_v46 }
 0xa5b   :  { %v2870_v49 = vpop.f32.mrb[74].mxu0  ;;  %v2911_v63 = vpop.f32.mrb[62].mxu1  ;;  %v2972_v18 = vadd.f32 %v2958_v29, %v2868_v23  ;;  %v2987_v32 = vadd.f32 %v2962_v39, %v2909_v13 }
 0xa5c   :  { %v3265_v25 = vmul.f32 -1.442695, %v2965_v38  ;;  %v2871_v17 = vpop.f32.mrb[75].mxu0  ;;  %v2912_v44 = vpop.f32.mrb[63].mxu1 }
 0xa5d   :  { %v3266_v33 = vmul.f32 -1.442695, %v2972_v18  ;;  %v3267_v61 = vmul.f32 -1.442695, %v2987_v32 }
 0xa5e   :  { %3692 = vpow2.f32 %v3265_v25 }
 0xa5f   :  { %3694 = vpow2.f32 %v3266_v33 }
 0xa68   :  { %v3693_v56 = vpop.eup %3692 }
 0xa69   :  { %v2969_v50 = vadd.f32 1.0, %v3693_v56  ;;  %v3695_v36 = vpop.eup %3694 }
 0xa6a   :  { %v2976_v24 = vadd.f32 1.0, %v3695_v36 }
 0xa6b   :  { %3696 = vrcp.f32 %v2969_v50 }
 0xa6c   :  { %3698 = vrcp.f32 %v2976_v24 }
 0xa75   :  { %v3697_v45 = vpop.eup %3696 }
 0xa76   :  { %v2980_v40 = vmul.f32 %v3697_v45, %v2979_v43  ;;  %v3699_v51 = vpop.eup %3698 }
 0xa77   :  { %v2983_v5 = vsub.f32 1.0, %v3699_v51  ;;  %v2985_v20 = vmul.f32 %v3699_v51, %v5844_v10 }
 0xa78   :  { %v2981_v4 = vadd.f32 %v2980_v40, %v2959_v58 }
 0xa7a   :  { %3700 = vtanh.f32 %v2981_v4 }
 0xa7b   :  { %3702 = vpow2.f32 %v3267_v61 }
 0xa84   :  { %v3701_v2 = vpop.eup %3700 }
 0xa85   :  { %v2984_v52 = vmul.f32 %v3701_v2, %v2983_v5  ;;  %v3703_v12 = vpop.eup %3702 }
 0xa86   :  { %v2991_v9 = vadd.f32 1.0, %v3703_v12 }
 0xa87   :  { %v2986_v15 = vadd.f32 %v2985_v20, %v2984_v52 }
 0xa88   :  { %3704 = vrcp.f32 %v2991_v9 }
 0xa89   :  { %v3009_v48 = vmul.f32 %v6490_v60, %v2986_v15  ;;  %v3013_v41 = vsub.f32 %v2986_v15, %v5844_v10 }
 0xa8b   :  { %3010 = vst [vmem:[#allocation14 + $0x70] sm:$0xff] %v3009_v48  ;;  %v3014_v0 = vmul.f32 %v6490_v60, %v3013_v41 }
 0xa8d   :  { %v3015_v19 = vadd.f32 %v3014_v0, %v5844_v10 }
 0xa8f   :  { %3019 = vst [vmem:[#allocation15] sm:$0xff] %v3015_v19 }
 0xa92   :  { %v3705_v26 = vpop.eup %3704 }
 0xa99   :  { %v2948_v57 = vpop.f32.mrb[76].mxu0 }
 0xa9a   :  { %v2994_v59 = vadd.f32 %v2963_v55, %v2948_v57  ;;  %v2950_v3 = vpop.f32.mrb[77].mxu0 }
 0xa9b   :  { %v3001_v6 = vadd.f32 %v5834_v28, %v2950_v3  ;;  %v2952_v53 = vpop.f32.mrb[78].mxu0 }
 0xa9c   :  { %v3268_v1 = vmul.f32 -1.442695, %v2994_v59  ;;  %v2953_v27 = vpop.f32.mrb[79].mxu0 }
 0xa9d   :  { %v3002_v16 = vmul.f32 %v3705_v26, %v3001_v6 }
 0xa9e   :  { %3706 = vpow2.f32 %v3268_v1 }
 0xa9f   :  { %v3003_v22 = vadd.f32 %v3002_v16, %v2964_v34 }
 0xaa8   :  { %v3707_v30 = vpop.eup %3706 }
 0xaa9   :  { %v2998_v62 = vadd.f32 1.0, %v3707_v30 }
 0xaab   :  { %3708 = vrcp.f32 %v2998_v62 }
 0xaac   :  { %3710 = vtanh.f32 %v3003_v22 }
 0xab5   :  { %v3709_v8 = vpop.eup %3708 }
 0xab6   :  { %v3005_v14 = vsub.f32 1.0, %v3709_v8  ;;  %v3711_v47 = vpop.eup %3710  ;;  %v3007_v10 = vmul.f32 %v3709_v8, %v5847_v35 }
 0xab8   :  { %v3006_v31 = vmul.f32 %v3711_v47, %v3005_v14 }
 0xaba   :  { %v3008_v28 = vadd.f32 %v3007_v10, %v3006_v31 }
 0xabc   :  { %v3011_v7 = vmul.f32 %v6491_v54, %v3008_v28  ;;  %v3016_v21 = vsub.f32 %v3008_v28, %v5847_v35 }
 0xabe   :  { %3012 = vst [vmem:[#allocation14 + $0x8] sm:$0xff] %v3011_v7  ;;  %v3017_v37 = vmul.f32 %v6491_v54, %v3016_v21 }
 0xabf   :  { %4052 = shalt.err (!%p4049_p10)
}
 0xac0   :  { %s4053_s29 = scalar_lea.hbm %s5926_s6, 2048 }
 0xac1   :  { %p4054_p11 = scmp.ne.s32.totalorder %s5926_s6, %s4053_s29  ;;  %p4057_p12 = scmp.lt.u32.totalorder %s4053_s29, %s5926_s6 }
 0xac3   :  { %p4059_p13 = pnand %p4057_p12, %p4054_p11 }
 0xac5   :  { %4062 = shalt.err (!%p4059_p13)
}
 0xac6   :  { %s4112_s11 = smov 256   ;;  %s4113_s3 = smov 16   ;;  %v3018_v46 = vadd.f32 %v3017_v37, %v5847_v35 }
 0xac7   :  { %3032 = dma.vmem_to_hbm [thread:$0]  %s3027_s0, 2048, %s5926_s6, [#allocation5], %s4112_s11, %s4112_s11, %s4113_s3  }
 0xac8   :  { %3020 = vst [vmem:[#allocation15 + $0x8] sm:$0xff] %v3018_v46  ;;  %s4063_s2 = scalar_lea.vmem %s3040_s24, 256  ;;  %p4068_p1 = scmp.lt.s32.totalorder %s3040_s24, %s3040_s24 }
 0xac9   :  { %p4064_p0 = scmp.ne.s32.totalorder %s3040_s24, %s4063_s2  ;;  %p4069_p2 = scmp.lt.s32.totalorder %s4063_s2, %s4063_s2 }
 0xacb   :  { %p4070_p3 = por %p4069_p2, %p4068_p1 }
 0xacd   :  { %p4071_p4 = pnand %p4070_p3, %p4064_p0 }
 0xacf   :  { %4074 = shalt.err (!%p4071_p4)
}
 0xad0   :  { %s4075_s15 = scalar_lea.hbm %s5927_s7, 256 }
 0xad1   :  { %p4076_p5 = scmp.ne.s32.totalorder %s5927_s7, %s4075_s15  ;;  %p4079_p6 = scmp.lt.u32.totalorder %s4075_s15, %s5927_s7 }
 0xad3   :  { %p4081_p7 = pnand %p4079_p6, %p4076_p5 }
 0xad5   :  { %4084 = shalt.err (!%p4081_p7)
}
 0xad6   :  { %3042 = dma.vmem_to_hbm [thread:$0]  %s3040_s24, 256, %s5927_s7, [#allocation16]  }
 0xad7   :  { %4093 = dma.done.wait [#allocation5], 2048  }
 0xad8   :  { %4094 = vsyncadd [#allocation5], 4294965248 }
 0xad9   :  { %4095 = dma.done.wait [#allocation16], 256  }
 0xada   :  { %4096 = vsyncadd [#allocation16], 4294967040 }
 0xadb   :  { %3049 = vsyncpa [#allocation4], 1 }
 0xadc   :  { %3050 = vsyncpa [#allocation7], 1 }
 0xadd   :  { %3051 = vsyncpa [#allocation10], 1 }
 0xade   :  { %3052 = vsyncpa [#allocation13], 1 }
 0xadf   :  { %3053 = vsyncpa [#allocation5], 1 }
 0xae0   :  { %3054 = vsyncpa [#allocation16], 1 }

</bundles_post_ra>
